<compile_context>
chip_gen: v7x
topology: tpu7x:2x2x1
jax: 0.10.0
libtpu: 0.0.40
codegen_flags: <defaults>
</compile_context>

<pallas_src>
import functools

import numpy as np
import jax
import jax.numpy as jnp
from jax import lax
from jax.experimental import pallas as pl
from jax.experimental.pallas import tpu as pltpu


# ---------------------------------------------------------------------------
# Synthetic configuration (small, deterministic)
# ---------------------------------------------------------------------------
NUM_CLASS = 4
NUM_HEADING_BIN = 2
NUM_SIZE_CLUSTER = 4
NUM_PROPOSAL = 16          # npoint of the vote aggregation SA module
SEED_FEAT_DIM = 256        # torch default seed_feat_dim
NSAMPLE = 16               # ball-query nsample (multiple of 8 -> aligned max-pool)
RADIUS = 0.3               # ball-query radius (normalize_xyz=True divides by it)
HID = 128                  # SA-MLP / proposal hidden width
OUT_CH = 2 + 3 + NUM_HEADING_BIN * 2 + NUM_SIZE_CLUSTER * 4 + NUM_CLASS  # = 29
OUT_PAD = 128              # lane-pad the head output (sliced later)
BN_EPS = 1e-5
CIN = 3 + SEED_FEAT_DIM    # use_xyz=True -> xyz channels are rows 0..2 of w1

# Packed bf16 weight slab row offsets (all multiples of the 16-row bf16 tile).
O_W1F = 0                              # layer-1 weight, seed-feature rows
O_W2 = O_W1F + SEED_FEAT_DIM           # 256
O_W3 = O_W2 + HID                      # 384
O_PW1 = O_W3 + HID                     # 512
O_PW2 = O_PW1 + HID                    # 640
O_PW3 = O_PW2 + HID                    # 768
W_ROWS = O_PW3 + HID                   # 896

# Packed f32 slab rows (xyz weight rows stay f32: they run on the VPU, which
# has no bf16 path on v5e).
SB_WXYZ = 0                            # rows 0..2: layer-1 xyz weight rows
SB_S1, SB_B1 = 3, 4
SB_S2, SB_B2 = 5, 6
SB_S3, SB_B3 = 7, 8
SB_PS1, SB_PB1 = 9, 10
SB_PS2, SB_PB2 = 11, 12
SB_PB3 = 13
SB_ROWS = 14

# Per-pipeline-buffer budget for the big bf16 feature block.  Conservative for
# all of v5e/v6e/v7x default scoped VMEM (16/32/32 MiB) with double buffering.
# TODO(synk): derive from pltpu.get_tpu_info().vmem_capacity_bytes at realistic
# sizes and raise vmem_limit_bytes accordingly.
X_BLOCK_BUDGET_BYTES = 8 * 1024 * 1024


# ---------------------------------------------------------------------------
# Pallas kernel: fused SA-MLP + max-pool + proposal head
# ---------------------------------------------------------------------------
def _fused_kernel(xyz_ref, feat_ref, w_ref, sb_ref, feat_out_ref, score_ref,
                  *, tn, nsample):
    # xyz_ref : (tn*nsample, 8)  f32  normalized grouped xyz (cols 0..2 valid)
    # feat_ref: (tn*nsample, 256) bf16 grouped seed features
    # w_ref   : (896, 128) bf16  [w1_feat | w2 | w3 | pw1 | pw2 | pw3]
    # sb_ref  : (14, 128)  f32   [w1_xyz(3) | s1 b1 s2 b2 s3 b3 ps1 pb1 ps2 pb2 | pb3]
    sb = sb_ref[...]
    x = feat_ref[...]
    xyz = xyz_ref[...]

    def row(i):
        return sb[i:i + 1, :]

    # --- Shared PointNet MLP layer 1: MXU matmul on seed features (K=256) ---
    h = jnp.dot(x, w_ref[O_W1F:O_W1F + SEED_FEAT_DIM, :],
                preferred_element_type=jnp.float32)
    # xyz contribution: 3 VPU broadcast-FMAs, hidden under the MXU.
    h = h + (xyz[:, 0:1] * row(SB_WXYZ)
             + xyz[:, 1:2] * row(SB_WXYZ + 1)
             + xyz[:, 2:3] * row(SB_WXYZ + 2))
    h = jnp.maximum(h * row(SB_S1) + row(SB_B1), 0.0)

    # --- layers 2 & 3 (Conv2d 1x1 + folded BN + ReLU) ---
    h = jnp.dot(h.astype(jnp.bfloat16), w_ref[O_W2:O_W2 + HID, :],
                preferred_element_type=jnp.float32)
    h = jnp.maximum(h * row(SB_S2) + row(SB_B2), 0.0)
    h = jnp.dot(h.astype(jnp.bfloat16), w_ref[O_W3:O_W3 + HID, :],
                preferred_element_type=jnp.float32)
    h = jnp.maximum(h * row(SB_S3) + row(SB_B3), 0.0)      # (tn*nsample, HID)

    # --- max-pool over the nsample neighbourhood (aligned sublane reduce) ---
    feat = jnp.max(h.reshape(tn, nsample, HID), axis=1)     # (tn, HID)
    feat_out_ref[...] = feat

    # --- proposal head: Conv1d(128,128,bias=False)+BN+ReLU x2, Conv1d(128,OUT) ---
    g = jnp.dot(feat.astype(jnp.bfloat16), w_ref[O_PW1:O_PW1 + HID, :],
                preferred_element_type=jnp.float32)
    g = jnp.maximum(g * row(SB_PS1) + row(SB_PB1), 0.0)
    g = jnp.dot(g.astype(jnp.bfloat16), w_ref[O_PW2:O_PW2 + HID, :],
                preferred_element_type=jnp.float32)
    g = jnp.maximum(g * row(SB_PS2) + row(SB_PB2), 0.0)
    score_ref[...] = (jnp.dot(g.astype(jnp.bfloat16), w_ref[O_PW3:O_PW3 + HID, :],
                              preferred_element_type=jnp.float32)
                      + row(SB_PB3))


def _pick_steps(n):
    """Smallest grid-step count whose per-step bf16 feature block fits the VMEM
    budget, with tn = n // steps a multiple of 8 so reshapes / max-pool stay
    layout-preserving.  At the synthetic size this is always 1 (the grid is a
    serial loop on single-TC parts; extra steps are pure overhead)."""
    for steps in range(1, n + 1):
        if n % steps:
            continue
        tn = n // steps
        if tn % 8 and tn != 1:
            continue
        if tn * NSAMPLE * SEED_FEAT_DIM * 2 <= X_BLOCK_BUDGET_BYTES:
            return steps
    return n


def run_fused(xyz_flat, feat_flat, packed):
    """xyz_flat: (B*P*S, 8) f32; feat_flat: (B*P*S, 256) bf16; packed = (w, sb)."""
    w, sb = packed
    rows = feat_flat.shape[0]
    n = rows // NSAMPLE                      # = B * NUM_PROPOSAL
    steps = _pick_steps(n)
    tn = n // steps

    kernel = functools.partial(_fused_kernel, tn=tn, nsample=NSAMPLE)

    def weight_spec(shape):
        if steps > 1:
            # Grid-invariant operands: skip the second buffer / redundant
            # prefetch wave when the grid actually iterates.
            return pl.BlockSpec(shape, lambda i: (0, 0),
                                pipeline_mode=pl.Buffered(1))
        return pl.BlockSpec(shape, lambda i: (0, 0))

    feats, scores = pl.pallas_call(
        kernel,
        out_shape=(jax.ShapeDtypeStruct((n, HID), jnp.float32),
                   jax.ShapeDtypeStruct((n, OUT_PAD), jnp.float32)),
        grid=(steps,),
        in_specs=[
            pl.BlockSpec((tn * NSAMPLE, 8), lambda i: (i, 0)),
            pl.BlockSpec((tn * NSAMPLE, SEED_FEAT_DIM), lambda i: (i, 0)),
            weight_spec((W_ROWS, HID)),
            weight_spec((SB_ROWS, HID)),
        ],
        out_specs=(pl.BlockSpec((tn, HID), lambda i: (i, 0)),
                   pl.BlockSpec((tn, OUT_PAD), lambda i: (i, 0))),
        compiler_params=pltpu.CompilerParams(
            dimension_semantics=("arbitrary",)),
    )(xyz_flat, feat_flat, w, sb)
    return feats, scores


def fused_reference(xyz_flat, feat_flat, packed):
    """Pure-JAX reference for the fused kernel (bf16 operands, f32 accumulate)."""
    w, sb = packed
    wf = w.astype(jnp.float32)

    def bf(v):                     # emulate the bf16 operand cast
        return v.astype(jnp.bfloat16).astype(jnp.float32)

    h = bf(feat_flat) @ wf[O_W1F:O_W1F + SEED_FEAT_DIM]
    h = h + (xyz_flat[:, 0:1] * sb[SB_WXYZ:SB_WXYZ + 1]
             + xyz_flat[:, 1:2] * sb[SB_WXYZ + 1:SB_WXYZ + 2]
             + xyz_flat[:, 2:3] * sb[SB_WXYZ + 2:SB_WXYZ + 3])
    h = jnp.maximum(h * sb[SB_S1:SB_S1 + 1] + sb[SB_B1:SB_B1 + 1], 0.0)
    h = jnp.maximum(bf(h) @ wf[O_W2:O_W2 + HID]
                    * sb[SB_S2:SB_S2 + 1] + sb[SB_B2:SB_B2 + 1], 0.0)
    h = jnp.maximum(bf(h) @ wf[O_W3:O_W3 + HID]
                    * sb[SB_S3:SB_S3 + 1] + sb[SB_B3:SB_B3 + 1], 0.0)
    n = feat_flat.shape[0] // NSAMPLE
    feat = jnp.max(h.reshape(n, NSAMPLE, HID), axis=1)
    g = jnp.maximum(bf(feat) @ wf[O_PW1:O_PW1 + HID]
                    * sb[SB_PS1:SB_PS1 + 1] + sb[SB_PB1:SB_PB1 + 1], 0.0)
    g = jnp.maximum(bf(g) @ wf[O_PW2:O_PW2 + HID]
                    * sb[SB_PS2:SB_PS2 + 1] + sb[SB_PB2:SB_PB2 + 1], 0.0)
    return feat, bf(g) @ wf[O_PW3:O_PW3 + HID] + sb[SB_PB3:SB_PB3 + 1]


# ---------------------------------------------------------------------------
# Plain-JAX glue: FPS, ball query, grouping (data-dependent gathers)
# ---------------------------------------------------------------------------
def furthest_point_sample(xyz, npoint):
    """xyz: (B, K, 3) -> (B, npoint) int32 (pointnet2 convention: start at 0)."""
    B, K, _ = xyz.shape

    def body(i, state):
        inds, dists, farthest = state
        inds = inds.at[:, i].set(farthest)
        centroid = jnp.take_along_axis(xyz, farthest[:, None, None], axis=1)  # (B,1,3)
        d = jnp.sum((xyz - centroid) ** 2, axis=-1)                           # (B,K)
        dists = jnp.minimum(dists, d)
        farthest = jnp.argmax(dists, axis=-1).astype(jnp.int32)
        return inds, dists, farthest

    inds0 = jnp.zeros((B, npoint), jnp.int32)
    dists0 = jnp.full((B, K), 1e10, jnp.float32)
    far0 = jnp.zeros((B,), jnp.int32)
    inds, _, _ = lax.fori_loop(0, npoint, body, (inds0, dists0, far0))
    return inds


def ball_query(radius, nsample, xyz, new_xyz):
    """xyz (B,K,3), new_xyz (B,P,3) -> (B,P,nsample) int32, first-hit filled."""
    # NOTE: centers come from xyz itself so every ball has >=1 point (dist 0).
    K = xyz.shape[1]
    sqd = jnp.sum((new_xyz[:, :, None, :] - xyz[:, None, :, :]) ** 2, axis=-1)
    in_ball = sqd < radius ** 2
    idx = jnp.where(in_ball, jnp.arange(K, dtype=jnp.int32)[None, None, :],
                    jnp.int32(K))
    idx = jnp.sort(idx, axis=-1)[:, :, :nsample]
    first = idx[:, :, :1]
    idx = jnp.where(idx == K, first, idx)
    return idx


def gather_points(points, idx):
    """points (B,K,D), idx (B,P,S) -> (B,P,S,D)."""
    B, P, S = idx.shape
    flat = idx.reshape(B, P * S)
    out = jnp.take_along_axis(points, flat[..., None], axis=1)
    return out.reshape(B, P, S, points.shape[-1])


def build_grouped(xyz, features):
    """Vote aggregation front-end: FPS + ball query + grouping (use_xyz, normalize_xyz).

    Seed features are cast to bf16 BEFORE the gather so the kernel's biggest
    input is produced directly in bf16 (no extra HBM cast pass); the tiny xyz
    block stays f32 for the VPU path."""
    B = xyz.shape[0]
    fps_inds = furthest_point_sample(xyz, NUM_PROPOSAL)                # (B,P)
    new_xyz = jnp.take_along_axis(xyz, fps_inds[..., None], axis=1)    # (B,P,3)
    idx = ball_query(RADIUS, NSAMPLE, xyz, new_xyz)                    # (B,P,S)
    feat_t = jnp.transpose(features, (0, 2, 1)).astype(jnp.bfloat16)   # (B,K,C) bf16
    grouped_xyz = (gather_points(xyz, idx) - new_xyz[:, :, None, :]) / RADIUS
    grouped_feat = gather_points(feat_t, idx)                          # (B,P,S,C) bf16
    rows = B * NUM_PROPOSAL * NSAMPLE
    xyz_flat = jnp.pad(grouped_xyz, ((0, 0), (0, 0), (0, 0), (0, 5)))  # 3 -> 8 cols
    xyz_flat = xyz_flat.reshape(rows, 8)                               # f32
    feat_flat = grouped_feat.reshape(rows, SEED_FEAT_DIM)              # bf16
    return xyz_flat, feat_flat, new_xyz, fps_inds


# ---------------------------------------------------------------------------
# decode_scores / decode_pred_box (plain JAX glue, same semantics as torch)
# ---------------------------------------------------------------------------
def decode_pred_box(data_dict, mean_size_arr):
    # TODO(synk): DC.param2obb_batch / get_3d_box_batch live in external ScanRefer
    # utils; re-implemented here with the VoteNet convention (class2angle/size,
    # heading negated in param2obb, roty corner boxes).
    center = data_dict['center']
    heading_cls = jnp.argmax(data_dict['heading_scores'], axis=-1)          # (B,P)
    heading_res = jnp.take_along_axis(data_dict['heading_residuals'],
                                      heading_cls[..., None], axis=2)[..., 0]
    size_cls = jnp.argmax(data_dict['size_scores'], axis=-1)                # (B,P)
    size_res = jnp.take_along_axis(data_dict['size_residuals'],
                                   size_cls[..., None, None], axis=2)[:, :, 0, :]
    angle_per_class = 2.0 * np.pi / NUM_HEADING_BIN
    heading = heading_cls.astype(jnp.float32) * angle_per_class + heading_res
    heading = jnp.where(heading > np.pi, heading - 2.0 * np.pi, heading)
    heading = -heading                                                       # param2obb
    box_size = mean_size_arr[size_cls] + size_res                            # (B,P,3)

    l, w, h = box_size[..., 0], box_size[..., 1], box_size[..., 2]
    x_c = jnp.stack([l, l, -l, -l, l, l, -l, -l], axis=-1) / 2.0
    y_c = jnp.stack([h, h, h, h, -h, -h, -h, -h], axis=-1) / 2.0
    z_c = jnp.stack([w, -w, -w, w, w, -w, -w, w], axis=-1) / 2.0
    corners = jnp.stack([x_c, y_c, z_c], axis=-1)                            # (B,P,8,3)
    c, s = jnp.cos(heading), jnp.sin(heading)
    zer, one = jnp.zeros_like(c), jnp.ones_like(c)
    R = jnp.stack([jnp.stack([c, zer, s], -1),
                   jnp.stack([zer, one, zer], -1),
                   jnp.stack([-s, zer, c], -1)], axis=-2)                    # (B,P,3,3)
    corners = jnp.matmul(corners, jnp.swapaxes(R, -1, -2))
    corners = corners + center[:, :, None, :]
    return corners                                                           # (B,P,8,3)


def decode_scores(net, data_dict, mean_size_arr):
    B, P, _ = net.shape
    NH, NS = NUM_HEADING_BIN, NUM_SIZE_CLUSTER
    objectness_scores = net[:, :, 0:2]
    base_xyz = data_dict['aggregated_vote_xyz']
    center = base_xyz + net[:, :, 2:5]
    heading_scores = net[:, :, 5:5 + NH]
    heading_residuals_normalized = net[:, :, 5 + NH:5 + 2 * NH]
    size_scores = net[:, :, 5 + 2 * NH:5 + 2 * NH + NS]
    size_residuals_normalized = net[:, :, 5 + 2 * NH + NS:
                                    5 + 2 * NH + 4 * NS].reshape(B, P, NS, 3)
    sem_cls_scores = net[:, :, 5 + 2 * NH + 4 * NS:]

    data_dict['objectness_scores'] = objectness_scores
    data_dict['center'] = center
    data_dict['heading_scores'] = heading_scores
    data_dict['heading_residuals_normalized'] = heading_residuals_normalized
    data_dict['heading_residuals'] = heading_residuals_normalized * (np.pi / NH)
    data_dict['size_scores'] = size_scores
    data_dict['size_residuals_normalized'] = size_residuals_normalized
    data_dict['size_residuals'] = (size_residuals_normalized
                                   * mean_size_arr[None, None, :, :])
    data_dict['sem_cls_scores'] = sem_cls_scores
    data_dict['bbox_center'] = center
    data_dict['bbox_corner'] = decode_pred_box(data_dict, mean_size_arr)
    data_dict['bbox_feature'] = data_dict['aggregated_vote_features']
    data_dict['bbox_mask'] = jnp.argmax(objectness_scores, axis=-1)
    data_dict['bbox_sems'] = jnp.argmax(sem_cls_scores, axis=-1)
    return data_dict


# ---------------------------------------------------------------------------
# Full forward (use_contextual_aggregation=False path)
# ---------------------------------------------------------------------------
# TODO(synk): ContextualAggregationModule is an external module; only the
# default (use_contextual_aggregation=False) branch is implemented.
def proposal_module_forward(xyz, features, packed, mean_size_arr):
    B = xyz.shape[0]
    data_dict = {}
    xyz_flat, feat_flat, new_xyz, fps_inds = build_grouped(xyz, features)
    feats, scores = run_fused(xyz_flat, feat_flat, packed)
    feats = feats.reshape(B, NUM_PROPOSAL, HID)                     # (B,P,128)
    net = scores[:, :OUT_CH].reshape(B, NUM_PROPOSAL, OUT_CH)       # (B,P,OUT_CH)

    data_dict['aggregated_vote_xyz'] = new_xyz
    data_dict['aggregated_vote_features'] = feats                   # == permute(0,2,1)
    data_dict['aggregated_vote_inds'] = fps_inds
    data_dict = decode_scores(net, data_dict, mean_size_arr)
    return data_dict


# ---------------------------------------------------------------------------
# Deterministic parameter init (eval-mode BN folded into scale / bias) + packing
# ---------------------------------------------------------------------------
def init_params(key):
    keys = jax.random.split(key, 12)

    def conv_w(k, cin, cout):
        return (jax.random.normal(k, (cin, cout), jnp.float32)
                / np.sqrt(cin)).astype(jnp.float32)

    def folded_bn(k, c):
        k1, k2, k3, k4 = jax.random.split(k, 4)
        gamma = 1.0 + 0.1 * jax.random.normal(k1, (c,), jnp.float32)
        beta = 0.1 * jax.random.normal(k2, (c,), jnp.float32)
        mean = 0.1 * jax.random.normal(k3, (c,), jnp.float32)
        var = 1.0 + 0.1 * jnp.abs(jax.random.normal(k4, (c,), jnp.float32))
        scale = gamma / jnp.sqrt(var + BN_EPS)
        bias = beta - mean * scale
        return scale.reshape(1, c), bias.reshape(1, c)

    # SA-module shared MLP: [CIN -> 128 -> 128 -> 128], Conv2d(1x1)+BN2d+ReLU.
    # w1 rows 0..2 act on the normalized xyz channels, rows 3.. on seed feats.
    w1 = conv_w(keys[0], CIN, HID)
    s1, b1 = folded_bn(keys[1], HID)
    w2 = conv_w(keys[2], HID, HID)
    s2, b2 = folded_bn(keys[3], HID)
    w3 = conv_w(keys[4], HID, HID)
    s3, b3 = folded_bn(keys[5], HID)

    # Proposal head: Conv1d(128,128,bias=False)+BN+ReLU x2, Conv1d(128,OUT_CH).
    pw1 = conv_w(keys[6], HID, HID)
    ps1, pb1 = folded_bn(keys[7], HID)
    pw2 = conv_w(keys[8], HID, HID)
    ps2, pb2 = folded_bn(keys[9], HID)
    pw3 = conv_w(keys[10], HID, OUT_CH)
    pb3 = 0.1 * jax.random.normal(keys[11], (OUT_CH,), jnp.float32)

    return (w1, s1, b1, w2, s2, b2, w3, s3, b3,
            pw1, ps1, pb1, pw2, ps2, pb2, pw3, pb3)


def pack_params(raw):
    """Pack 17 separate params into 2 kernel operands (bf16 weights, f32 rest)."""
    (w1, s1, b1, w2, s2, b2, w3, s3, b3,
     pw1, ps1, pb1, pw2, ps2, pb2, pw3, pb3) = raw
    pw3p = jnp.concatenate(
        [pw3, jnp.zeros((HID, OUT_PAD - OUT_CH), jnp.float32)], axis=1)
    pb3p = jnp.concatenate(
        [pb3, jnp.zeros((OUT_PAD - OUT_CH,), jnp.float32)]).reshape(1, OUT_PAD)
    w = jnp.concatenate([w1[3:], w2, w3, pw1, pw2, pw3p],
                        axis=0).astype(jnp.bfloat16)                 # (896, 128)
    sb = jnp.concatenate([w1[0:3], s1, b1, s2, b2, s3, b3,
                          ps1, pb1, ps2, pb2, pb3p], axis=0)          # (14, 128) f32
    assert w.shape == (W_ROWS, HID) and sb.shape == (SB_ROWS, HID)
    return (w, sb)


# ---------------------------------------------------------------------------
if __name__ == "__main__":
    key = jax.random.PRNGKey(0)
    kx, kf, kp = jax.random.split(key, 3)

    B, K = 2, 64
    xyz = jax.random.uniform(kx, (B, K, 3), jnp.float32) * 2.0            # (B,K,3)
    features = jax.random.normal(kf, (B, SEED_FEAT_DIM, K), jnp.float32)  # (B,C,K)
    raw_params = init_params(kp)
    packed = pack_params(raw_params)
    mean_size_arr = (0.3 + 0.1 * jnp.arange(NUM_SIZE_CLUSTER * 3,
                                            dtype=jnp.float32)).reshape(NUM_SIZE_CLUSTER, 3)

    # Correctness check of the fused Pallas kernel against a pure-JAX reference.
    xyz_flat, feat_flat, _, _ = build_grouped(xyz, features)
    feats_k, scores_k = run_fused(xyz_flat, feat_flat, packed)
    feats_r, scores_r = fused_reference(xyz_flat, feat_flat, packed)
    jax.block_until_ready((feats_k, scores_k))
    np.testing.assert_allclose(np.asarray(feats_k), np.asarray(feats_r),
                               rtol=2e-2, atol=2e-2)
    np.testing.assert_allclose(np.asarray(scores_k), np.asarray(scores_r),
                               rtol=2e-2, atol=2e-2)

    # Full forward pass.
    data_dict = proposal_module_forward(xyz, features, packed, mean_size_arr)
    jax.block_until_ready(jax.tree_util.tree_leaves(data_dict))

    # Shape sanity checks mirroring the torch module.
    assert data_dict['objectness_scores'].shape == (B, NUM_PROPOSAL, 2)
    assert data_dict['center'].shape == (B, NUM_PROPOSAL, 3)
    assert data_dict['heading_scores'].shape == (B, NUM_PROPOSAL, NUM_HEADING_BIN)
    assert data_dict['size_residuals'].shape == (B, NUM_PROPOSAL, NUM_SIZE_CLUSTER, 3)
    assert data_dict['sem_cls_scores'].shape == (B, NUM_PROPOSAL, NUM_CLASS)
    assert data_dict['bbox_corner'].shape == (B, NUM_PROPOSAL, 8, 3)
    assert data_dict['bbox_feature'].shape == (B, NUM_PROPOSAL, HID)
    assert all(bool(jnp.all(jnp.isfinite(v))) for v in
               jax.tree_util.tree_leaves(data_dict)
               if jnp.issubdtype(v.dtype, jnp.floating))

    print("KERNEL_OK")
</pallas_src>

<mosaic_0001>
module attributes {stable_mosaic.version = 11 : i64} {
  func.func @_fused_kernel(%arg0: i32, %arg1: memref<512x8xf32, #tpu.memory_space<vmem>>, %arg2: memref<512x256xbf16, #tpu.memory_space<vmem>>, %arg3: memref<896x128xbf16, #tpu.memory_space<vmem>>, %arg4: memref<14x128xf32, #tpu.memory_space<vmem>>, %arg5: memref<32x128xf32, #tpu.memory_space<vmem>>, %arg6: memref<32x128xf32, #tpu.memory_space<vmem>>) attributes {dimension_semantics = [#tpu.dimension_semantics<arbitrary>], iteration_bounds = array<i64: 1>, scalar_prefetch = 0 : i64, scratch_operands = 0 : i64, tpu.core_type = #tpu.core_type<tc>, window_params = [{transform_indices = @transform_0, window_bounds = array<i64: 512, 8>}, {transform_indices = @transform_1, window_bounds = array<i64: 512, 256>}, {pipeline_mode = #tpu.pipeline_mode<synchronous>, transform_indices = @transform_2, window_bounds = array<i64: 896, 128>}, {pipeline_mode = #tpu.pipeline_mode<synchronous>, transform_indices = @transform_3, window_bounds = array<i64: 14, 128>}, {transform_indices = @transform_4, window_bounds = array<i64: 32, 128>}, {transform_indices = @transform_5, window_bounds = array<i64: 32, 128>}]} {
    %c0 = arith.constant 0 : index
    %c0_0 = arith.constant 0 : index
    %0 = vector.load %arg4[%c0, %c0_0] : memref<14x128xf32, #tpu.memory_space<vmem>>, vector<14x128xf32>
    %c0_1 = arith.constant 0 : index
    %c0_2 = arith.constant 0 : index
    %1 = vector.load %arg2[%c0_1, %c0_2] : memref<512x256xbf16, #tpu.memory_space<vmem>>, vector<512x256xbf16>
    %c0_3 = arith.constant 0 : index
    %c0_4 = arith.constant 0 : index
    %2 = vector.load %arg1[%c0_3, %c0_4] : memref<512x8xf32, #tpu.memory_space<vmem>>, vector<512x8xf32>
    %c0_5 = arith.constant 0 : index
    %c0_6 = arith.constant 0 : index
    %3 = vector.load %arg3[%c0_5, %c0_6] : memref<896x128xbf16, #tpu.memory_space<vmem>>, vector<256x128xbf16>
    %cst = arith.constant dense<0.000000e+00> : vector<512x128xf32>
    %4 = tpu.matmul %1, %3, %cst {dimension_numbers = #tpu.dot_dimension_numbers<[1], [0], [0], [1], [0, 0, 1, 1], [], []>} : vector<512x256xbf16>, vector<256x128xbf16>, vector<512x128xf32> -> vector<512x128xf32>
    %5 = vector.extract_strided_slice %2 {offsets = [0, 0], sizes = [512, 1], strides = [1, 1]} : vector<512x8xf32> to vector<512x1xf32>
    %6 = vector.extract_strided_slice %0 {offsets = [0, 0], sizes = [1, 128], strides = [1, 1]} : vector<14x128xf32> to vector<1x128xf32>
    %7 = vector.broadcast %5 : vector<512x1xf32> to vector<512x128xf32>
    %8 = vector.broadcast %6 : vector<1x128xf32> to vector<512x128xf32>
    %9 = arith.mulf %7, %8 : vector<512x128xf32>
    %10 = vector.extract_strided_slice %2 {offsets = [0, 1], sizes = [512, 1], strides = [1, 1]} : vector<512x8xf32> to vector<512x1xf32>
    %11 = vector.extract_strided_slice %0 {offsets = [1, 0], sizes = [1, 128], strides = [1, 1]} : vector<14x128xf32> to vector<1x128xf32>
    %12 = vector.broadcast %10 : vector<512x1xf32> to vector<512x128xf32>
    %13 = vector.broadcast %11 : vector<1x128xf32> to vector<512x128xf32>
    %14 = arith.mulf %12, %13 : vector<512x128xf32>
    %15 = arith.addf %9, %14 : vector<512x128xf32>
    %16 = vector.extract_strided_slice %2 {offsets = [0, 2], sizes = [512, 1], strides = [1, 1]} : vector<512x8xf32> to vector<512x1xf32>
    %17 = vector.extract_strided_slice %0 {offsets = [2, 0], sizes = [1, 128], strides = [1, 1]} : vector<14x128xf32> to vector<1x128xf32>
    %18 = vector.broadcast %16 : vector<512x1xf32> to vector<512x128xf32>
    %19 = vector.broadcast %17 : vector<1x128xf32> to vector<512x128xf32>
    %20 = arith.mulf %18, %19 : vector<512x128xf32>
    %21 = arith.addf %15, %20 : vector<512x128xf32>
    %22 = arith.addf %4, %21 : vector<512x128xf32>
    %23 = vector.extract_strided_slice %0 {offsets = [3, 0], sizes = [1, 128], strides = [1, 1]} : vector<14x128xf32> to vector<1x128xf32>
    %24 = vector.broadcast %23 : vector<1x128xf32> to vector<512x128xf32>
    %25 = arith.mulf %22, %24 : vector<512x128xf32>
    %26 = vector.extract_strided_slice %0 {offsets = [4, 0], sizes = [1, 128], strides = [1, 1]} : vector<14x128xf32> to vector<1x128xf32>
    %27 = vector.broadcast %26 : vector<1x128xf32> to vector<512x128xf32>
    %28 = arith.addf %25, %27 : vector<512x128xf32>
    %cst_7 = arith.constant 0.000000e+00 : f32
    %29 = vector.broadcast %cst_7 : f32 to vector<512x128xf32>
    %30 = arith.maximumf %28, %29 : vector<512x128xf32>
    %31 = arith.truncf %30 : vector<512x128xf32> to vector<512x128xbf16>
    %c256 = arith.constant 256 : index
    %c0_8 = arith.constant 0 : index
    %32 = vector.load %arg3[%c256, %c0_8] : memref<896x128xbf16, #tpu.memory_space<vmem>>, vector<128x128xbf16>
    %cst_9 = arith.constant dense<0.000000e+00> : vector<512x128xf32>
    %33 = tpu.matmul %31, %32, %cst_9 {dimension_numbers = #tpu.dot_dimension_numbers<[1], [0], [0], [1], [0, 0, 1, 1], [], []>} : vector<512x128xbf16>, vector<128x128xbf16>, vector<512x128xf32> -> vector<512x128xf32>
    %34 = vector.extract_strided_slice %0 {offsets = [5, 0], sizes = [1, 128], strides = [1, 1]} : vector<14x128xf32> to vector<1x128xf32>
    %35 = vector.broadcast %34 : vector<1x128xf32> to vector<512x128xf32>
    %36 = arith.mulf %33, %35 : vector<512x128xf32>
    %37 = vector.extract_strided_slice %0 {offsets = [6, 0], sizes = [1, 128], strides = [1, 1]} : vector<14x128xf32> to vector<1x128xf32>
    %38 = vector.broadcast %37 : vector<1x128xf32> to vector<512x128xf32>
    %39 = arith.addf %36, %38 : vector<512x128xf32>
    %cst_10 = arith.constant 0.000000e+00 : f32
    %40 = vector.broadcast %cst_10 : f32 to vector<512x128xf32>
    %41 = arith.maximumf %39, %40 : vector<512x128xf32>
    %42 = arith.truncf %41 : vector<512x128xf32> to vector<512x128xbf16>
    %c384 = arith.constant 384 : index
    %c0_11 = arith.constant 0 : index
    %43 = vector.load %arg3[%c384, %c0_11] : memref<896x128xbf16, #tpu.memory_space<vmem>>, vector<128x128xbf16>
    %cst_12 = arith.constant dense<0.000000e+00> : vector<512x128xf32>
    %44 = tpu.matmul %42, %43, %cst_12 {dimension_numbers = #tpu.dot_dimension_numbers<[1], [0], [0], [1], [0, 0, 1, 1], [], []>} : vector<512x128xbf16>, vector<128x128xbf16>, vector<512x128xf32> -> vector<512x128xf32>
    %45 = vector.extract_strided_slice %0 {offsets = [7, 0], sizes = [1, 128], strides = [1, 1]} : vector<14x128xf32> to vector<1x128xf32>
    %46 = vector.broadcast %45 : vector<1x128xf32> to vector<512x128xf32>
    %47 = arith.mulf %44, %46 : vector<512x128xf32>
    %48 = vector.extract_strided_slice %0 {offsets = [8, 0], sizes = [1, 128], strides = [1, 1]} : vector<14x128xf32> to vector<1x128xf32>
    %49 = vector.broadcast %48 : vector<1x128xf32> to vector<512x128xf32>
    %50 = arith.addf %47, %49 : vector<512x128xf32>
    %cst_13 = arith.constant 0.000000e+00 : f32
    %51 = vector.broadcast %cst_13 : f32 to vector<512x128xf32>
    %52 = arith.maximumf %50, %51 : vector<512x128xf32>
    %53 = vector.shape_cast %52 : vector<512x128xf32> to vector<32x16x128xf32>
    %cst_14 = arith.constant dense<0xFF800000> : vector<32x128xf32>
    %54 = vector.multi_reduction <maximumf>, %53, %cst_14 [1] : vector<32x16x128xf32> to vector<32x128xf32>
    %c0_15 = arith.constant 0 : index
    %c0_16 = arith.constant 0 : index
    %55 = vector.load %arg5[%c0_15, %c0_16] : memref<32x128xf32, #tpu.memory_space<vmem>>, vector<32x128xf32>
    tpu.vector_store %arg5[%c0_15, %c0_16], %54 {strides = array<i32>} : memref<32x128xf32, #tpu.memory_space<vmem>>, vector<32x128xf32>,
    %56 = arith.truncf %54 : vector<32x128xf32> to vector<32x128xbf16>
    %c512 = arith.constant 512 : index
    %c0_17 = arith.constant 0 : index
    %57 = vector.load %arg3[%c512, %c0_17] : memref<896x128xbf16, #tpu.memory_space<vmem>>, vector<128x128xbf16>
    %cst_18 = arith.constant dense<0.000000e+00> : vector<32x128xf32>
    %58 = tpu.matmul %56, %57, %cst_18 {dimension_numbers = #tpu.dot_dimension_numbers<[1], [0], [0], [1], [0, 0, 1, 1], [], []>} : vector<32x128xbf16>, vector<128x128xbf16>, vector<32x128xf32> -> vector<32x128xf32>
    %59 = vector.extract_strided_slice %0 {offsets = [9, 0], sizes = [1, 128], strides = [1, 1]} : vector<14x128xf32> to vector<1x128xf32>
    %60 = vector.broadcast %59 : vector<1x128xf32> to vector<32x128xf32>
    %61 = arith.mulf %58, %60 : vector<32x128xf32>
    %62 = vector.extract_strided_slice %0 {offsets = [10, 0], sizes = [1, 128], strides = [1, 1]} : vector<14x128xf32> to vector<1x128xf32>
    %63 = vector.broadcast %62 : vector<1x128xf32> to vector<32x128xf32>
    %64 = arith.addf %61, %63 : vector<32x128xf32>
    %cst_19 = arith.constant 0.000000e+00 : f32
    %65 = vector.broadcast %cst_19 : f32 to vector<32x128xf32>
    %66 = arith.maximumf %64, %65 : vector<32x128xf32>
    %67 = arith.truncf %66 : vector<32x128xf32> to vector<32x128xbf16>
    %c640 = arith.constant 640 : index
    %c0_20 = arith.constant 0 : index
    %68 = vector.load %arg3[%c640, %c0_20] : memref<896x128xbf16, #tpu.memory_space<vmem>>, vector<128x128xbf16>
    %cst_21 = arith.constant dense<0.000000e+00> : vector<32x128xf32>
    %69 = tpu.matmul %67, %68, %cst_21 {dimension_numbers = #tpu.dot_dimension_numbers<[1], [0], [0], [1], [0, 0, 1, 1], [], []>} : vector<32x128xbf16>, vector<128x128xbf16>, vector<32x128xf32> -> vector<32x128xf32>
    %70 = vector.extract_strided_slice %0 {offsets = [11, 0], sizes = [1, 128], strides = [1, 1]} : vector<14x128xf32> to vector<1x128xf32>
    %71 = vector.broadcast %70 : vector<1x128xf32> to vector<32x128xf32>
    %72 = arith.mulf %69, %71 : vector<32x128xf32>
    %73 = vector.extract_strided_slice %0 {offsets = [12, 0], sizes = [1, 128], strides = [1, 1]} : vector<14x128xf32> to vector<1x128xf32>
    %74 = vector.broadcast %73 : vector<1x128xf32> to vector<32x128xf32>
    %75 = arith.addf %72, %74 : vector<32x128xf32>
    %cst_22 = arith.constant 0.000000e+00 : f32
    %76 = vector.broadcast %cst_22 : f32 to vector<32x128xf32>
    %77 = arith.maximumf %75, %76 : vector<32x128xf32>
    %78 = arith.truncf %77 : vector<32x128xf32> to vector<32x128xbf16>
    %c768 = arith.constant 768 : index
    %c0_23 = arith.constant 0 : index
    %79 = vector.load %arg3[%c768, %c0_23] : memref<896x128xbf16, #tpu.memory_space<vmem>>, vector<128x128xbf16>
    %cst_24 = arith.constant dense<0.000000e+00> : vector<32x128xf32>
    %80 = tpu.matmul %78, %79, %cst_24 {dimension_numbers = #tpu.dot_dimension_numbers<[1], [0], [0], [1], [0, 0, 1, 1], [], []>} : vector<32x128xbf16>, vector<128x128xbf16>, vector<32x128xf32> -> vector<32x128xf32>
    %81 = vector.extract_strided_slice %0 {offsets = [13, 0], sizes = [1, 128], strides = [1, 1]} : vector<14x128xf32> to vector<1x128xf32>
    %82 = vector.broadcast %81 : vector<1x128xf32> to vector<32x128xf32>
    %83 = arith.addf %80, %82 : vector<32x128xf32>
    %c0_25 = arith.constant 0 : index
    %c0_26 = arith.constant 0 : index
    %84 = vector.load %arg6[%c0_25, %c0_26] : memref<32x128xf32, #tpu.memory_space<vmem>>, vector<32x128xf32>
    tpu.vector_store %arg6[%c0_25, %c0_26], %83 {strides = array<i32>} : memref<32x128xf32, #tpu.memory_space<vmem>>, vector<32x128xf32>,
    return
  }
  func.func @transform_0(%arg0: i32) -> (i32, i32) {
    %c0_i32 = arith.constant 0 : i32
    %c0_i32_0 = arith.constant 0 : i32
    return %arg0, %c0_i32 : i32, i32
  }
  func.func @transform_1(%arg0: i32) -> (i32, i32) {
    %c0_i32 = arith.constant 0 : i32
    %c0_i32_0 = arith.constant 0 : i32
    return %arg0, %c0_i32 : i32, i32
  }
  func.func @transform_2(%arg0: i32) -> (i32, i32) {
    %c0_i32 = arith.constant 0 : i32
    %c0_i32_0 = arith.constant 0 : i32
    %c0_i32_1 = arith.constant 0 : i32
    return %c0_i32, %c0_i32_0 : i32, i32
  }
  func.func @transform_3(%arg0: i32) -> (i32, i32) {
    %c0_i32 = arith.constant 0 : i32
    %c0_i32_0 = arith.constant 0 : i32
    %c0_i32_1 = arith.constant 0 : i32
    return %c0_i32, %c0_i32_0 : i32, i32
  }
  func.func @transform_4(%arg0: i32) -> (i32, i32) {
    %c0_i32 = arith.constant 0 : i32
    %c0_i32_0 = arith.constant 0 : i32
    return %arg0, %c0_i32 : i32, i32
  }
  func.func @transform_5(%arg0: i32) -> (i32, i32) {
    %c0_i32 = arith.constant 0 : i32
    %c0_i32_0 = arith.constant 0 : i32
    return %arg0, %c0_i32 : i32, i32
  }
}

</mosaic_0001>

<bundles_post_ra>
// kernel: tpu_custom_call.1
= control target key start
LH: loop header
LB: loop body
LE: loop exit
PB: predicated region body
PF: predicated region fallthrough
CT: control target
= control target key end

     0   :  { %11 = vsyncpa [#allocation3], 0  ;;  %s7148_s0 = inlined_call_operand.vmem [shape: f32[512,8], index: 0, kind: input, shape index: {}]   ;;  %s7149_s1 = inlined_call_operand.vmem [shape: bf16[512,256], index: 1, kind: input, shape index: {}]   ;;  %s7150_s2 = inlined_call_operand.hbm [shape: bf16[896,128], index: 2, kind: input, shape index: {}]   ;;  %s7151_s3 = inlined_call_operand.vmem [shape: f32[14,128], index: 3, kind: input, shape index: {}]   ;;  %s7152_s4 = inlined_call_operand.hbm [shape: f32[32,128], index: 4, kind: output, shape index: {0}]   ;;  %s7153_s5 = inlined_call_operand.hbm [shape: f32[32,128], index: 5, kind: output, shape index: {1}]  }
   0x1   :  { %12 = vsyncpa [#allocation4], 0 }
   0x2   :  { %13 = vsyncpa [#allocation7], 0  ;;  %s5079_s18 = smov [#allocation2]   ;;  %s5007_s22 = scalar_lea.hbm %s7150_s2, 7168 }
   0x3   :  { %s23_s19 = sshll.u32 %s5079_s18, 4  ;;  %p5008_p0 = scmp.ne.s32.totalorder %s7150_s2, %s5007_s22  ;;  %s24_s19 = int_to_ptr.vmem [resolvable:$true] %s23_s19 }
   0x4   :  { %p5011_p1 = scmp.lt.u32.totalorder %s5007_s22, %s7150_s2 }
   0x6   :  { %p5013_p2 = pnand %p5011_p1, %p5008_p0 }
   0x8   :  { %5016 = shalt.err (!%p5013_p2)
}
   0x9   :  { %s5017_s27 = scalar_lea.vmem %s24_s19, 7168  ;;  %p5022_p4 = scmp.lt.s32.totalorder %s24_s19, %s24_s19 }
   0xa   :  { %p5018_p3 = scmp.ne.s32.totalorder %s24_s19, %s5017_s27  ;;  %p5023_p5 = scmp.lt.s32.totalorder %s5017_s27, %s5017_s27 }
   0xc   :  { %p5024_p6 = por %p5023_p5, %p5022_p4 }
   0xe   :  { %p5025_p7 = pnand %p5024_p6, %p5018_p3 }
  0x10   :  { %5028 = shalt.err (!%p5025_p7)
}
  0x11   :  { %s5080_s28 = smov 64   ;;  %s5081_s29 = smov 4  }
  0x12   :  { %29 = dma.hbm_to_vmem [thread:$0]  %s7150_s2, 7168, %s24_s19, [#allocation3], %s5080_s28, %s5080_s28, %s5081_s29  }
  0x13   :  { %5073 = dma.done.wait [#allocation3], 7168  }
  0x14   :  { %5074 = vsyncadd [#allocation3], 4294960128  ;;  %v7156_v0 = vmov 1   ;;  %v7158_v1 = vmov 0   ;;  %v5137_v2 = vld [vmem:[%s7148_s0 + $0x10] sm:$0xff]  ;;  %v5142_v3 = vld [vmem:[%s7148_s0] sm:$0xff] }
  0x15   :  { %4750 = vset.pattern.permute.xlu0 %v7156_v0  ;;  %4748 = vset.pattern.permute.xlu1 %v7156_v0  ;;  %v4832_v4 = vld [vmem:[#allocation2] sm:$0xff]   ;;  %v5149_v5 = vld [vmem:[%s7148_s0 + $0x28] sm:$0xff]  ;;  %v5162_v8 = vld [vmem:[%s7148_s0 + $0x30] sm:$0xff]  ;;  %v7154_v16 = vmov 2   ;;  %vm3693_vm0 = vcmask 1041409   ;;  %vm3695_vm1 = vcmask 1042434  }
  0x16   :  { %1778 = vmatprep.subr.bf16.mxu0 %v7158_v1  ;;  %595 = vperm.xlu0 %4750, %v5137_v2   ;;  %v5154_v6 = vld [vmem:[%s7148_s0 + $0x8] sm:$0xff]  ;;  %v105_v9 = vld [vmem:[%s7148_s0 + $0x18] sm:$0xff]  ;;  %v4834_v10 = vld [vmem:[#allocation2 + $0x10] sm:$0xff]   ;;  %vm3697_vm2 = vcmask 1043459   ;;  %vm3699_vm3 = vcmask 1044484   ;;  %vm3701_vm4 = vcmask 1045509  }
  0x17   :  { %587 = vperm.xlu1 %4748, %v5142_v3   ;;  %1779 = vmatpush1.bf16.msra.mxu0 %v4832_v4  ;;  %v4833_v7 = vld [vmem:[#allocation2 + $0x8] sm:$0xff]   ;;  %v5173_v11 = vld [vmem:[%s7148_s0 + $0x50] sm:$0xff]  ;;  %v4835_v12 = vld [vmem:[#allocation2 + $0x18] sm:$0xff]   ;;  %vm3703_vm5 = vcmask 1046534   ;;  %vm3705_vm6 = vcmask 1047559  }
  0x18   :  { %1780 = vmatprep.subr.bf16.mxu0 %v7158_v1  ;;  %v5181_v13 = vld [vmem:[%s7148_s0 + $0x68] sm:$0xff]  ;;  %v4836_v14 = vld [vmem:[#allocation2 + $0x20] sm:$0xff]   ;;  %v5188_v15 = vld [vmem:[%s7148_s0 + $0x70] sm:$0xff] }
  0x19   :  { %v4837_v17 = vld [vmem:[#allocation2 + $0x28] sm:$0xff]   ;;  %v5197_v18 = vld [vmem:[%s7148_s0 + $0x90] sm:$0xff]  ;;  %v4839_v22 = vld [vmem:[#allocation2 + $0x38] sm:$0xff]  }
  0x1a   :  { %607 = vperm.xlu0 %4750, %v5149_v5   ;;  %v4838_v19 = vld [vmem:[#allocation2 + $0x30] sm:$0xff]   ;;  %v4850_v20 = vld [vmem:[%s7149_s1 + $0x4] ss:$8 sps:$4 sm:$0xff]   ;;  %v4843_v31 = vld [vmem:[#allocation2 + $0x58] sm:$0xff]  }
  0x1b   :  { %591 = vperm.xlu1 %4748, %v5154_v6   ;;  %1781 = vmatpush1.bf16.msra.mxu0 %v4833_v7  ;;  %v5208_v21 = vld [vmem:[%s7148_s0 + $0xa8] sm:$0xff]  ;;  %v5215_v23 = vld [vmem:[%s7148_s0 + $0xb0] sm:$0xff]  ;;  %v4840_v24 = vld [vmem:[#allocation2 + $0x40] sm:$0xff]  }
  0x1c   :  { %1782 = vmatprep.subr.bf16.mxu0 %v7158_v1  ;;  %1810 = vmatprep.mubr.bf16.mxu0 %v4850_v20  ;;  %v5224_v25 = vld [vmem:[%s7148_s0 + $0xd0] sm:$0xff]  ;;  %v5229_v26 = vld [vmem:[%s7148_s0 + $0x20] sm:$0xff]  ;;  %v4841_v27 = vld [vmem:[#allocation2 + $0x48] sm:$0xff]  }
  0x1d   :  { %v5238_v28 = vld [vmem:[%s7148_s0 + $0xe8] sm:$0xff]  ;;  %v4842_v29 = vld [vmem:[#allocation2 + $0x50] sm:$0xff]   ;;  %v109_v32 = vld [vmem:[%s7148_s0 + $0x38] sm:$0xff] }
  0x1e   :  { %611 = vperm.xlu0 %4750, %v5162_v8   ;;  %v5246_v30 = vld [vmem:[%s7148_s0 + $0xf0] sm:$0xff]  ;;  %v4844_v34 = vld [vmem:[#allocation2 + $0x60] sm:$0xff]   ;;  %v139_v35 = vld [vmem:[%s7148_s0 + $0x128] sm:$0xff] }
  0x1f   :  { %4749 = vset.pattern.permute.xlu1 %v7158_v1  ;;  %1783 = vmatpush1.bf16.msra.mxu0 %v4834_v10  ;;  %v5257_v33 = vld [vmem:[%s7148_s0 + $0x110] sm:$0xff]  ;;  %v4845_v36 = vld [vmem:[#allocation2 + $0x68] sm:$0xff]   ;;  %v4847_v39 = vld [vmem:[#allocation2 + $0x78] sm:$0xff]  }
  0x20   :  { %215 = vperm.xlu1 %4749, %v105_v9   ;;  %1784 = vmatprep.subr.bf16.mxu0 %v7158_v1  ;;  %v140_v37 = vld [vmem:[%s7148_s0 + $0x130] sm:$0xff]  ;;  %v4848_v40 = vld [vmem:[%s7149_s1] ss:$8 sps:$4 sm:$0xff]   ;;  %v4854_v45 = vld [vmem:[%s7149_s1 + $0x24] ss:$8 sps:$4 sm:$0xff]  }
  0x21   :  { %v4846_v38 = vld [vmem:[#allocation2 + $0x70] sm:$0xff]   ;;  %v110_v41 = vld [vmem:[%s7148_s0 + $0x40] sm:$0xff]  ;;  %v5290_v43 = vld [vmem:[%s7148_s0 + $0x48] sm:$0xff] }
  0x22   :  { %627 = vperm.xlu0 %4750, %v5173_v11   ;;  %v4851_v42 = vld [vmem:[%s7149_s1 + $0x14] ss:$8 sps:$4 sm:$0xff]   ;;  %v4853_v44 = vld [vmem:[%s7149_s1 + $0x10] ss:$8 sps:$4 sm:$0xff]   ;;  %v5302_v46 = vld [vmem:[%s7148_s0 + $0x60] sm:$0xff] }
  0x23   :  { %1785 = vmatpush1.bf16.msra.mxu0 %v4835_v12  ;;  %v113_v47 = vld [vmem:[%s7148_s0 + $0x58] sm:$0xff]  ;;  %v4856_v49 = vld [vmem:[%s7149_s1 + $0x20] ss:$8 sps:$4 sm:$0xff]   ;;  %v4860_v54 = vld [vmem:[%s7149_s1 + $0x44] ss:$8 sps:$4 sm:$0xff]  }
  0x24   :  { %4751 = vset.pattern.permute.xlu1 %v7156_v0  ;;  %1786 = vmatprep.subr.bf16.mxu0 %v7158_v1  ;;  %v117_v48 = vld [vmem:[%s7148_s0 + $0x78] sm:$0xff]  ;;  %v5323_v51 = vld [vmem:[%s7148_s0 + $0x88] sm:$0xff]  ;;  %v5329_v52 = vld [vmem:[%s7148_s0 + $0xa0] sm:$0xff] }
  0x25   :  { %599 = vperm.xlu1 %4751, %v105_v9   ;;  %v4857_v50 = vld [vmem:[%s7149_s1 + $0x34] ss:$8 sps:$4 sm:$0xff]   ;;  %v4859_v53 = vld [vmem:[%s7149_s1 + $0x30] ss:$8 sps:$4 sm:$0xff]   ;;  %v5350_v56 = vld [vmem:[%s7148_s0 + $0xc8] sm:$0xff] }
  0x26   :  { %639 = vperm.xlu0 %4750, %v5181_v13   ;;  %v5343_v55 = vld [vmem:[%s7148_s0 + $0xb8] sm:$0xff]  ;;  %v4862_v57 = vld [vmem:[%s7149_s1 + $0x40] ss:$8 sps:$4 sm:$0xff]   ;;  %v4866_v62 = vld [vmem:[%s7149_s1 + $0x64] ss:$8 sps:$4 sm:$0xff]  }
  0x27   :  { %1787 = vmatpush1.bf16.msra.mxu0 %v4836_v14  ;;  %v4863_v58 = vld [vmem:[%s7149_s1 + $0x54] ss:$8 sps:$4 sm:$0xff]   ;;  %v5362_v59 = vld [vmem:[%s7148_s0 + $0xe0] sm:$0xff]  ;;  %v4865_v61 = vld [vmem:[%s7149_s1 + $0x50] ss:$8 sps:$4 sm:$0xff]  }
  0x28   :  { %1788 = vmatprep.subr.bf16.mxu0 %v7158_v1  ;;  %v5370_v60 = vld [vmem:[%s7148_s0 + $0xf8] sm:$0xff]  ;;  %v5383_v63 = vld [vmem:[%s7148_s0 + $0x108] sm:$0xff]  ;;  %v5390_v4 = vld [vmem:[%s7148_s0 + $0x120] sm:$0xff] }
  0x29   :  { %4752 = vset.pattern.permute.xlu1 %v7154_v16  ;;  %v4869_v7 = vld [vmem:[%s7149_s1 + $0x74] ss:$8 sps:$4 sm:$0xff]   ;;  %v4871_v10 = vld [vmem:[%s7149_s1 + $0x70] ss:$8 sps:$4 sm:$0xff]   ;;  %v4872_v12 = vld [vmem:[%s7149_s1 + $0x84] ss:$8 sps:$4 sm:$0xff]  }
  0x2a   :  { %975 = vperm.xlu1 %4752, %v5142_v3   ;;  %643 = vperm.xlu0 %4750, %v5188_v15   ;;  %v5420_v14 = vld [vmem:[%s7148_s0 + $0x160] sm:$0xff] }
  0x2b   :  { %1789 = vmatpush1.bf16.msra.mxu0 %v4837_v17  ;;  %v149_v17 = vld [vmem:[%s7148_s0 + $0x178] sm:$0xff] }
  0x2c   :  { %1790 = vmatprep.subr.bf16.mxu0 %v7158_v1 }
  0x2e   :  { %983 = vperm.xlu1 %4752, %v5137_v2   ;;  %659 = vperm.xlu0 %4750, %v5197_v18  }
  0x2f   :  { %1791 = vmatpush1.bf16.msra.mxu0 %v4838_v19  ;;  %v4874_v19 = vld [vmem:[%s7149_s1 + $0x80] ss:$8 sps:$4 sm:$0xff]  }
  0x30   :  { %1792 = vmatprep.subr.bf16.mxu0 %v7158_v1 }
  0x32   :  { %987 = vperm.xlu1 %4752, %v105_v9   ;;  %671 = vperm.xlu0 %4750, %v5208_v21   ;;  %v5407_v9 = vld [vmem:[%s7148_s0 + $0x148] sm:$0xff] }
  0x33   :  { %1793 = vmatpush1.bf16.msra.mxu0 %v4839_v22 }
  0x34   :  { %1794 = vmatprep.subr.bf16.mxu0 %v7158_v1 }
  0x36   :  { %4753 = vset.pattern.permute.xlu1 %v7158_v1  ;;  %675 = vperm.xlu0 %4750, %v5215_v23  }
  0x37   :  { %225 = vperm.xlu1 %4753, %v5149_v5   ;;  %1795 = vmatpush1.bf16.msra.mxu0 %v4840_v24  ;;  %v4875_v24 = vld [vmem:[%s7149_s1 + $0x94] ss:$8 sps:$4 sm:$0xff]  }
  0x38   :  { %1796 = vmatprep.subr.bf16.mxu0 %v7158_v1 }
  0x3a   :  { %691 = vperm.xlu0 %4750, %v5224_v25  }
  0x3b   :  { %4754 = vset.pattern.permute.xlu1 %v7156_v0  ;;  %1797 = vmatpush1.bf16.msra.mxu0 %v4841_v27 }
  0x3c   :  { %603 = vperm.xlu1 %4754, %v5229_v26   ;;  %1798 = vmatprep.subr.bf16.mxu0 %v7158_v1 }
  0x3e   :  { %703 = vperm.xlu0 %4750, %v5238_v28  }
  0x3f   :  { %1799 = vmatpush1.bf16.msra.mxu0 %v4842_v29 }
  0x40   :  { %4755 = vset.pattern.permute.xlu1 %v7158_v1  ;;  %1800 = vmatprep.subr.bf16.mxu0 %v7158_v1 }
  0x41   :  { %230 = vperm.xlu1 %4755, %v5162_v8  }
  0x42   :  { %707 = vperm.xlu0 %4750, %v5246_v30  }
  0x43   :  { %1801 = vmatpush1.bf16.msra.mxu0 %v4843_v31  ;;  %v118_v31 = vld [vmem:[%s7148_s0 + $0x80] sm:$0xff] }
  0x44   :  { %1802 = vmatprep.subr.bf16.mxu0 %v7158_v1 }
  0x45   :  { %235 = vperm.xlu1 %4755, %v109_v32  }
  0x46   :  { %723 = vperm.xlu0 %4750, %v5257_v33  }
  0x47   :  { %1803 = vmatpush1.bf16.msra.mxu0 %v4844_v34 }
  0x48   :  { %1804 = vmatprep.subr.bf16.mxu0 %v7158_v1 }
  0x49   :  { %4756 = vset.pattern.permute.xlu1 %v7156_v0 }
  0x4a   :  { %615 = vperm.xlu1 %4756, %v109_v32   ;;  %735 = vperm.xlu0 %4750, %v139_v35   ;;  %v4878_v35 = vld [vmem:[%s7149_s1 + $0xa4] ss:$8 sps:$4 sm:$0xff]  }
  0x4b   :  { %1805 = vmatpush1.bf16.msra.mxu0 %v4845_v36 }
  0x4c   :  { %1806 = vmatprep.subr.bf16.mxu0 %v7158_v1 }
  0x4e   :  { %4757 = vset.pattern.permute.xlu1 %v7154_v16  ;;  %739 = vperm.xlu0 %4750, %v140_v37   ;;  %v157_v37 = vld [vmem:[%s7148_s0 + $0x1b8] sm:$0xff] }
  0x4f   :  { %995 = vperm.xlu1 %4757, %v5149_v5   ;;  %1807 = vmatpush1.bf16.msra.mxu0 %v4846_v38  ;;  %v4868_v5 = vld [vmem:[%s7149_s1 + $0x60] ss:$8 sps:$4 sm:$0xff]  }
  0x50   :  { %1808 = vmatprep.subr.bf16.mxu0 %v7158_v1 }
  0x52   :  { %4796 = vset.pattern.permute.xlu0 %v7154_v16 }
  0x53   :  { %999 = vperm.xlu1 %4757, %v5162_v8   ;;  %979 = vperm.xlu0 %4796, %v5154_v6   ;;  %v141_v8 = vld [vmem:[%s7148_s0 + $0x138] sm:$0xff] }
  0x54   :  { %1809 = vmatpush1.bf16.msra.mxu0 %v4847_v39 }
  0x57   :  { %4758 = vset.pattern.permute.xlu1 %v7158_v1  ;;  %991 = vperm.xlu0 %4796, %v5229_v26  }
  0x58   :  { %240 = vperm.xlu1 %4758, %v110_v41   ;;  %1811 = vmatmul.mubr.bf16.vlgmr.msra.gmra.mrb[0].mxu0 %v4848_v40  ;;  %v5480_v40 = vld [vmem:[%s7148_s0 + $0x1c8] sm:$0xff] }
  0x59   :  { %1818 = vmatprep.mubr.bf16.mxu0 %v4851_v42  ;;  %v4908_v42 = vld [vmem:[#allocation2 + $0x80] sm:$0xff]  }
  0x5a   :  { %4518 = vmatprep.subr.bf16.mxu1 %v4908_v42 }
  0x5b   :  { %1003 = vperm.xlu0 %4796, %v109_v32   ;;  %v4877_v32 = vld [vmem:[%s7149_s1 + $0x90] ss:$8 sps:$4 sm:$0xff]   ;;  %4519 = vmatpush3.bf16.msra.mxu1 %v4908_v42  ;;  %v4892_v42 = vld [vmem:[%s7149_s1 + $0xe0] ss:$8 sps:$4 sm:$0xff]  }
  0x5c   :  { %4759 = vset.pattern.permute.xlu1 %v7156_v0 }
  0x5d   :  { %619 = vperm.xlu1 %4759, %v110_v41  }
  0x5f   :  { %1011 = vperm.xlu0 %4796, %v5290_v43  }
  0x60   :  { %1819 = vmatmul.mubr.bf16.gmra.mrb[4].mxu0 %v4853_v44 }
  0x61   :  { %623 = vperm.xlu1 %4759, %v5290_v43   ;;  %1826 = vmatprep.mubr.bf16.mxu0 %v4854_v45  ;;  %v4881_v45 = vld [vmem:[%s7149_s1 + $0xb4] ss:$8 sps:$4 sm:$0xff]  }
  0x63   :  { %1023 = vperm.xlu0 %4796, %v5302_v46  }
  0x65   :  { %4760 = vset.pattern.permute.xlu1 %v7158_v1 }
  0x66   :  { %255 = vperm.xlu1 %4760, %v113_v47  }
  0x67   :  { %1035 = vperm.xlu0 %4796, %v117_v48  }
  0x68   :  { %1827 = vmatmul.mubr.bf16.gmra.mrb[8].mxu0 %v4856_v49  ;;  %v121_v49 = vld [vmem:[%s7148_s0 + $0x98] sm:$0xff] }
  0x69   :  { %1834 = vmatprep.mubr.bf16.mxu0 %v4857_v50 }
  0x6a   :  { %4761 = vset.pattern.permute.xlu1 %v7156_v0 }
  0x6b   :  { %631 = vperm.xlu1 %4761, %v113_v47   ;;  %1043 = vperm.xlu0 %4796, %v5323_v51  }
  0x6f   :  { %4762 = vset.pattern.permute.xlu1 %v7154_v16  ;;  %1055 = vperm.xlu0 %4796, %v5329_v52  }
  0x70   :  { %1007 = vperm.xlu1 %4762, %v110_v41   ;;  %1835 = vmatmul.mubr.bf16.gmra.mrb[12].mxu0 %v4859_v53  ;;  %v4880_v41 = vld [vmem:[%s7149_s1 + $0xa0] ss:$8 sps:$4 sm:$0xff]  }
  0x71   :  { %1842 = vmatprep.mubr.bf16.mxu0 %v4860_v54  ;;  %v4883_v54 = vld [vmem:[%s7149_s1 + $0xb0] ss:$8 sps:$4 sm:$0xff]  }
  0x73   :  { %1067 = vperm.xlu0 %4796, %v5343_v55  }
  0x74   :  { %1015 = vperm.xlu1 %4762, %v5173_v11  }
  0x77   :  { %1075 = vperm.xlu0 %4796, %v5350_v56  }
  0x78   :  { %1019 = vperm.xlu1 %4762, %v113_v47   ;;  %1843 = vmatmul.mubr.bf16.gmra.mrb[16].mxu0 %v4862_v57  ;;  %v4911_v47 = vld [vmem:[#allocation2 + $0x88] sm:$0xff]   ;;  %v4913_v57 = vld [vmem:[#allocation2 + $0x90] sm:$0xff]  }
  0x79   :  { %1850 = vmatprep.mubr.bf16.mxu0 %v4863_v58  ;;  %4520 = vmatprep.subr.bf16.mxu1 %v4911_v47 }
  0x7a   :  { %4521 = vmatpush3.bf16.msra.mxu1 %v4911_v47 }
  0x7b   :  { %1087 = vperm.xlu0 %4796, %v5362_v59   ;;  %4522 = vmatprep.subr.bf16.mxu1 %v4913_v57 }
  0x7c   :  { %4763 = vset.pattern.permute.xlu1 %v7158_v1 }
  0x7d   :  { %265 = vperm.xlu1 %4763, %v5181_v13  }
  0x7e   :  { %4523 = vmatpush3.bf16.msra.mxu1 %v4913_v57 }
  0x7f   :  { %1099 = vperm.xlu0 %4796, %v5370_v60  }
  0x80   :  { %1851 = vmatmul.mubr.bf16.gmra.mrb[20].mxu0 %v4865_v61  ;;  %v4884_v61 = vld [vmem:[%s7149_s1 + $0xc4] ss:$8 sps:$4 sm:$0xff]  }
  0x81   :  { %4764 = vset.pattern.permute.xlu1 %v7156_v0  ;;  %1858 = vmatprep.mubr.bf16.mxu0 %v4866_v62  ;;  %v4914_v62 = vld [vmem:[#allocation2 + $0x98] sm:$0xff]  }
  0x82   :  { %635 = vperm.xlu1 %4764, %v5302_v46   ;;  %4524 = vmatprep.subr.bf16.mxu1 %v4914_v62 }
  0x83   :  { %1107 = vperm.xlu0 %4796, %v5383_v63   ;;  %4525 = vmatpush3.bf16.msra.mxu1 %v4914_v62 }
  0x86   :  { %4765 = vset.pattern.permute.xlu1 %v7158_v1 }
  0x87   :  { %270 = vperm.xlu1 %4765, %v5188_v15   ;;  %1119 = vperm.xlu0 %4796, %v5390_v4  }
  0x88   :  { %1859 = vmatmul.mubr.bf16.gmra.mrb[24].mxu0 %v4868_v5 }
  0x89   :  { %1866 = vmatprep.mubr.bf16.mxu0 %v4869_v7  ;;  %v4886_v7 = vld [vmem:[%s7149_s1 + $0xc0] ss:$8 sps:$4 sm:$0xff]  }
  0x8b   :  { %275 = vperm.xlu1 %4765, %v117_v48   ;;  %1131 = vperm.xlu0 %4796, %v141_v8   ;;  %v4915_v8 = vld [vmem:[#allocation2 + $0xa0] sm:$0xff]  }
  0x8c   :  { %4526 = vmatprep.subr.bf16.mxu1 %v4915_v8 }
  0x8d   :  { %4527 = vmatpush3.bf16.msra.mxu1 %v4915_v8 }
  0x8f   :  { %4766 = vset.pattern.permute.xlu1 %v7156_v0  ;;  %1139 = vperm.xlu0 %4796, %v5407_v9  }
  0x90   :  { %647 = vperm.xlu1 %4766, %v117_v48   ;;  %1867 = vmatmul.mubr.bf16.gmra.mrb[28].mxu0 %v4871_v10 }
  0x91   :  { %1874 = vmatprep.mubr.bf16.mxu0 %v4872_v12  ;;  %v4887_v12 = vld [vmem:[%s7149_s1 + $0xd4] ss:$8 sps:$4 sm:$0xff]  }
  0x93   :  { %1151 = vperm.xlu0 %4796, %v5420_v14  }
  0x94   :  { %4767 = vset.pattern.permute.xlu1 %v7154_v16 }
  0x95   :  { %1027 = vperm.xlu1 %4767, %v5181_v13   ;;  %v5433_v22 = vpop.permute.xlu0 %595  ;;  %v5442_v13 = vld [vmem:[%s7148_s0 + $0x188] sm:$0xff] }
  0x96   :  { %v5431_v20 = vpop.permute.xlu1 %587 }
  0x97   :  { %1163 = vperm.xlu0 %4796, %v149_v17  }
  0x98   :  { %1875 = vmatmul.mubr.bf16.gmra.mrb[32].mxu0 %v4874_v19 }
  0x99   :  { %1031 = vperm.xlu1 %4767, %v5188_v15   ;;  %v5446_v29 = vpop.permute.xlu0 %607  ;;  %1882 = vmatprep.mubr.bf16.mxu0 %v4875_v24  ;;  %v5456_v15 = vld [vmem:[%s7148_s0 + $0x1a0] sm:$0xff]  ;;  %v4889_v24 = vld [vmem:[%s7149_s1 + $0xd0] ss:$8 sps:$4 sm:$0xff]  }
  0x9a   :  { %v5444_v27 = vpop.permute.xlu1 %591 }
  0x9b   :  { %1171 = vperm.xlu0 %4796, %v5442_v13  }
  0x9d   :  { %4768 = vset.pattern.permute.xlu1 %v7158_v1  ;;  %v5461_v34 = vpop.permute.xlu0 %611 }
  0x9e   :  { %280 = vperm.xlu1 %4768, %v118_v31  }
  0x9f   :  { %v5466_v36 = vpop.permute.xlu1 %215  ;;  %1183 = vperm.xlu0 %4796, %v5456_v15  }
  0xa0   :  { %1883 = vmatmul.mubr.bf16.gmra.mrb[36].mxu0 %v4877_v32 }
  0xa1   :  { %v5473_v38 = vpop.permute.xlu0 %627  ;;  %1890 = vmatprep.mubr.bf16.mxu0 %v4878_v35 }
  0xa2   :  { %4769 = vset.pattern.permute.xlu1 %v7156_v0 }
  0xa3   :  { %651 = vperm.xlu1 %4769, %v118_v31   ;;  %1195 = vperm.xlu0 %4796, %v157_v37  }
  0xa4   :  { %v5475_v39 = vpop.permute.xlu1 %599 }
  0xa5   :  { %v5485_v44 = vpop.permute.xlu0 %639 }
  0xa7   :  { %655 = vperm.xlu1 %4769, %v5323_v51   ;;  %1203 = vperm.xlu0 %4796, %v5480_v40  }
  0xa8   :  { %1891 = vmatmul.mubr.bf16.gmra.mrb[40].mxu0 %v4880_v41 }
  0xa9   :  { %v5492_v48 = vpop.permute.xlu1 %975  ;;  %v5497_v50 = vpop.permute.xlu0 %643  ;;  %1898 = vmatprep.mubr.bf16.mxu0 %v4881_v45 }
  0xab   :  { %4770 = vset.pattern.permute.xlu1 %v7158_v1  ;;  %4824 = vset.pattern.permute.xlu0 %v7158_v1 }
  0xac   :  { %295 = vperm.xlu1 %4770, %v121_v49   ;;  %200 = vperm.xlu0 %4824, %v5142_v3  }
  0xad   :  { %v5502_v53 = vpop.permute.xlu1 %983  ;;  %v5507_v58 = vpop.permute.xlu0 %659 }
  0xae   :  { %7166 = vst [vmem:[#allocation11_spill] sm:$0xff] %v5507_v58 }
  0xb0   :  { %4771 = vset.pattern.permute.xlu1 %v7156_v0  ;;  %1899 = vmatmul.mubr.bf16.gmra.mrb[44].mxu0 %v4883_v54 }
  0xb1   :  { %205 = vperm.xlu0 %4824, %v5154_v6   ;;  %v5514_v3 = vpop.permute.xlu1 %987  ;;  %663 = vperm.xlu1 %4771, %v121_v49   ;;  %v5516_v5 = vpop.permute.xlu0 %671 }
  0xb2   :  { %7167 = vst [vmem:[#allocation12_spill] sm:$0xff] %v5516_v5  ;;  %1906 = vmatprep.mubr.bf16.mxu0 %v4884_v61 }
  0xb5   :  { %210 = vperm.xlu0 %4824, %v5137_v2   ;;  %4772 = vset.pattern.permute.xlu1 %v7154_v16  ;;  %v5525_v6 = vpop.permute.xlu0 %675  ;;  %v4916_v2 = vld [vmem:[#allocation2 + $0xa8] sm:$0xff]  }
  0xb6   :  { %v5523_v10 = vpop.permute.xlu1 %225  ;;  %7168 = vst [vmem:[#allocation13_spill] sm:$0xff] %v5525_v6  ;;  %1039 = vperm.xlu1 %4772, %v118_v31   ;;  %4528 = vmatprep.subr.bf16.mxu1 %v4916_v2  ;;  %v4920_v31 = vld [vmem:[#allocation2 + $0xb0] sm:$0xff]   ;;  %v5830_v6 = vld [vmem:[%s7148_s0 + $0x100] sm:$0xff] }
  0xb7   :  { %4529 = vmatpush3.bf16.msra.mxu1 %v4916_v2 }
  0xb8   :  { %1907 = vmatmul.mubr.bf16.gmra.mrb[48].mxu0 %v4886_v7  ;;  %4530 = vmatprep.subr.bf16.mxu1 %v4920_v31  ;;  %v4899_v7 = vld [vmem:[%s7149_s1 + $0x114] ss:$8 sps:$4 sm:$0xff]  }
  0xb9   :  { %220 = vperm.xlu0 %4824, %v5229_v26   ;;  %v5531_v17 = vpop.permute.xlu0 %691  ;;  %1914 = vmatprep.mubr.bf16.mxu0 %v4887_v12  ;;  %v4890_v26 = vld [vmem:[%s7149_s1 + $0xe4] ss:$8 sps:$4 sm:$0xff]  }
  0xba   :  { %7169 = vst [vmem:[#allocation14_spill] sm:$0xff] %v5531_v17  ;;  %1047 = vperm.xlu1 %4772, %v5197_v18   ;;  %v4934_v17 = vld [vmem:[%s7149_s1 + $0x1a4] ss:$8 sps:$4 sm:$0xff]  }
  0xbb   :  { %v5534_v19 = vpop.permute.xlu1 %603  ;;  %4531 = vmatpush3.bf16.msra.mxu1 %v4920_v31 }
  0xbd   :  { %245 = vperm.xlu0 %4824, %v5290_v43   ;;  %v5540_v32 = vpop.permute.xlu0 %703  ;;  %v4921_v43 = vld [vmem:[#allocation2 + $0xb8] sm:$0xff]  }
  0xbe   :  { %7170 = vst [vmem:[#allocation15_spill] sm:$0xff] %v5540_v32  ;;  %1051 = vperm.xlu1 %4772, %v121_v49   ;;  %4532 = vmatprep.subr.bf16.mxu1 %v4921_v43  ;;  %v4895_v49 = vld [vmem:[%s7149_s1 + $0xf0] ss:$8 sps:$4 sm:$0xff]  }
  0xbf   :  { %4533 = vmatpush3.bf16.msra.mxu1 %v4921_v43 }
  0xc0   :  { %v5545_v35 = vpop.permute.xlu1 %230  ;;  %1915 = vmatmul.mubr.bf16.gmra.mrb[52].mxu0 %v4889_v24  ;;  %v4902_v24 = vld [vmem:[%s7149_s1 + $0x124] ss:$8 sps:$4 sm:$0xff]  }
  0xc1   :  { %250 = vperm.xlu0 %4824, %v5173_v11   ;;  %v5548_v37 = vpop.permute.xlu0 %707  ;;  %1922 = vmatprep.mubr.bf16.mxu0 %v4890_v26  ;;  %v4893_v11 = vld [vmem:[%s7149_s1 + $0xf4] ss:$8 sps:$4 sm:$0xff]  }
  0xc2   :  { %7171 = vst [vmem:[#allocation16_spill] sm:$0xff] %v5548_v37  ;;  %4773 = vset.pattern.permute.xlu1 %v7158_v1  ;;  %v5692_v37 = vld [vmem:[%s7148_s0 + $0x190] sm:$0xff] }
  0xc3   :  { %305 = vperm.xlu1 %4773, %v5208_v21  }
  0xc4   :  { %v5552_v41 = vpop.permute.xlu1 %235 }
  0xc5   :  { %260 = vperm.xlu0 %4824, %v5302_v46   ;;  %v5558_v45 = vpop.permute.xlu0 %723 }
  0xc6   :  { %7172 = vst [vmem:[#allocation17_spill] sm:$0xff] %v5558_v45 }
  0xc7   :  { %4774 = vset.pattern.permute.xlu1 %v7156_v0 }
  0xc8   :  { %667 = vperm.xlu1 %4774, %v5329_v52   ;;  %1923 = vmatmul.mubr.bf16.gmra.mrb[56].mxu0 %v4892_v42 }
  0xc9   :  { %v5565_v47 = vpop.permute.xlu1 %615  ;;  %285 = vperm.xlu0 %4824, %v5323_v51   ;;  %v5568_v46 = vpop.permute.xlu0 %735  ;;  %1930 = vmatprep.mubr.bf16.mxu0 %v4893_v11  ;;  %v4896_v51 = vld [vmem:[%s7149_s1 + $0x104] ss:$8 sps:$4 sm:$0xff]   ;;  %v4905_v11 = vld [vmem:[%s7149_s1 + $0x134] ss:$8 sps:$4 sm:$0xff]  }
  0xca   :  { %7173 = vst [vmem:[#allocation18_spill] sm:$0xff] %v5568_v46  ;;  %v7183_v46 = vmov 2  }
  0xcc   :  { %4775 = vset.pattern.permute.xlu1 %v7158_v1 }
  0xcd   :  { %290 = vperm.xlu0 %4824, %v5197_v18   ;;  %310 = vperm.xlu1 %4775, %v5215_v23   ;;  %v5578_v57 = vpop.permute.xlu0 %739  ;;  %v4898_v18 = vld [vmem:[%s7149_s1 + $0x100] ss:$8 sps:$4 sm:$0xff]  }
  0xce   :  { %v5576_v54 = vpop.permute.xlu1 %995  ;;  %7174 = vst [vmem:[#allocation19_spill] sm:$0xff] %v5578_v57  ;;  %v7180_v57 = vmov 1  }
  0xd0   :  { %1931 = vmatmul.mubr.bf16.gmra.mrb[60].mxu0 %v4895_v49 }
  0xd1   :  { %300 = vperm.xlu0 %4824, %v5329_v52   ;;  %315 = vperm.xlu1 %4775, %v5343_v55  }
  0xd2   :  { %v5585_v61 = vpop.permute.xlu1 %999  ;;  %v5587_v62 = vpop.permute.xlu0 %979  ;;  %1938 = vmatprep.mubr.bf16.mxu0 %v4896_v51 }
  0xd5   :  { %4776 = vset.pattern.permute.xlu1 %v7156_v0  ;;  %325 = vperm.xlu0 %4824, %v5350_v56  }
  0xd6   :  { %679 = vperm.xlu1 %4776, %v5343_v55   ;;  %v5598_v52 = vpop.permute.xlu0 %991  ;;  %v4901_v55 = vld [vmem:[%s7149_s1 + $0x110] ss:$8 sps:$4 sm:$0xff]  }
  0xd7   :  { %v5600_v8 = vpop.permute.xlu1 %240 }
  0xd8   :  { %1939 = vmatmul.mubr.bf16.gmra.mrb[64].mxu0 %v4898_v18 }
  0xd9   :  { %1946 = vmatprep.mubr.bf16.mxu0 %v4899_v7  ;;  %330 = vperm.xlu0 %4824, %v5224_v25   ;;  %v4907_v7 = vld [vmem:[%s7149_s1 + $0x130] ss:$8 sps:$4 sm:$0xff]  }
  0xda   :  { %4777 = vset.pattern.permute.xlu1 %v7154_v16  ;;  %v5604_v12 = vpop.permute.xlu0 %1003 }
  0xdb   :  { %1059 = vperm.xlu1 %4777, %v5208_v21   ;;  %v126_v21 = vld [vmem:[%s7148_s0 + $0xc0] sm:$0xff] }
  0xdc   :  { %v5607_v2 = vpop.permute.xlu1 %619 }
  0xdd   :  { %340 = vperm.xlu0 %4824, %v5362_v59  }
  0xde   :  { %v5616_v31 = vpop.permute.xlu0 %1011 }
  0xdf   :  { %1063 = vperm.xlu1 %4777, %v5215_v23   ;;  %v4904_v23 = vld [vmem:[%s7149_s1 + $0x120] ss:$8 sps:$4 sm:$0xff]  }
  0xe0   :  { %v5619_v26 = vpop.permute.xlu1 %623  ;;  %1947 = vmatmul.mubr.bf16.gmra.mrb[68].mxu0 %v4901_v55 }
  0xe1   :  { %1954 = vmatprep.mubr.bf16.mxu0 %v4902_v24  ;;  %365 = vperm.xlu0 %4824, %v5383_v63  }
  0xe2   :  { %v5625_v43 = vpop.permute.xlu0 %1023 }
  0xe3   :  { %4778 = vset.pattern.permute.xlu1 %v7158_v1 }
  0xe4   :  { %320 = vperm.xlu1 %4778, %v126_v21  }
  0xe5   :  { %v5628_v42 = vpop.permute.xlu1 %255  ;;  %370 = vperm.xlu0 %4824, %v5257_v33   ;;  %v4909_v33 = vld [vmem:[%s7149_s1 + $0x144] ss:$8 sps:$4 sm:$0xff]  }
  0xe6   :  { %v5637_v49 = vpop.permute.xlu0 %1035 }
  0xe7   :  { %7175 = vst [vmem:[#allocation20_spill] sm:$0xff] %v5637_v49 }
  0xe8   :  { %4779 = vset.pattern.permute.xlu1 %v7156_v0  ;;  %1955 = vmatmul.mubr.bf16.gmra.mrb[72].mxu0 %v4904_v23  ;;  %v129_v23 = vld [vmem:[%s7148_s0 + $0xd8] sm:$0xff] }
  0xe9   :  { %683 = vperm.xlu1 %4779, %v126_v21   ;;  %1962 = vmatprep.mubr.bf16.mxu0 %v4905_v11  ;;  %v5663_v11 = vld [vmem:[%s7148_s0 + $0x150] sm:$0xff] }
  0xea   :  { %v5640_v51 = vpop.permute.xlu1 %631  ;;  %v5642_v18 = vpop.permute.xlu0 %1043  ;;  %380 = vperm.xlu0 %4824, %v5390_v4   ;;  %7178 = vst [vmem:[#allocation23_spill] sm:$0xff] %v5663_v11  ;;  %v4917_v0 = vld [vmem:[%s7149_s1 + $0x154] ss:$8 sps:$4 sm:$0xff]  }
  0xeb   :  { %7176 = vst [vmem:[#allocation21_spill] sm:$0xff] %v5642_v18 }
  0xed   :  { %687 = vperm.xlu1 %4779, %v5350_v56  }
  0xee   :  { %v5654_v24 = vpop.permute.xlu0 %1055  ;;  %405 = vperm.xlu0 %4824, %v5407_v9   ;;  %v4912_v9 = vld [vmem:[%s7149_s1 + $0x140] ss:$8 sps:$4 sm:$0xff]  }
  0xef   :  { %v5652_v55 = vpop.permute.xlu1 %1007  ;;  %7177 = vst [vmem:[#allocation22_spill] sm:$0xff] %v5654_v24 }
  0xf0   :  { %1963 = vmatmul.mubr.bf16.gmra.mrb[76].mxu0 %v4907_v7 }
  0xf1   :  { %4780 = vset.pattern.permute.xlu1 %v7158_v1  ;;  %1970 = vmatprep.mubr.bf16.mxu0 %v4909_v33 }
  0xf2   :  { %335 = vperm.xlu1 %4780, %v129_v23   ;;  %v5668_v16 = vpop.permute.xlu0 %1067  ;;  %410 = vperm.xlu0 %4824, %v5663_v11  }
  0xf3   :  { %v5666_v56 = vpop.permute.xlu1 %1015  ;;  %7179 = vst [vmem:[#allocation24_spill] sm:$0xff] %v5668_v16 }
  0xf6   :  { %4781 = vset.pattern.permute.xlu1 %v7180_v57  ;;  %v5680_v33 = vpop.permute.xlu0 %1075  ;;  %420 = vperm.xlu0 %4824, %v5420_v14   ;;  %v4919_v14 = vld [vmem:[%s7149_s1 + $0x150] ss:$8 sps:$4 sm:$0xff]  }
  0xf7   :  { %v5678_v7 = vpop.permute.xlu1 %1019  ;;  %7181 = vst [vmem:[#allocation25_spill] sm:$0xff] %v5680_v33  ;;  %695 = vperm.xlu1 %4781, %v129_v23  }
  0xf8   :  { %1971 = vmatmul.mubr.bf16.gmra.mrb[80].mxu0 %v4912_v9 }
  0xf9   :  { %1978 = vmatprep.mubr.bf16.mxu0 %v4917_v0  ;;  %v4922_v0 = vld [vmem:[%s7149_s1 + $0x164] ss:$8 sps:$4 sm:$0xff]  }
  0xfa   :  { %v5683_v1 = vpop.permute.xlu0 %1087  ;;  %445 = vperm.xlu0 %4824, %v5442_v13  }
  0xfb   :  { %7182 = vst [vmem:[#allocation26_spill] sm:$0xff] %v5683_v1  ;;  %4782 = vset.pattern.permute.xlu1 %v7183_v46 }
  0xfc   :  { %v5687_v45 = vpop.permute.xlu1 %265  ;;  %1071 = vperm.xlu1 %4782, %v126_v21   ;;  %v4924_v21 = vld [vmem:[%s7149_s1 + $0x160] ss:$8 sps:$4 sm:$0xff]  }
  0xfe   :  { %v5700_v9 = vpop.permute.xlu0 %1099  ;;  %450 = vperm.xlu0 %4824, %v5692_v37  }
  0xff   :  { %7184 = vst [vmem:[#allocation27_spill] sm:$0xff] %v5700_v9  ;;  %v4925_v9 = vld [vmem:[%s7149_s1 + $0x174] ss:$8 sps:$4 sm:$0xff]  }
 0x100   :  { %1079 = vperm.xlu1 %4782, %v5224_v25   ;;  %1979 = vmatmul.mubr.bf16.gmra.mrb[84].mxu0 %v4919_v14  ;;  %v5723_v14 = vld [vmem:[%s7148_s0 + $0x1d0] sm:$0xff] }
 0x101   :  { %v5704_v13 = vpop.permute.xlu1 %635  ;;  %1986 = vmatprep.mubr.bf16.mxu0 %v4922_v0 }
 0x102   :  { %v5706_v32 = vpop.permute.xlu0 %1107  ;;  %460 = vperm.xlu0 %4824, %v5456_v15   ;;  %v7187_v15 = vmov 0  }
 0x103   :  { %7185 = vst [vmem:[#allocation28_spill] sm:$0xff] %v5706_v32 }
 0x104   :  { %1083 = vperm.xlu1 %4782, %v129_v23  }
 0x106   :  { %v5712_v1 = vpop.permute.xlu1 %270  ;;  %v5717_v25 = vpop.permute.xlu0 %1119  ;;  %485 = vperm.xlu0 %4824, %v5480_v40   ;;  %v5735_v40 = vld [vmem:[%s7148_s0 + $0x1e0] sm:$0xff] }
 0x107   :  { %7186 = vst [vmem:[#allocation29_spill] sm:$0xff] %v5717_v25  ;;  %7190 = vst [vmem:[#allocation32_spill] sm:$0xff] %v5735_v40  ;;  %v4927_v25 = vld [vmem:[%s7149_s1 + $0x170] ss:$8 sps:$4 sm:$0xff]  }
 0x108   :  { %4783 = vset.pattern.permute.xlu1 %v7187_v15  ;;  %1987 = vmatmul.mubr.bf16.gmra.mrb[88].mxu0 %v4924_v21 }
 0x109   :  { %345 = vperm.xlu1 %4783, %v5238_v28   ;;  %1994 = vmatprep.mubr.bf16.mxu0 %v4925_v9  ;;  %v4928_v28 = vld [vmem:[%s7149_s1 + $0x184] ss:$8 sps:$4 sm:$0xff]  }
 0x10a   :  { %v5727_v23 = vpop.permute.xlu1 %275  ;;  %v5729_v0 = vpop.permute.xlu0 %1131  ;;  %490 = vperm.xlu0 %4824, %v5723_v14  }
 0x10b   :  { %7188 = vst [vmem:[#allocation30_spill] sm:$0xff] %v5727_v23  ;;  %7189 = vst [vmem:[#allocation31_spill] sm:$0xff] %v5729_v0 }
 0x10d   :  { %4784 = vset.pattern.permute.xlu1 %v7180_v57 }
 0x10e   :  { %699 = vperm.xlu1 %4784, %v5362_v59   ;;  %v5747_v21 = vpop.permute.xlu0 %1139  ;;  %500 = vperm.xlu0 %4824, %v5735_v40   ;;  %v4930_v59 = vld [vmem:[%s7149_s1 + $0x180] ss:$8 sps:$4 sm:$0xff]   ;;  %v518_v40 = vlaneseq }
 0x10f   :  { %v5745_v9 = vpop.permute.xlu1 %647  ;;  %7192 = vst [vmem:[#allocation34_spill] sm:$0xff] %v5747_v21 }
 0x110   :  { %7191 = vst [vmem:[#allocation33_spill] sm:$0xff] %v5745_v9  ;;  %1995 = vmatmul.mubr.bf16.gmra.mrb[92].mxu0 %v4927_v25  ;;  %v4931_v25 = vld [vmem:[%s7149_s1 + $0x194] ss:$8 sps:$4 sm:$0xff]  }
 0x111   :  { %2002 = vmatprep.mubr.bf16.mxu0 %v4928_v28 }
 0x112   :  { %4785 = vset.pattern.permute.xlu1 %v7187_v15  ;;  %v5751_v0 = vpop.permute.xlu0 %1151  ;;  %4825 = vset.pattern.permute.xlu0 %v7180_v57 }
 0x113   :  { %7193 = vst [vmem:[#allocation35_spill] sm:$0xff] %v5751_v0  ;;  %350 = vperm.xlu1 %4785, %v5246_v30   ;;  %755 = vperm.xlu0 %4825, %v5663_v11   ;;  %v5769_v0 = vld [vmem:[%s7148_s0 + $0x168] sm:$0xff]  ;;  %v4933_v11 = vld [vmem:[%s7149_s1 + $0x190] ss:$8 sps:$4 sm:$0xff]  }
 0x114   :  { %v5755_v32 = vpop.permute.xlu1 %1027  ;;  %7195 = vst [vmem:[#allocation37_spill] sm:$0xff] %v5769_v0 }
 0x116   :  { %v5764_v28 = vpop.permute.xlu0 %1163 }
 0x117   :  { %7194 = vst [vmem:[#allocation36_spill] sm:$0xff] %v5764_v28  ;;  %355 = vperm.xlu1 %4785, %v5370_v60   ;;  %767 = vperm.xlu0 %4825, %v5769_v0  }
 0x118   :  { %v5772_v30 = vpop.permute.xlu1 %1031  ;;  %2003 = vmatmul.mubr.bf16.gmra.mrb[96].mxu0 %v4930_v59  ;;  %v5792_v59 = vld [vmem:[%s7148_s0 + $0x170] sm:$0xff] }
 0x119   :  { %7196 = vst [vmem:[#allocation38_spill] sm:$0xff] %v5772_v30  ;;  %2010 = vmatprep.mubr.bf16.mxu0 %v4931_v25  ;;  %7200 = vst [vmem:[#allocation42_spill] sm:$0xff] %v5792_v59  ;;  %v5794_v25 = vshrl.u32 %v518_v40, 7  ;;  %v4936_v40 = vld [vmem:[%s7149_s1 + $0x1a0] ss:$8 sps:$4 sm:$0xff]  }
 0x11a   :  { %v5775_v21 = vpop.permute.xlu0 %1171 }
 0x11b   :  { %7197 = vst [vmem:[#allocation39_spill] sm:$0xff] %v5775_v21  ;;  %4786 = vset.pattern.permute.xlu1 %v7180_v57  ;;  %771 = vperm.xlu0 %4825, %v5792_v59   ;;  %v7165_v59 = vsub.s32 2, %v5794_v25  ;;  %v7205_v24 = vsub.s32 1, %v5794_v25 }
 0x11c   :  { %711 = vperm.xlu1 %4786, %v5370_v60   ;;  %v4984_v60 = vld [vmem:[%s7148_s0 + $0xe8] sm:$0xff] }
 0x11d   :  { %v5779_v28 = vpop.permute.xlu1 %280 }
 0x11e   :  { %7198 = vst [vmem:[#allocation40_spill] sm:$0xff] %v5779_v28  ;;  %v5787_v0 = vpop.permute.xlu0 %1183 }
 0x11f   :  { %7199 = vst [vmem:[#allocation41_spill] sm:$0xff] %v5787_v0  ;;  %v4937_v0 = vld [vmem:[%s7149_s1 + $0x1b4] ss:$8 sps:$4 sm:$0xff]   ;;  %787 = vperm.xlu0 %4825, %v5692_v37  }
 0x120   :  { %4787 = vset.pattern.permute.xlu1 %v7183_v46  ;;  %2011 = vmatmul.mubr.bf16.gmra.mrb[100].mxu0 %v4933_v11  ;;  %v5812_v11 = vld [vmem:[%s7151_s3] sm:$0xff] }
 0x121   :  { %1091 = vperm.xlu1 %4787, %v4984_v60   ;;  %2018 = vmatprep.mubr.bf16.mxu0 %v4934_v17  ;;  %v4985_v60 = vld [vmem:[%s7148_s0 + $0xf0] sm:$0xff]  ;;  %v5838_v5 = vrot.slane %v5812_v11, %v7205_v24 }
 0x122   :  { %v5800_v21 = vpop.permute.xlu1 %651  ;;  %v5802_v33 = vpop.permute.xlu0 %1195 }
 0x123   :  { %7201 = vst [vmem:[#allocation43_spill] sm:$0xff] %v5800_v21  ;;  %7202 = vst [vmem:[#allocation44_spill] sm:$0xff] %v5802_v33  ;;  %v7164_v33 = vsub.s32 0, %v5794_v25  ;;  %v848_v30 = vmul.f32 %v5838_v5, %v5433_v22  ;;  %v851_v22 = vmul.f32 %v5838_v5, %v5446_v29  ;;  %v4942_v29 = vld [vmem:[%s7149_s1 + $0x1c0] ss:$8 sps:$4 sm:$0xff]  }
 0x125   :  { %1095 = vperm.xlu1 %4787, %v4985_v60   ;;  %v155_v60 = vld [vmem:[%s7148_s0 + $0x1a8] sm:$0xff]  ;;  %v5844_v37 = vrot.slane %v5812_v11, %v7164_v33  ;;  %v846_v33 = vmul.f32 %v5838_v5, %v5431_v20 }
 0x126   :  { %v5817_v17 = vpop.permute.xlu1 %655  ;;  %v5824_v16 = vpop.permute.xlu0 %1203  ;;  %799 = vperm.xlu0 %4825, %v155_v60   ;;  %v849_v60 = vmul.f32 %v5838_v5, %v5475_v39 }
 0x127   :  { %7203 = vst [vmem:[#allocation45_spill] sm:$0xff] %v5817_v17  ;;  %7204 = vst [vmem:[#allocation46_spill] sm:$0xff] %v5824_v16  ;;  %v5849_v16 = vrot.slane %v5812_v11, %v7165_v59  ;;  %v4939_v59 = vld [vmem:[%s7149_s1 + $0x1b0] ss:$8 sps:$4 sm:$0xff]  }
 0x128   :  { %2019 = vmatmul.mubr.bf16.gmra.mrb[104].mxu0 %v4936_v40 }
 0x129   :  { %4788 = vset.pattern.permute.xlu1 %v7187_v15  ;;  %2026 = vmatprep.mubr.bf16.mxu0 %v4937_v0  ;;  %v156_v0 = vld [vmem:[%s7148_s0 + $0x1b0] sm:$0xff]  ;;  %v1234_v21 = vmul.f32 %v5849_v16, %v5492_v48  ;;  %v1237_v39 = vmul.f32 %v5849_v16, %v5514_v3  ;;  %v1235_v48 = vmul.f32 %v5849_v16, %v5587_v62 }
 0x12a   :  { %360 = vperm.xlu1 %4788, %v5830_v6   ;;  %803 = vperm.xlu0 %4825, %v156_v0  }
 0x12b   :  { %v5852_v58 = vpop.permute.xlu1 %295  ;;  %v201_v24 = vpop.permute.xlu0 %200 }
 0x12c   :  { %7206 = vst [vmem:[#allocation47_spill] sm:$0xff] %v5852_v58  ;;  %v1812_v40 = vpop.f32.mrb[0].mxu0  ;;  %v522_v18 = vmul.f32 %v5844_v37, %v201_v24  ;;  %v525_v24 = vmul.f32 %v5844_v37, %v5466_v36  ;;  %v4940_v36 = vld [vmem:[%s7149_s1 + $0x1c4] ss:$8 sps:$4 sm:$0xff]  }
 0x12d   :  { %v1814_v17 = vpop.f32.mrb[1].mxu0 }
 0x12e   :  { %v1815_v58 = vpop.f32.mrb[2].mxu0  ;;  %v910_v49 = vadd.f32 %v846_v33, %v522_v18  ;;  %4789 = vset.pattern.permute.xlu1 %v7180_v57  ;;  %v847_v17 = vmul.f32 %v5838_v5, %v5444_v27  ;;  %v7207_v27 = vsub.s32 3, %v5794_v25  ;;  %v913_v3 = vadd.f32 %v849_v60, %v525_v24  ;;  %819 = vperm.xlu0 %4825, %v5723_v14   ;;  %v5910_v24 = vld [vmem:[%s7148_s0 + $0x118] sm:$0xff] }
 0x12f   :  { %v1817_v20 = vpop.f32.mrb[3].mxu0  ;;  %715 = vperm.xlu1 %4789, %v5830_v6  }
 0x130   :  { %v206_v28 = vpop.permute.xlu0 %205  ;;  %v1298_v18 = vadd.f32 %v1234_v21, %v910_v49  ;;  %v5879_v20 = vpop.permute.xlu1 %663  ;;  %2027 = vmatmul.mubr.bf16.gmra.mrb[108].mxu0 %v4939_v59  ;;  %v5884_v0 = vrot.slane %v5812_v11, %v7207_v27  ;;  %v1301_v27 = vadd.f32 %v1237_v39, %v913_v3 }
 0x131   :  { %v523_v33 = vmul.f32 %v5844_v37, %v206_v28  ;;  %2034 = vmatprep.mubr.bf16.mxu0 %v4940_v36 }
 0x132   :  { %v1813_v23 = vadd.f32 %v1812_v40, %v1298_v18  ;;  %v1236_v40 = vmul.f32 %v5849_v16, %v5502_v53  ;;  %v527_v53 = vmul.f32 %v5844_v37, %v5523_v10 }
 0x133   :  { %v911_v9 = vadd.f32 %v847_v17, %v523_v33  ;;  %719 = vperm.xlu1 %4789, %v5383_v63   ;;  %v1820_v62 = vpop.f32.mrb[4].mxu0  ;;  %v1239_v33 = vmul.f32 %v5849_v16, %v5576_v54 }
 0x134   :  { %v211_v49 = vpop.permute.xlu0 %210  ;;  %v1822_v59 = vpop.f32.mrb[5].mxu0  ;;  %v2071_v14 = vmul.f32 %v5884_v0, %v1813_v23  ;;  %v915_v54 = vadd.f32 %v851_v22, %v527_v53 }
 0x135   :  { %v1299_v21 = vadd.f32 %v1235_v48, %v911_v9  ;;  %v524_v28 = vmul.f32 %v5844_v37, %v211_v49  ;;  %v5900_v63 = vpop.permute.xlu1 %1039  ;;  %v1823_v60 = vpop.f32.mrb[6].mxu0  ;;  %v7208_v9 = vsub.s32 4, %v5794_v25  ;;  %v1238_v49 = vmul.f32 %v5849_v16, %v5598_v52 }
 0x136   :  { %v1824_v48 = vadd.f32 %v1823_v60, %v1301_v27  ;;  %v1825_v18 = vpop.f32.mrb[7].mxu0  ;;  %v852_v52 = vmul.f32 %v5838_v5, %v5461_v34  ;;  %v528_v27 = vmul.f32 %v5844_v37, %v5545_v35  ;;  %v853_v35 = vmul.f32 %v5838_v5, %v5565_v47 }
 0x137   :  { %v5905_v17 = vrot.slane %v5812_v11, %v7208_v9  ;;  %v1816_v23 = vadd.f32 %v1815_v58, %v1299_v21  ;;  %v912_v39 = vadd.f32 %v848_v30, %v524_v28  ;;  %v850_v11 = vmul.f32 %v5838_v5, %v5534_v19  ;;  %4790 = vset.pattern.permute.xlu1 %v7187_v15 }
 0x138   :  { %v221_v3 = vpop.permute.xlu0 %220  ;;  %375 = vperm.xlu1 %4790, %v5910_v24   ;;  %v2074_v30 = vmul.f32 %v5884_v0, %v1824_v48  ;;  %2035 = vmatmul.mubr.bf16.gmra.mrb[112].mxu0 %v4942_v29  ;;  %v1240_v48 = vmul.f32 %v5849_v16, %v5585_v61 }
 0x139   :  { %v2072_v59 = vmul.f32 %v5884_v0, %v1816_v23  ;;  %v1300_v10 = vadd.f32 %v1236_v40, %v912_v39  ;;  %v526_v58 = vmul.f32 %v5844_v37, %v221_v3  ;;  %v5928_v36 = vpop.permute.xlu1 %1047  ;;  %v2139_v19 = vadd.f32 %v5905_v17, %v2071_v14 }
 0x13a   :  { %v1303_v39 = vadd.f32 %v1239_v33, %v915_v54  ;;  %v2142_v22 = vadd.f32 %v5905_v17, %v2074_v30  ;;  %v916_v3 = vadd.f32 %v852_v52, %v528_v27  ;;  %v854_v27 = vmul.f32 %v5838_v5, %v5607_v2 }
 0x13b   :  { %v1821_v21 = vadd.f32 %v1820_v62, %v1300_v10  ;;  %v914_v28 = vadd.f32 %v850_v11, %v526_v58  ;;  %v1828_v40 = vpop.f32.mrb[8].mxu0  ;;  %v2140_v60 = vadd.f32 %v5905_v17, %v2072_v59  ;;  %v2203_v29 = vmax.f32 %v2139_v19, 0.0 }
 0x13c   :  { %4791 = vset.pattern.permute.xlu1 %v7180_v57  ;;  %v1830_v23 = vpop.f32.mrb[9].mxu0  ;;  %v529_v10 = vmul.f32 %v5844_v37, %v5552_v41  ;;  %v1241_v58 = vmul.f32 %v5849_v16, %v5604_v12  ;;  %v2206_v19 = vmax.f32 %v2142_v22, 0.0  ;;  %v246_v54 = vpop.permute.xlu0 %245  ;;  %v1304_v12 = vadd.f32 %v1240_v48, %v916_v3  ;;  %v4986_v48 = vld [vmem:[%s7148_s0 + $0x110] sm:$0xff] }
 0x13d   :  { %v1302_v9 = vadd.f32 %v1238_v49, %v914_v28  ;;  %v2073_v14 = vmul.f32 %v5884_v0, %v1821_v21  ;;  %727 = vperm.xlu1 %4791, %v5910_v24   ;;  %v5940_v62 = vpop.permute.xlu1 %1051  ;;  %v1831_v34 = vpop.f32.mrb[10].mxu0  ;;  %v2204_v53 = vmax.f32 %v2140_v60, 0.0 }
 0x13e   :  { %v1832_v11 = vadd.f32 %v1831_v34, %v1303_v39  ;;  %v1833_v33 = vpop.f32.mrb[11].mxu0  ;;  %v917_v21 = vadd.f32 %v853_v35, %v529_v10  ;;  %v530_v34 = vmul.f32 %v5844_v37, %v5600_v8  ;;  %v855_v8 = vmul.f32 %v5838_v5, %v5619_v26 }
 0x13f   :  { %v1829_v18 = vadd.f32 %v1828_v40, %v1302_v9  ;;  %v2267_v49 = vpack.c.bf16 %v2204_v53, %v2203_v29  ;;  %v2141_v59 = vadd.f32 %v5905_v17, %v2073_v14  ;;  %v531_v29 = vmul.f32 %v5844_v37, %v246_v54 }
 0x140   :  { %v2076_v47 = vmul.f32 %v5884_v0, %v1832_v11  ;;  %v1305_v22 = vadd.f32 %v1241_v58, %v917_v21  ;;  %v251_v33 = vpop.permute.xlu0 %250  ;;  %v4945_v58 = vld [vmem:[%s7149_s1 + $0x1d0] ss:$8 sps:$4 sm:$0xff]   ;;  %v856_v26 = vmul.f32 %v5838_v5, %v5473_v38 }
 0x141   :  { %v2075_v30 = vmul.f32 %v5884_v0, %v1829_v18  ;;  %4792 = vset.pattern.permute.xlu1 %v7183_v46  ;;  %4534 = vmatprep.mubr.bf16.mxu1 %v2267_v49  ;;  %v2205_v61 = vmax.f32 %v2141_v59, 0.0  ;;  %v918_v49 = vadd.f32 %v854_v27, %v530_v34 }
 0x142   :  { %v2144_v52 = vadd.f32 %v5905_v17, %v2076_v47  ;;  %1103 = vperm.xlu1 %4792, %v5830_v6   ;;  %v5957_v41 = vpop.permute.xlu1 %305  ;;  %v1242_v6 = vmul.f32 %v5849_v16, %v5652_v55  ;;  %v4943_v55 = vld [vmem:[%s7149_s1 + $0x1d4] ss:$8 sps:$4 sm:$0xff]   ;;  %v919_v47 = vadd.f32 %v855_v8, %v531_v29  ;;  %v1244_v29 = vmul.f32 %v5849_v16, %v5666_v56 }
 0x143   :  { %v2143_v28 = vadd.f32 %v5905_v17, %v2075_v30  ;;  %v1836_v40 = vpop.f32.mrb[12].mxu0  ;;  %v2268_v60 = vpack.c.bf16 %v2206_v19, %v2205_v61  ;;  %v1243_v30 = vmul.f32 %v5849_v16, %v5616_v31  ;;  %2042 = vmatprep.mubr.bf16.mxu0 %v4943_v55  ;;  %v532_v19 = vmul.f32 %v5844_v37, %v251_v33 }
 0x144   :  { %v2208_v23 = vmax.f32 %v2144_v52, 0.0  ;;  %v1837_v39 = vadd.f32 %v1836_v40, %v1304_v12  ;;  %v1838_v14 = vpop.f32.mrb[13].mxu0  ;;  %v1306_v61 = vadd.f32 %v1242_v6, %v918_v49  ;;  %2043 = vmatmul.mubr.bf16.gmra.mrb[116].mxu0 %v4945_v58  ;;  %v857_v31 = vmul.f32 %v5838_v5, %v5640_v51 }
 0x145   :  { %v2207_v9 = vmax.f32 %v2143_v28, 0.0  ;;  %v1839_v53 = vpop.f32.mrb[14].mxu0  ;;  %4535 = vmatmul.mubr.bf16.vlgmr.msra.gmra.mrb[0].mxu1 %v2268_v60  ;;  %v1307_v40 = vadd.f32 %v1243_v30, %v919_v47  ;;  %v920_v60 = vadd.f32 %v856_v26, %v532_v19  ;;  %v533_v51 = vmul.f32 %v5844_v37, %v5628_v42 }
 0x146   :  { %v2077_v35 = vmul.f32 %v5884_v0, %v1837_v39  ;;  %v1840_v2 = vadd.f32 %v1839_v53, %v1305_v22  ;;  %1111 = vperm.xlu1 %4792, %v4986_v48   ;;  %v1841_v11 = vpop.f32.mrb[15].mxu0  ;;  %v261_v39 = vpop.permute.xlu0 %260  ;;  %v5998_v22 = vld [vmem:[%s7148_s0 + $0x128] sm:$0xff]  ;;  %v1245_v53 = vmul.f32 %v5849_v16, %v5678_v7  ;;  %v858_v56 = vmul.f32 %v5838_v5, %v5704_v13 }
 0x147   :  { %v2269_v18 = vpack.c.bf16 %v2208_v23, %v2207_v9  ;;  %v5972_v3 = vpop.permute.xlu1 %667  ;;  %v921_v48 = vadd.f32 %v857_v31, %v533_v51  ;;  %v1308_v11 = vadd.f32 %v1244_v29, %v920_v60  ;;  %v859_v49 = vmul.f32 %v5838_v5, %v5485_v44  ;;  %v4946_v44 = vld [vmem:[%s7149_s1 + $0x1e4] ss:$8 sps:$4 sm:$0xff]  }
 0x148   :  { %v2145_v59 = vadd.f32 %v5905_v17, %v2077_v35  ;;  %v2078_v10 = vmul.f32 %v5884_v0, %v1840_v2  ;;  %v535_v47 = vmul.f32 %v5844_v37, %v5687_v45  ;;  %2050 = vmatprep.mubr.bf16.mxu0 %v4946_v44  ;;  %v4948_v45 = vld [vmem:[%s7149_s1 + $0x1e0] ss:$8 sps:$4 sm:$0xff]   ;;  %v860_v31 = vmul.f32 %v5838_v5, %v5497_v50 }
 0x149   :  { %4538 = vmatprep.mubr.bf16.mxu1 %v2269_v18  ;;  %v534_v18 = vmul.f32 %v5844_v37, %v261_v39  ;;  %v1309_v55 = vadd.f32 %v1245_v53, %v921_v48  ;;  %v536_v60 = vmul.f32 %v5844_v37, %v5712_v1  ;;  %v7210_v53 = vld [vmem:[#allocation30_spill] sm:$0xff] }
 0x14a   :  { %v2146_v54 = vadd.f32 %v5905_v17, %v2078_v10  ;;  %1115 = vperm.xlu1 %4792, %v5910_v24   ;;  %v2209_v28 = vmax.f32 %v2145_v59, 0.0  ;;  %v1246_v59 = vmul.f32 %v5849_v16, %v5625_v43  ;;  %v1247_v43 = vmul.f32 %v5849_v16, %v5755_v32  ;;  %v7211_v48 = vld [vmem:[#allocation38_spill] sm:$0xff] }
 0x14b   :  { %v1844_v21 = vpop.f32.mrb[16].mxu0  ;;  %v922_v13 = vadd.f32 %v858_v56, %v534_v18  ;;  %v923_v32 = vadd.f32 %v859_v49, %v535_v47  ;;  %v1248_v1 = vmul.f32 %v5849_v16, %v7211_v48  ;;  %v924_v49 = vadd.f32 %v860_v31, %v536_v60  ;;  %v7215_v60 = vld [vmem:[#allocation45_spill] sm:$0xff] }
 0x14c   :  { %v2210_v52 = vmax.f32 %v2146_v54, 0.0  ;;  %v1845_v12 = vadd.f32 %v1844_v21, %v1306_v61  ;;  %v5989_v27 = vpop.permute.xlu1 %310  ;;  %v1846_v38 = vpop.f32.mrb[17].mxu0  ;;  %2051 = vmatmul.mubr.bf16.gmra.mrb[120].mxu0 %v4948_v45 }
 0x14d   :  { %v1847_v23 = vpop.f32.mrb[18].mxu0  ;;  %v1311_v29 = vadd.f32 %v1247_v43, %v923_v32  ;;  %v1312_v47 = vadd.f32 %v1248_v1, %v924_v49 }
 0x14e   :  { %v2079_v9 = vmul.f32 %v5884_v0, %v1845_v12  ;;  %4793 = vset.pattern.permute.xlu1 %v7187_v15  ;;  %v2270_v24 = vpack.c.bf16 %v2210_v52, %v2209_v28  ;;  %v1848_v14 = vadd.f32 %v1847_v23, %v1307_v40  ;;  %v1849_v34 = vpop.f32.mrb[19].mxu0  ;;  %v6040_v52 = vld [vmem:[%s7148_s0 + $0x130] sm:$0xff]  ;;  %v1310_v40 = vadd.f32 %v1246_v59, %v922_v13  ;;  %v7213_v13 = vld [vmem:[#allocation43_spill] sm:$0xff] }
 0x14f   :  { %385 = vperm.xlu1 %4793, %v5998_v22  }
 0x150   :  { %v6007_v6 = vpop.permute.xlu1 %315  ;;  %4539 = vmatmul.mubr.bf16.gmra.mrb[4].mxu1 %v2270_v24  ;;  %v2147_v35 = vadd.f32 %v5905_v17, %v2079_v9  ;;  %v2080_v2 = vmul.f32 %v5884_v0, %v1848_v14  ;;  %v7209_v9 = vld [vmem:[#allocation33_spill] sm:$0xff] }
 0x151   :  { %v861_v23 = vmul.f32 %v5838_v5, %v7209_v9  ;;  %v863_v9 = vmul.f32 %v5838_v5, %v7215_v60 }
 0x152   :  { %v2148_v8 = vadd.f32 %v5905_v17, %v2080_v2  ;;  %v2211_v10 = vmax.f32 %v2147_v35, 0.0  ;;  %v537_v35 = vmul.f32 %v5844_v37, %v7210_v53  ;;  %v4989_v2 = vld [vmem:[%s7148_s0 + $0x138] sm:$0xff] }
 0x153   :  { %4794 = vset.pattern.permute.xlu1 %v7180_v57  ;;  %v1852_v42 = vpop.f32.mrb[20].mxu0 }
 0x154   :  { %v1853_v7 = vadd.f32 %v1852_v42, %v1308_v11  ;;  %731 = vperm.xlu1 %4794, %v5390_v4   ;;  %v1854_v33 = vpop.f32.mrb[21].mxu0  ;;  %v2212_v58 = vmax.f32 %v2148_v8, 0.0 }
 0x155   :  { %v6021_v26 = vpop.permute.xlu1 %679  ;;  %v1855_v30 = vpop.f32.mrb[22].mxu0 }
 0x156   :  { %v2081_v19 = vmul.f32 %v5884_v0, %v1853_v7  ;;  %v1856_v4 = vadd.f32 %v1855_v30, %v1309_v55  ;;  %v1857_v54 = vpop.f32.mrb[23].mxu0  ;;  %v2271_v61 = vpack.c.bf16 %v2212_v58, %v2211_v10  ;;  %v7212_v7 = vld [vmem:[#allocation20_spill] sm:$0xff]  ;;  %v925_v55 = vadd.f32 %v861_v23, %v537_v35  ;;  %v286_v58 = vpop.permute.xlu0 %285 }
 0x157   :  { %v1249_v33 = vmul.f32 %v5849_v16, %v7212_v7  ;;  %v539_v43 = vmul.f32 %v5844_v37, %v286_v58  ;;  %v1250_v23 = vmul.f32 %v5849_v16, %v5900_v63 }
 0x158   :  { %v2149_v21 = vadd.f32 %v5905_v17, %v2081_v19  ;;  %v2082_v28 = vmul.f32 %v5884_v0, %v1856_v4  ;;  %4795 = vset.pattern.permute.xlu1 %v7187_v15  ;;  %4542 = vmatprep.mubr.bf16.mxu1 %v2271_v61  ;;  %v862_v19 = vmul.f32 %v5838_v5, %v7213_v13  ;;  %v4949_v61 = vld [vmem:[%s7149_s1 + $0x1f4] ss:$8 sps:$4 sm:$0xff]   ;;  %v6106_v13 = vld [vmem:[%s7148_s0 + $0x140] sm:$0xff] }
 0x159   :  { %390 = vperm.xlu1 %4795, %v6040_v52   ;;  %v1313_v44 = vadd.f32 %v1249_v33, %v925_v55  ;;  %2058 = vmatprep.mubr.bf16.mxu0 %v4949_v61 }
 0x15a   :  { %v2150_v12 = vadd.f32 %v5905_v17, %v2082_v28  ;;  %v6044_v38 = vpop.permute.xlu1 %1059  ;;  %v2213_v39 = vmax.f32 %v2149_v21, 0.0  ;;  %v291_v35 = vpop.permute.xlu0 %290 }
 0x15b   :  { %v1860_v24 = vpop.f32.mrb[24].mxu0 }
 0x15c   :  { %v2214_v14 = vmax.f32 %v2150_v12, 0.0  ;;  %v1861_v34 = vadd.f32 %v1860_v24, %v1310_v40  ;;  %v1862_v51 = vpop.f32.mrb[25].mxu0  ;;  %v4951_v12 = vld [vmem:[%s7149_s1 + $0x1f0] ss:$8 sps:$4 sm:$0xff]   ;;  %v7214_v40 = vld [vmem:[#allocation40_spill] sm:$0xff] }
 0x15d   :  { %395 = vperm.xlu1 %4795, %v4989_v2   ;;  %v1863_v50 = vpop.f32.mrb[26].mxu0  ;;  %v538_v31 = vmul.f32 %v5844_v37, %v7214_v40  ;;  %2059 = vmatmul.mubr.bf16.gmra.mrb[124].mxu0 %v4951_v12 }
 0x15e   :  { %v2083_v18 = vmul.f32 %v5884_v0, %v1861_v34  ;;  %v1864_v11 = vadd.f32 %v1863_v50, %v1311_v29  ;;  %v6060_v8 = vpop.permute.xlu1 %1063  ;;  %v2272_v42 = vpack.c.bf16 %v2214_v14, %v2213_v39  ;;  %v1865_v56 = vpop.f32.mrb[27].mxu0  ;;  %v7216_v29 = vld [vmem:[#allocation21_spill] sm:$0xff]  ;;  %v927_v50 = vadd.f32 %v863_v9, %v539_v43  ;;  %v7218_v43 = vld [vmem:[#allocation47_spill] sm:$0xff] }
 0x15f   :  { %v1251_v53 = vmul.f32 %v5849_v16, %v7216_v29  ;;  %v7219_v29 = vld [vmem:[#allocation12_spill] sm:$0xff] }
 0x160   :  { %v2151_v59 = vadd.f32 %v5905_v17, %v2083_v18  ;;  %v2084_v10 = vmul.f32 %v5884_v0, %v1864_v11  ;;  %4543 = vmatmul.mubr.bf16.gmra.mrb[8].mxu1 %v2272_v42  ;;  %v7217_v18 = vld [vmem:[#allocation11_spill] sm:$0xff]  ;;  %v540_v42 = vmul.f32 %v5844_v37, %v291_v35  ;;  %v7220_v35 = vld [vmem:[#allocation22_spill] sm:$0xff] }
 0x161   :  { %4797 = vset.pattern.permute.xlu1 %v7180_v57  ;;  %v864_v11 = vmul.f32 %v5838_v5, %v7217_v18  ;;  %v1315_v58 = vadd.f32 %v1251_v53, %v927_v50  ;;  %v867_v53 = vmul.f32 %v5838_v5, %v7219_v29  ;;  %v543_v50 = vmul.f32 %v5844_v37, %v5957_v41  ;;  %v4990_v41 = vld [vmem:[%s7148_s0 + $0x148] sm:$0xff] }
 0x162   :  { %v2152_v30 = vadd.f32 %v5905_v17, %v2084_v10  ;;  %743 = vperm.xlu1 %4797, %v4989_v2   ;;  %v2215_v21 = vmax.f32 %v2151_v59, 0.0  ;;  %v926_v2 = vadd.f32 %v862_v19, %v538_v31 }
 0x163   :  { %v6070_v4 = vpop.permute.xlu1 %320  ;;  %v1868_v54 = vpop.f32.mrb[28].mxu0  ;;  %v928_v19 = vadd.f32 %v864_v11, %v540_v42 }
 0x164   :  { %v2216_v28 = vmax.f32 %v2152_v30, 0.0  ;;  %v1869_v45 = vadd.f32 %v1868_v54, %v1312_v47  ;;  %v1870_v32 = vpop.f32.mrb[29].mxu0  ;;  %v1314_v7 = vadd.f32 %v1250_v23, %v926_v2  ;;  %v865_v30 = vmul.f32 %v5838_v5, %v5879_v20 }
 0x165   :  { %v1871_v24 = vpop.f32.mrb[30].mxu0  ;;  %v1252_v20 = vmul.f32 %v5849_v16, %v5928_v36  ;;  %v866_v36 = vmul.f32 %v5838_v5, %v5972_v3  ;;  %v1254_v2 = vmul.f32 %v5849_v16, %v7220_v35 }
 0x166   :  { %v2085_v39 = vmul.f32 %v5884_v0, %v1869_v45  ;;  %v1872_v14 = vadd.f32 %v1871_v24, %v1313_v44  ;;  %4798 = vset.pattern.permute.xlu1 %v7183_v46  ;;  %v2273_v34 = vpack.c.bf16 %v2216_v28, %v2215_v21  ;;  %v1873_v51 = vpop.f32.mrb[31].mxu0  ;;  %v541_v21 = vmul.f32 %v5844_v37, %v7218_v43  ;;  %v301_v45 = vpop.permute.xlu0 %300 }
 0x167   :  { %1123 = vperm.xlu1 %4798, %v5998_v22   ;;  %v1253_v28 = vmul.f32 %v5849_v16, %v5940_v62  ;;  %v542_v60 = vmul.f32 %v5844_v37, %v301_v45  ;;  %v1316_v9 = vadd.f32 %v1252_v20, %v928_v19  ;;  %v545_v45 = vmul.f32 %v5844_v37, %v6007_v6 }
 0x168   :  { %v2153_v63 = vadd.f32 %v5905_v17, %v2085_v39  ;;  %v2086_v48 = vmul.f32 %v5884_v0, %v1872_v14  ;;  %v6092_v1 = vpop.permute.xlu1 %683  ;;  %4546 = vmatprep.mubr.bf16.mxu1 %v2273_v34  ;;  %v929_v40 = vadd.f32 %v865_v30, %v541_v21 }
 0x16a   :  { %v2154_v56 = vadd.f32 %v5905_v17, %v2086_v48  ;;  %v2217_v33 = vmax.f32 %v2153_v63, 0.0  ;;  %v1317_v24 = vadd.f32 %v1253_v28, %v929_v40  ;;  %v930_v48 = vadd.f32 %v866_v36, %v542_v60  ;;  %v7222_v60 = vld [vmem:[#allocation24_spill] sm:$0xff]  ;;  %v326_v6 = vpop.permute.xlu0 %325 }
 0x16b   :  { %1127 = vperm.xlu1 %4798, %v6040_v52   ;;  %v1876_v22 = vpop.f32.mrb[32].mxu0 }
 0x16c   :  { %v2218_v55 = vmax.f32 %v2154_v56, 0.0  ;;  %v1877_v49 = vadd.f32 %v1876_v22, %v1314_v7  ;;  %v6099_v59 = vpop.permute.xlu1 %687  ;;  %v1878_v10 = vpop.f32.mrb[33].mxu0  ;;  %v1255_v7 = vmul.f32 %v5849_v16, %v6044_v38  ;;  %v544_v38 = vmul.f32 %v5844_v37, %v5989_v27 }
 0x16d   :  { %v1879_v47 = vpop.f32.mrb[34].mxu0  ;;  %v1318_v10 = vadd.f32 %v1254_v2, %v930_v48  ;;  %v871_v2 = vmul.f32 %v5838_v5, %v6099_v59 }
 0x16e   :  { %v2087_v52 = vmul.f32 %v5884_v0, %v1877_v49  ;;  %v1880_v54 = vadd.f32 %v1879_v47, %v1315_v58  ;;  %v2274_v44 = vpack.c.bf16 %v2218_v55, %v2217_v33  ;;  %v1881_v61 = vpop.f32.mrb[35].mxu0  ;;  %v931_v55 = vadd.f32 %v867_v53, %v543_v50  ;;  %v7221_v58 = vld [vmem:[#allocation13_spill] sm:$0xff] }
 0x16f   :  { %4799 = vset.pattern.permute.xlu1 %v7187_v15  ;;  %v868_v30 = vmul.f32 %v5838_v5, %v7221_v58  ;;  %v869_v47 = vmul.f32 %v5838_v5, %v6021_v26  ;;  %v1256_v26 = vmul.f32 %v5849_v16, %v6060_v8 }
 0x170   :  { %v2155_v32 = vadd.f32 %v5905_v17, %v2087_v52  ;;  %v2088_v12 = vmul.f32 %v5884_v0, %v1880_v54  ;;  %400 = vperm.xlu1 %4799, %v6106_v13   ;;  %4547 = vmatmul.mubr.bf16.gmra.mrb[12].mxu1 %v2274_v44  ;;  %v6153_v54 = vld [vmem:[%s7148_s0 + $0x158] sm:$0xff]  ;;  %v1319_v28 = vadd.f32 %v1255_v7, %v931_v55  ;;  %v7223_v55 = vld [vmem:[#allocation25_spill] sm:$0xff] }
 0x171   :  { %v6119_v31 = vpop.permute.xlu1 %335 }
 0x172   :  { %v2156_v62 = vadd.f32 %v5905_v17, %v2088_v12  ;;  %v2219_v39 = vmax.f32 %v2155_v32, 0.0 }
 0x173   :  { %v1884_v23 = vpop.f32.mrb[36].mxu0 }
 0x174   :  { %v2220_v14 = vmax.f32 %v2156_v62, 0.0  ;;  %v1885_v34 = vadd.f32 %v1884_v23, %v1316_v9  ;;  %4800 = vset.pattern.permute.xlu1 %v7180_v57  ;;  %v1886_v51 = vpop.f32.mrb[37].mxu0  ;;  %v1257_v62 = vmul.f32 %v5849_v16, %v7222_v60  ;;  %v933_v9 = vadd.f32 %v869_v47, %v545_v45  ;;  %v7225_v45 = vld [vmem:[#allocation23_spill] sm:$0xff] }
 0x175   :  { %747 = vperm.xlu1 %4800, %v6106_v13   ;;  %v1887_v63 = vpop.f32.mrb[38].mxu0  ;;  %v547_v51 = vmul.f32 %v5844_v37, %v326_v6 }
 0x176   :  { %v2089_v3 = vmul.f32 %v5884_v0, %v1885_v34  ;;  %v1888_v18 = vadd.f32 %v1887_v63, %v1317_v24  ;;  %v6134_v11 = vpop.permute.xlu1 %695  ;;  %v2275_v42 = vpack.c.bf16 %v2220_v14, %v2219_v39  ;;  %v1889_v56 = vpop.f32.mrb[39].mxu0  ;;  %v932_v24 = vadd.f32 %v868_v30, %v544_v38  ;;  %v7224_v38 = vld [vmem:[#allocation14_spill] sm:$0xff] }
 0x177   :  { %v870_v34 = vmul.f32 %v5838_v5, %v6092_v1  ;;  %v1321_v35 = vadd.f32 %v1257_v62, %v933_v9  ;;  %v331_v56 = vpop.permute.xlu0 %330  ;;  %v872_v47 = vmul.f32 %v5838_v5, %v7224_v38 }
 0x178   :  { %v2157_v22 = vadd.f32 %v5905_v17, %v2089_v3  ;;  %v2090_v33 = vmul.f32 %v5884_v0, %v1888_v18  ;;  %4550 = vmatprep.mubr.bf16.mxu1 %v2275_v42  ;;  %v1320_v14 = vadd.f32 %v1256_v26, %v932_v24  ;;  %v546_v18 = vmul.f32 %v5844_v37, %v6070_v4 }
 0x179   :  { %751 = vperm.xlu1 %4800, %v4990_v41  }
 0x17a   :  { %v2158_v49 = vadd.f32 %v5905_v17, %v2090_v33  ;;  %v2221_v44 = vmax.f32 %v2157_v22, 0.0  ;;  %v934_v59 = vadd.f32 %v870_v34, %v546_v18  ;;  %v7226_v18 = vld [vmem:[#allocation26_spill] sm:$0xff] }
 0x17b   :  { %v1072_v19 = vpop.permute.xlu1 %1071  ;;  %v1892_v52 = vpop.f32.mrb[40].mxu0 }
 0x17c   :  { %v2222_v61 = vmax.f32 %v2158_v49, 0.0  ;;  %v1893_v43 = vadd.f32 %v1892_v52, %v1318_v10  ;;  %v1894_v21 = vpop.f32.mrb[41].mxu0  ;;  %v1258_v1 = vmul.f32 %v5849_v16, %v1072_v19  ;;  %v1259_v49 = vmul.f32 %v5849_v16, %v7223_v55  ;;  %v341_v62 = vpop.permute.xlu0 %340 }
 0x17d   :  { %4801 = vset.pattern.permute.xlu1 %v7187_v15  ;;  %v1895_v27 = vpop.f32.mrb[42].mxu0  ;;  %v935_v10 = vadd.f32 %v871_v2, %v547_v51  ;;  %v548_v19 = vmul.f32 %v5844_v37, %v331_v56 }
 0x17e   :  { %v2091_v20 = vmul.f32 %v5884_v0, %v1893_v43  ;;  %v1896_v32 = vadd.f32 %v1895_v27, %v1319_v28  ;;  %415 = vperm.xlu1 %4801, %v6153_v54   ;;  %v2276_v12 = vpack.c.bf16 %v2222_v61, %v2221_v44  ;;  %v1897_v40 = vpop.f32.mrb[43].mxu0  ;;  %v1322_v44 = vadd.f32 %v1258_v1, %v934_v59  ;;  %v7227_v1 = vld [vmem:[#allocation37_spill] sm:$0xff] }
 0x17f   :  { %v1080_v23 = vpop.permute.xlu1 %1079  ;;  %v1323_v26 = vadd.f32 %v1259_v49, %v935_v10 }
 0x180   :  { %v2159_v36 = vadd.f32 %v5905_v17, %v2091_v20  ;;  %v2092_v39 = vmul.f32 %v5884_v0, %v1896_v32  ;;  %4551 = vmatmul.mubr.bf16.gmra.mrb[16].mxu1 %v2276_v12  ;;  %v936_v20 = vadd.f32 %v872_v47, %v548_v19  ;;  %v1260_v40 = vmul.f32 %v5849_v16, %v1080_v23  ;;  %v7228_v47 = vld [vmem:[#allocation32_spill] sm:$0xff] }
 0x182   :  { %v2160_v8 = vadd.f32 %v5905_v17, %v2092_v39  ;;  %4802 = vset.pattern.permute.xlu1 %v7180_v57  ;;  %v2223_v50 = vmax.f32 %v2159_v36, 0.0  ;;  %v6198_v36 = vld [vmem:[%s7148_s0 + $0x1e8] sm:$0xff]  ;;  %v549_v39 = vmul.f32 %v5844_v37, %v6119_v31  ;;  %v1324_v31 = vadd.f32 %v1260_v40, %v936_v20  ;;  %v7230_v40 = vld [vmem:[#allocation42_spill] sm:$0xff] }
 0x183   :  { %759 = vperm.xlu1 %4802, %v6153_v54   ;;  %v1084_v29 = vpop.permute.xlu1 %1083  ;;  %v1900_v53 = vpop.f32.mrb[44].mxu0  ;;  %831 = vperm.xlu0 %4825, %v6198_v36  }
 0x184   :  { %v2224_v63 = vmax.f32 %v2160_v8, 0.0  ;;  %v1901_v48 = vadd.f32 %v1900_v53, %v1320_v14  ;;  %v1902_v3 = vpop.f32.mrb[45].mxu0  ;;  %v550_v14 = vmul.f32 %v5844_v37, %v341_v62 }
 0x185   :  { %v1903_v42 = vpop.f32.mrb[46].mxu0 }
 0x186   :  { %v2093_v7 = vmul.f32 %v5884_v0, %v1901_v48  ;;  %v1904_v22 = vadd.f32 %v1903_v42, %v1321_v35  ;;  %v2277_v33 = vpack.c.bf16 %v2224_v63, %v2223_v50  ;;  %v1905_v41 = vpop.f32.mrb[47].mxu0  ;;  %v1262_v42 = vmul.f32 %v5849_v16, %v7226_v18 }
 0x187   :  { %4803 = vset.pattern.permute.xlu1 %v7183_v46 }
 0x188   :  { %v2161_v58 = vadd.f32 %v5905_v17, %v2093_v7  ;;  %v2094_v4 = vmul.f32 %v5884_v0, %v1904_v22  ;;  %1135 = vperm.xlu1 %4803, %v6106_v13   ;;  %v6184_v30 = vpop.permute.xlu1 %345  ;;  %4554 = vmatprep.mubr.bf16.mxu1 %v2277_v33  ;;  %v873_v13 = vmul.f32 %v5838_v5, %v6134_v11 }
 0x189   :  { %v1261_v11 = vmul.f32 %v5849_v16, %v1084_v29 }
 0x18a   :  { %v2162_v52 = vadd.f32 %v5905_v17, %v2094_v4  ;;  %v2225_v43 = vmax.f32 %v2161_v58, 0.0  ;;  %v937_v34 = vadd.f32 %v873_v13, %v549_v39  ;;  %v4991_v4 = vld [vmem:[%s7148_s0 + $0x160] sm:$0xff] }
 0x18b   :  { %v1908_v61 = vpop.f32.mrb[48].mxu0 }
 0x18c   :  { %v2226_v21 = vmax.f32 %v2162_v52, 0.0  ;;  %v1909_v28 = vadd.f32 %v1908_v61, %v1322_v44  ;;  %1143 = vperm.xlu1 %4803, %v7225_v45   ;;  %v1910_v27 = vpop.f32.mrb[49].mxu0  ;;  %v1325_v3 = vadd.f32 %v1261_v11, %v937_v34  ;;  %v7229_v45 = vld [vmem:[#allocation15_spill] sm:$0xff]  ;;  %v4992_v34 = vld [vmem:[%s7148_s0 + $0x178] sm:$0xff] }
 0x18d   :  { %v700_v32 = vpop.permute.xlu1 %699  ;;  %v1911_v12 = vpop.f32.mrb[50].mxu0  ;;  %v875_v27 = vmul.f32 %v5838_v5, %v7229_v45 }
 0x18e   :  { %v2095_v60 = vmul.f32 %v5884_v0, %v1909_v28  ;;  %v1912_v9 = vadd.f32 %v1911_v12, %v1323_v26  ;;  %v2278_v24 = vpack.c.bf16 %v2226_v21, %v2225_v43  ;;  %v1913_v6 = vpop.f32.mrb[51].mxu0  ;;  %v874_v51 = vmul.f32 %v5838_v5, %v700_v32 }
 0x18f   :  { %v551_v26 = vmul.f32 %v5844_v37, %v6184_v30  ;;  %v7232_v6 = vld [vmem:[#allocation16_spill] sm:$0xff] }
 0x190   :  { %v2163_v23 = vadd.f32 %v5905_v17, %v2095_v60  ;;  %v2096_v8 = vmul.f32 %v5884_v0, %v1912_v9  ;;  %1147 = vperm.xlu1 %4803, %v6153_v54   ;;  %4555 = vmatmul.mubr.bf16.gmra.mrb[20].mxu1 %v2278_v24  ;;  %v6214_v54 = vld [vmem:[%s7148_s0 + $0x1f0] sm:$0xff]  ;;  %v938_v7 = vadd.f32 %v874_v51, %v550_v14  ;;  %v7231_v60 = vld [vmem:[#allocation27_spill] sm:$0xff] }
 0x191   :  { %835 = vperm.xlu0 %4825, %v6214_v54   ;;  %v1265_v62 = vmul.f32 %v5849_v16, %v7231_v60  ;;  %v876_v39 = vmul.f32 %v5838_v5, %v7232_v6  ;;  %v939_v11 = vadd.f32 %v875_v27, %v551_v26  ;;  %v4994_v27 = vld [vmem:[%s7148_s0 + $0x170] sm:$0xff] }
 0x192   :  { %v2164_v53 = vadd.f32 %v5905_v17, %v2096_v8  ;;  %v351_v35 = vpop.permute.xlu1 %350  ;;  %v2227_v50 = vmax.f32 %v2163_v23, 0.0  ;;  %v1326_v38 = vadd.f32 %v1262_v42, %v938_v7 }
 0x193   :  { %v1916_v2 = vpop.f32.mrb[52].mxu0  ;;  %v552_v30 = vmul.f32 %v5844_v37, %v351_v35 }
 0x194   :  { %v2228_v63 = vmax.f32 %v2164_v53, 0.0  ;;  %v1917_v29 = vadd.f32 %v1916_v2, %v1324_v31  ;;  %4804 = vset.pattern.permute.xlu1 %v7187_v15  ;;  %v1918_v48 = vpop.f32.mrb[53].mxu0 }
 0x195   :  { %425 = vperm.xlu1 %4804, %v7227_v1   ;;  %v1919_v56 = vpop.f32.mrb[54].mxu0  ;;  %4830 = vset.pattern.permute.xlu0 %v7183_v46 }
 0x196   :  { %v2097_v22 = vmul.f32 %v5884_v0, %v1917_v29  ;;  %v1920_v33 = vadd.f32 %v1919_v56, %v1325_v3  ;;  %v356_v41 = vpop.permute.xlu1 %355  ;;  %v2279_v55 = vpack.c.bf16 %v2228_v63, %v2227_v50  ;;  %v1921_v49 = vpop.f32.mrb[55].mxu0  ;;  %1215 = vperm.xlu0 %4830, %v7228_v47   ;;  %v940_v50 = vadd.f32 %v876_v39, %v552_v30 }
 0x197   :  { %v553_v20 = vmul.f32 %v5844_v37, %v356_v41 }
 0x198   :  { %v2165_v59 = vadd.f32 %v5905_v17, %v2097_v22  ;;  %v2098_v10 = vmul.f32 %v5884_v0, %v1920_v33  ;;  %4558 = vmatprep.mubr.bf16.mxu1 %v2279_v55 }
 0x199   :  { %4805 = vset.pattern.permute.xlu1 %v7180_v57 }
 0x19a   :  { %v2166_v58 = vadd.f32 %v5905_v17, %v2098_v10  ;;  %763 = vperm.xlu1 %4805, %v4991_v4   ;;  %v2229_v44 = vmax.f32 %v2165_v59, 0.0  ;;  %v4993_v4 = vld [vmem:[%s7148_s0 + $0x168] sm:$0xff] }
 0x19b   :  { %v712_v19 = vpop.permute.xlu1 %711  ;;  %v1924_v52 = vpop.f32.mrb[56].mxu0 }
 0x19c   :  { %v2230_v61 = vmax.f32 %v2166_v58, 0.0  ;;  %v877_v43 = vmul.f32 %v5838_v5, %v712_v19  ;;  %v1925_v21 = vadd.f32 %v1924_v52, %v1326_v38  ;;  %v1926_v28 = vpop.f32.mrb[57].mxu0 }
 0x19d   :  { %v1927_v13 = vpop.f32.mrb[58].mxu0  ;;  %v6266_v28 = vld [vmem:[%s7148_s0 + $0x1f8] sm:$0xff] }
 0x19e   :  { %4806 = vset.pattern.permute.xlu1 %v7187_v15  ;;  %v2280_v32 = vpack.c.bf16 %v2230_v61, %v2229_v44  ;;  %v1929_v12 = vpop.f32.mrb[59].mxu0  ;;  %v941_v9 = vadd.f32 %v877_v43, %v553_v20  ;;  %v2099_v8 = vmul.f32 %v5884_v0, %v1925_v21  ;;  %v366_v21 = vpop.permute.xlu0 %365  ;;  %1227 = vperm.xlu0 %4830, %v6266_v28   ;;  %v7233_v20 = vld [vmem:[#allocation28_spill] sm:$0xff] }
 0x19f   :  { %430 = vperm.xlu1 %4806, %v7230_v40   ;;  %v555_v45 = vmul.f32 %v5844_v37, %v366_v21  ;;  %v6279_v40 = vld [vmem:[%s7148_s0 + $0x180] sm:$0xff] }
 0x1a0   :  { %v1092_v24 = vpop.permute.xlu1 %1091  ;;  %4559 = vmatmul.mubr.bf16.gmra.mrb[24].mxu1 %v2280_v32  ;;  %v1329_v2 = vadd.f32 %v1265_v62, %v941_v9  ;;  %v2167_v18 = vadd.f32 %v5905_v17, %v2099_v8  ;;  %v1267_v32 = vmul.f32 %v5849_v16, %v7233_v20 }
 0x1a1   :  { %v1263_v23 = vmul.f32 %v5849_v16, %v1092_v24 }
 0x1a2   :  { %v2231_v41 = vmax.f32 %v2167_v18, 0.0 }
 0x1a3   :  { %v1327_v14 = vadd.f32 %v1263_v23, %v939_v11  ;;  %435 = vperm.xlu1 %4806, %v4992_v34   ;;  %v1932_v51 = vpop.f32.mrb[60].mxu0 }
 0x1a4   :  { %v1096_v53 = vpop.permute.xlu1 %1095  ;;  %v1934_v31 = vpop.f32.mrb[61].mxu0 }
 0x1a5   :  { %v1928_v63 = vadd.f32 %v1927_v13, %v1327_v14  ;;  %v1264_v29 = vmul.f32 %v5849_v16, %v1096_v53  ;;  %v1935_v48 = vpop.f32.mrb[62].mxu0  ;;  %v371_v31 = vpop.permute.xlu0 %370 }
 0x1a6   :  { %v1936_v35 = vadd.f32 %v1935_v48, %v1329_v2  ;;  %v1937_v3 = vpop.f32.mrb[63].mxu0  ;;  %v4995_v2 = vld [vmem:[%s7148_s0 + $0x188] sm:$0xff]  ;;  %v7234_v48 = vld [vmem:[#allocation17_spill] sm:$0xff] }
 0x1a7   :  { %v2100_v42 = vmul.f32 %v5884_v0, %v1928_v63  ;;  %v1328_v1 = vadd.f32 %v1264_v29, %v940_v50  ;;  %4807 = vset.pattern.permute.xlu1 %v7180_v57  ;;  %v153_v29 = vld [vmem:[%s7148_s0 + $0x198] sm:$0xff]  ;;  %v556_v3 = vmul.f32 %v5844_v37, %v371_v31 }
 0x1a8   :  { %v2102_v56 = vmul.f32 %v5884_v0, %v1936_v35  ;;  %775 = vperm.xlu1 %4807, %v4992_v34   ;;  %v880_v35 = vmul.f32 %v5838_v5, %v7234_v48 }
 0x1a9   :  { %v2168_v7 = vadd.f32 %v5905_v17, %v2100_v42  ;;  %v1933_v22 = vadd.f32 %v1932_v51, %v1328_v1  ;;  %v361_v33 = vpop.permute.xlu1 %360 }
 0x1aa   :  { %v2170_v59 = vadd.f32 %v5905_v17, %v2102_v56  ;;  %v554_v50 = vmul.f32 %v5844_v37, %v361_v33 }
 0x1ab   :  { %v2232_v55 = vmax.f32 %v2168_v7, 0.0  ;;  %v2101_v49 = vmul.f32 %v5884_v0, %v1933_v22  ;;  %v6256_v10 = vpop.f32.mrb[64].mxu0 }
 0x1ac   :  { %4808 = vset.pattern.permute.xlu1 %v7183_v46  ;;  %v1942_v58 = vpop.f32.mrb[65].mxu0  ;;  %v2234_v61 = vmax.f32 %v2170_v59, 0.0 }
 0x1ad   :  { %1155 = vperm.xlu1 %4808, %v4993_v4   ;;  %v2281_v38 = vpack.c.bf16 %v2232_v55, %v2231_v41  ;;  %v2169_v47 = vadd.f32 %v5905_v17, %v2101_v49  ;;  %v1943_v19 = vpop.f32.mrb[66].mxu0  ;;  %v944_v55 = vadd.f32 %v880_v35, %v556_v3 }
 0x1ae   :  { %v716_v52 = vpop.permute.xlu1 %715  ;;  %v1945_v44 = vpop.f32.mrb[67].mxu0 }
 0x1af   :  { %4562 = vmatprep.mubr.bf16.mxu1 %v2281_v38  ;;  %v2233_v43 = vmax.f32 %v2169_v47, 0.0  ;;  %v878_v51 = vmul.f32 %v5838_v5, %v716_v52  ;;  %v381_v44 = vpop.permute.xlu0 %380 }
 0x1b1   :  { %1159 = vperm.xlu1 %4808, %v4994_v27   ;;  %v2282_v26 = vpack.c.bf16 %v2234_v61, %v2233_v43  ;;  %v942_v18 = vadd.f32 %v878_v51, %v554_v50  ;;  %v4996_v51 = vld [vmem:[%s7148_s0 + $0x190] sm:$0xff] }
 0x1b2   :  { %v720_v13 = vpop.permute.xlu1 %719 }
 0x1b3   :  { %v879_v12 = vmul.f32 %v5838_v5, %v720_v13  ;;  %4563 = vmatmul.mubr.bf16.gmra.mrb[28].mxu1 %v2282_v26  ;;  %v1948_v60 = vpop.f32.mrb[68].mxu0 }
 0x1b4   :  { %v1950_v62 = vpop.f32.mrb[69].mxu0 }
 0x1b5   :  { %v943_v9 = vadd.f32 %v879_v12, %v555_v45  ;;  %4809 = vset.pattern.permute.xlu1 %v7187_v15  ;;  %v1951_v24 = vpop.f32.mrb[70].mxu0  ;;  %v6319_v12 = vpop.permute.xlu0 %405 }
 0x1b6   :  { %440 = vperm.xlu1 %4809, %v6279_v40   ;;  %v1953_v6 = vpop.f32.mrb[71].mxu0 }
 0x1b7   :  { %v376_v39 = vpop.permute.xlu1 %375  ;;  %v1331_v11 = vadd.f32 %v1267_v32, %v943_v9 }
 0x1b8   :  { %v557_v38 = vmul.f32 %v5844_v37, %v376_v39 }
 0x1b9   :  { %v1944_v30 = vadd.f32 %v1943_v19, %v1331_v11 }
 0x1ba   :  { %4810 = vset.pattern.permute.xlu1 %v7180_v57 }
 0x1bb   :  { %779 = vperm.xlu1 %4810, %v6279_v40   ;;  %v6285_v23 = vpop.f32.mrb[72].mxu0  ;;  %v2104_v56 = vmul.f32 %v5884_v0, %v1944_v30 }
 0x1bc   :  { %v728_v8 = vpop.permute.xlu1 %727  ;;  %v1958_v14 = vpop.f32.mrb[73].mxu0 }
 0x1bd   :  { %v6287_v34 = vpop.f32.mrb[74].mxu0  ;;  %v881_v49 = vmul.f32 %v5838_v5, %v728_v8  ;;  %v2172_v47 = vadd.f32 %v5905_v17, %v2104_v56 }
 0x1be   :  { %v1961_v53 = vpop.f32.mrb[75].mxu0 }
 0x1bf   :  { %783 = vperm.xlu1 %4810, %v4995_v2   ;;  %v945_v43 = vadd.f32 %v881_v49, %v557_v38  ;;  %v2236_v26 = vmax.f32 %v2172_v47, 0.0  ;;  %v558_v53 = vmul.f32 %v5844_v37, %v381_v44  ;;  %v7235_v2 = vld [vmem:[#allocation29_spill] sm:$0xff] }
 0x1c0   :  { %v1270_v50 = vmul.f32 %v5849_v16, %v7235_v2 }
 0x1c1   :  { %v1104_v63 = vpop.permute.xlu1 %1103 }
 0x1c2   :  { %v1266_v42 = vmul.f32 %v5849_v16, %v1104_v63 }
 0x1c3   :  { %4811 = vset.pattern.permute.xlu1 %v7187_v15  ;;  %v6302_v1 = vpop.f32.mrb[76].mxu0 }
 0x1c4   :  { %v1330_v7 = vadd.f32 %v1266_v42, %v942_v18  ;;  %455 = vperm.xlu1 %4811, %v153_v29   ;;  %v1966_v22 = vpop.f32.mrb[77].mxu0 }
 0x1c5   :  { %v1112_v33 = vpop.permute.xlu1 %1111  ;;  %v6305_v41 = vpop.f32.mrb[78].mxu0 }
 0x1c6   :  { %v1941_v59 = vadd.f32 %v6256_v10, %v1330_v7  ;;  %v1268_v58 = vmul.f32 %v5849_v16, %v1112_v33  ;;  %v1969_v4 = vpop.f32.mrb[79].mxu0 }
 0x1c8   :  { %v2103_v19 = vmul.f32 %v5884_v0, %v1941_v59  ;;  %4812 = vset.pattern.permute.xlu1 %v7180_v57  ;;  %v1332_v52 = vadd.f32 %v1268_v58, %v944_v55  ;;  %v4997_v59 = vld [vmem:[%s7148_s0 + $0x1a8] sm:$0xff] }
 0x1c9   :  { %791 = vperm.xlu1 %4812, %v153_v29   ;;  %v1116_v61 = vpop.permute.xlu1 %1115 }
 0x1ca   :  { %v1269_v21 = vmul.f32 %v5849_v16, %v1116_v61  ;;  %v1949_v45 = vadd.f32 %v1948_v60, %v1332_v52  ;;  %v2171_v10 = vadd.f32 %v5905_v17, %v2103_v19 }
 0x1cb   :  { %v6316_v27 = vpop.f32.mrb[80].mxu0 }
 0x1cc   :  { %v2105_v13 = vmul.f32 %v5884_v0, %v1949_v45  ;;  %v1333_v20 = vadd.f32 %v1269_v21, %v945_v43  ;;  %v2235_v32 = vmax.f32 %v2171_v10, 0.0  ;;  %v1974_v62 = vpop.f32.mrb[81].mxu0  ;;  %v7236_v45 = vld [vmem:[#allocation31_spill] sm:$0xff] }
 0x1cd   :  { %4813 = vset.pattern.permute.xlu1 %v7183_v46  ;;  %v6322_v9 = vpop.f32.mrb[82].mxu0  ;;  %v1273_v10 = vmul.f32 %v5849_v16, %v7236_v45 }
 0x1ce   :  { %v1952_v6 = vadd.f32 %v1951_v24, %v1333_v20  ;;  %1167 = vperm.xlu1 %4813, %v6279_v40   ;;  %v386_v60 = vpop.permute.xlu1 %385  ;;  %v2283_v39 = vpack.c.bf16 %v2236_v26, %v2235_v32  ;;  %v1977_v11 = vpop.f32.mrb[83].mxu0  ;;  %v2173_v30 = vadd.f32 %v5905_v17, %v2105_v13  ;;  %v7237_v32 = vld [vmem:[#allocation18_spill] sm:$0xff] }
 0x1cf   :  { %v6332_v24 = vpop.permute.xlu0 %410  ;;  %v559_v43 = vmul.f32 %v5844_v37, %v386_v60  ;;  %v883_v62 = vmul.f32 %v5838_v5, %v7237_v32 }
 0x1d0   :  { %v2106_v8 = vmul.f32 %v5884_v0, %v1952_v6  ;;  %4566 = vmatprep.mubr.bf16.mxu1 %v2283_v39  ;;  %v2237_v63 = vmax.f32 %v2173_v30, 0.0  ;;  %v4999_v6 = vld [vmem:[%s7148_s0 + $0x1b0] sm:$0xff] }
 0x1d2   :  { %v2174_v14 = vadd.f32 %v5905_v17, %v2106_v8  ;;  %1175 = vperm.xlu1 %4813, %v4996_v51   ;;  %v947_v8 = vadd.f32 %v883_v62, %v559_v43 }
 0x1d3   :  { %v732_v40 = vpop.permute.xlu1 %731  ;;  %v6334_v31 = vpop.f32.mrb[84].mxu0 }
 0x1d4   :  { %v2238_v48 = vmax.f32 %v2174_v14, 0.0  ;;  %v882_v35 = vmul.f32 %v5838_v5, %v732_v40  ;;  %v1982_v3 = vpop.f32.mrb[85].mxu0  ;;  %v6341_v55 = vpop.permute.xlu0 %420  ;;  %v7238_v40 = vld [vmem:[#allocation19_spill] sm:$0xff] }
 0x1d5   :  { %v6339_v18 = vpop.f32.mrb[86].mxu0  ;;  %v884_v2 = vmul.f32 %v5838_v5, %v7238_v40 }
 0x1d6   :  { %v946_v42 = vadd.f32 %v882_v35, %v558_v53  ;;  %1179 = vperm.xlu1 %4813, %v153_v29   ;;  %v2284_v56 = vpack.c.bf16 %v2238_v48, %v2237_v63  ;;  %v1985_v7 = vpop.f32.mrb[87].mxu0  ;;  %v5000_v48 = vld [vmem:[%s7148_s0 + $0x1b8] sm:$0xff] }
 0x1d8   :  { %v391_v22 = vpop.permute.xlu1 %390  ;;  %4567 = vmatmul.mubr.bf16.gmra.mrb[32].mxu1 %v2284_v56  ;;  %v1334_v33 = vadd.f32 %v1270_v50, %v946_v42  ;;  %v6352_v47 = vpop.permute.xlu0 %445 }
 0x1d9   :  { %v560_v14 = vmul.f32 %v5844_v37, %v391_v22 }
 0x1da   :  { %v1957_v49 = vadd.f32 %v6285_v23, %v1334_v33  ;;  %4814 = vset.pattern.permute.xlu1 %v7187_v15  ;;  %v4998_v23 = vld [vmem:[%s7148_s0 + $0x1a0] sm:$0xff] }
 0x1db   :  { %465 = vperm.xlu1 %4814, %v4997_v59   ;;  %v6348_v58 = vpop.f32.mrb[88].mxu0  ;;  %v948_v42 = vadd.f32 %v884_v2, %v560_v14 }
 0x1dc   :  { %v396_v4 = vpop.permute.xlu1 %395  ;;  %v1990_v29 = vpop.f32.mrb[89].mxu0  ;;  %v2107_v50 = vmul.f32 %v5884_v0, %v1957_v49 }
 0x1dd   :  { %v6350_v38 = vpop.f32.mrb[90].mxu0  ;;  %v561_v44 = vmul.f32 %v5844_v37, %v396_v4  ;;  %v6366_v13 = vpop.permute.xlu0 %450 }
 0x1de   :  { %v1993_v19 = vpop.f32.mrb[91].mxu0  ;;  %v2175_v33 = vadd.f32 %v5905_v17, %v2107_v50  ;;  %v6416_v50 = vld [vmem:[%s7148_s0 + $0x1c0] sm:$0xff] }
 0x1df   :  { %4815 = vset.pattern.permute.xlu1 %v7180_v57 }
 0x1e0   :  { %795 = vperm.xlu1 %4815, %v4998_v23   ;;  %v2239_v43 = vmax.f32 %v2175_v33, 0.0 }
 0x1e1   :  { %v744_v52 = vpop.permute.xlu1 %743  ;;  %v6384_v3 = vpop.permute.xlu0 %460 }
 0x1e2   :  { %v885_v61 = vmul.f32 %v5838_v5, %v744_v52 }
 0x1e3   :  { %v6361_v21 = vpop.f32.mrb[92].mxu0 }
 0x1e4   :  { %v949_v26 = vadd.f32 %v885_v61, %v561_v44  ;;  %4816 = vset.pattern.permute.xlu1 %v7187_v15  ;;  %v1998_v20 = vpop.f32.mrb[93].mxu0 }
 0x1e5   :  { %470 = vperm.xlu1 %4816, %v4999_v6   ;;  %v6373_v60 = vpop.f32.mrb[94].mxu0  ;;  %v6398_v61 = vpop.permute.xlu0 %485 }
 0x1e6   :  { %v1124_v39 = vpop.permute.xlu1 %1123  ;;  %v1337_v11 = vadd.f32 %v1273_v10, %v949_v26  ;;  %v2001_v30 = vpop.f32.mrb[95].mxu0 }
 0x1e7   :  { %v1271_v51 = vmul.f32 %v5849_v16, %v1124_v39 }
 0x1e8   :  { %v1968_v53 = vadd.f32 %v6305_v41, %v1337_v11 }
 0x1e9   :  { %v1335_v63 = vadd.f32 %v1271_v51, %v947_v8  ;;  %475 = vperm.xlu1 %4816, %v5000_v48   ;;  %v6408_v14 = vpop.permute.xlu0 %490 }
 0x1ea   :  { %v1128_v35 = vpop.permute.xlu1 %1127  ;;  %v2110_v4 = vmul.f32 %v5884_v0, %v1968_v53  ;;  %v563_v53 = vmul.f32 %v5844_v37, %v6319_v12 }
 0x1eb   :  { %v1960_v56 = vadd.f32 %v6287_v34, %v1335_v63  ;;  %v1272_v7 = vmul.f32 %v5849_v16, %v1128_v35  ;;  %v6388_v41 = vpop.f32.mrb[96].mxu0  ;;  %v7239_v63 = vld [vmem:[#allocation34_spill] sm:$0xff] }
 0x1ec   :  { %v2006_v22 = vpop.f32.mrb[97].mxu0  ;;  %v2178_v45 = vadd.f32 %v5905_v17, %v2110_v4 }
 0x1ed   :  { %v2108_v49 = vmul.f32 %v5884_v0, %v1960_v56  ;;  %v1336_v29 = vadd.f32 %v1272_v7, %v948_v42  ;;  %4817 = vset.pattern.permute.xlu1 %v7180_v57  ;;  %v6394_v19 = vpop.f32.mrb[98].mxu0  ;;  %v6424_v12 = vpop.permute.xlu0 %500 }
 0x1ee   :  { %807 = vperm.xlu1 %4817, %v5000_v48   ;;  %v2009_v23 = vpop.f32.mrb[99].mxu0  ;;  %v2242_v11 = vmax.f32 %v2178_v45, 0.0  ;;  %v1275_v48 = vmul.f32 %v5849_v16, %v7239_v63 }
 0x1ef   :  { %v1965_v34 = vadd.f32 %v6302_v1, %v1336_v29  ;;  %v401_v52 = vpop.permute.xlu1 %400  ;;  %v2176_v44 = vadd.f32 %v5905_v17, %v2108_v49 }
 0x1f1   :  { %v2109_v10 = vmul.f32 %v5884_v0, %v1965_v34  ;;  %v2240_v26 = vmax.f32 %v2176_v44, 0.0  ;;  %v756_v29 = vpop.permute.xlu0 %755 }
 0x1f2   :  { %4818 = vset.pattern.permute.xlu1 %v7183_v46 }
 0x1f3   :  { %1187 = vperm.xlu1 %4818, %v4997_v59   ;;  %v2285_v20 = vpack.c.bf16 %v2240_v26, %v2239_v43  ;;  %v2177_v32 = vadd.f32 %v5905_v17, %v2109_v10  ;;  %v6404_v62 = vpop.f32.mrb[100].mxu0  ;;  %v5001_v43 = vld [vmem:[%s7148_s0 + $0x1c8] sm:$0xff]  ;;  %v562_v10 = vmul.f32 %v5844_v37, %v401_v52  ;;  %v888_v26 = vmul.f32 %v5838_v5, %v756_v29 }
 0x1f4   :  { %v748_v1 = vpop.permute.xlu1 %747  ;;  %v2014_v39 = vpop.f32.mrb[101].mxu0 }
 0x1f5   :  { %4570 = vmatprep.mubr.bf16.mxu1 %v2285_v20  ;;  %v2241_v30 = vmax.f32 %v2177_v32, 0.0  ;;  %v6406_v8 = vpop.f32.mrb[102].mxu0  ;;  %v886_v34 = vmul.f32 %v5838_v5, %v748_v1  ;;  %v6446_v1 = vld [vmem:[%s7148_s0 + $0x1d8] sm:$0xff] }
 0x1f6   :  { %v2017_v51 = vpop.f32.mrb[103].mxu0 }
 0x1f7   :  { %1191 = vperm.xlu1 %4818, %v4999_v6   ;;  %v2286_v59 = vpack.c.bf16 %v2242_v11, %v2241_v30  ;;  %v950_v39 = vadd.f32 %v886_v34, %v562_v10 }
 0x1f8   :  { %v752_v40 = vpop.permute.xlu1 %751 }
 0x1f9   :  { %v887_v2 = vmul.f32 %v5838_v5, %v752_v40  ;;  %4571 = vmatmul.mubr.bf16.gmra.mrb[36].mxu1 %v2286_v59 }
 0x1fb   :  { %v951_v35 = vadd.f32 %v887_v2, %v563_v53  ;;  %4819 = vset.pattern.permute.xlu1 %v7187_v15  ;;  %v6421_v42 = vpop.f32.mrb[104].mxu0 }
 0x1fc   :  { %480 = vperm.xlu1 %4819, %v6416_v50   ;;  %v2022_v6 = vpop.f32.mrb[105].mxu0 }
 0x1fd   :  { %v416_v56 = vpop.permute.xlu1 %415  ;;  %v1339_v7 = vadd.f32 %v1275_v48, %v951_v35  ;;  %v6426_v22 = vpop.f32.mrb[106].mxu0 }
 0x1fe   :  { %v2025_v33 = vpop.f32.mrb[107].mxu0  ;;  %v565_v48 = vmul.f32 %v5844_v37, %v416_v56 }
 0x1ff   :  { %v1976_v49 = vadd.f32 %v6322_v9, %v1339_v7  ;;  %v564_v9 = vmul.f32 %v5844_v37, %v6332_v24 }
 0x200   :  { %4820 = vset.pattern.permute.xlu1 %v7180_v57 }
 0x201   :  { %811 = vperm.xlu1 %4820, %v6416_v50   ;;  %v2112_v30 = vmul.f32 %v5884_v0, %v1976_v49  ;;  %v952_v24 = vadd.f32 %v888_v26, %v564_v9 }
 0x202   :  { %v760_v4 = vpop.permute.xlu1 %759 }
 0x203   :  { %v6431_v23 = vpop.f32.mrb[108].mxu0  ;;  %v889_v53 = vmul.f32 %v5838_v5, %v760_v4  ;;  %v2180_v35 = vadd.f32 %v5905_v17, %v2112_v30 }
 0x204   :  { %v2030_v44 = vpop.f32.mrb[109].mxu0 }
 0x205   :  { %815 = vperm.xlu1 %4820, %v5001_v43   ;;  %v6437_v45 = vpop.f32.mrb[110].mxu0  ;;  %v953_v4 = vadd.f32 %v889_v53, %v565_v48  ;;  %v2654_v44 = vsub.s32 5, %v5794_v25  ;;  %v2244_v43 = vmax.f32 %v2180_v35, 0.0  ;;  %v5003_v53 = vld [vmem:[%s7148_s0 + $0x1d0] sm:$0xff] }
 0x206   :  { %v2033_v20 = vpop.f32.mrb[111].mxu0 }
 0x207   :  { %v1136_v32 = vpop.permute.xlu1 %1135  ;;  %v2722_v20 = vsub.s32 6, %v5794_v25 }
 0x208   :  { %v1274_v11 = vmul.f32 %v5849_v16, %v1136_v32 }
 0x209   :  { %4821 = vset.pattern.permute.xlu1 %v7187_v15 }
 0x20a   :  { %v1338_v51 = vadd.f32 %v1274_v11, %v950_v39  ;;  %495 = vperm.xlu1 %4821, %v6446_v1   ;;  %v5002_v11 = vld [vmem:[%s7151_s3] sm:$0xff] }
 0x20b   :  { %v1144_v52 = vpop.permute.xlu1 %1143  ;;  %v6455_v2 = vpop.f32.mrb[112].mxu0  ;;  %v6480_v30 = vrot.slane %v5002_v11, %v2654_v44 }
 0x20c   :  { %v1973_v59 = vadd.f32 %v6316_v27, %v1338_v51  ;;  %v1276_v40 = vmul.f32 %v5849_v16, %v1144_v52  ;;  %v2038_v63 = vpop.f32.mrb[113].mxu0  ;;  %v6484_v52 = vrot.slane %v5002_v11, %v2722_v20 }
 0x20d   :  { %v6461_v33 = vpop.f32.mrb[114].mxu0 }
 0x20e   :  { %v2111_v6 = vmul.f32 %v5884_v0, %v1973_v59  ;;  %4822 = vset.pattern.permute.xlu1 %v7180_v57  ;;  %v1340_v7 = vadd.f32 %v1276_v40, %v952_v24  ;;  %v2041_v27 = vpop.f32.mrb[115].mxu0 }
 0x20f   :  { %823 = vperm.xlu1 %4822, %v6446_v1   ;;  %v1148_v49 = vpop.permute.xlu1 %1147 }
 0x210   :  { %v1277_v29 = vmul.f32 %v5849_v16, %v1148_v49  ;;  %v1981_v34 = vadd.f32 %v6334_v31, %v1340_v7  ;;  %v2179_v56 = vadd.f32 %v5905_v17, %v2111_v6 }
 0x212   :  { %v2113_v9 = vmul.f32 %v5884_v0, %v1981_v34  ;;  %v1341_v10 = vadd.f32 %v1277_v29, %v953_v4  ;;  %v2243_v26 = vmax.f32 %v2179_v56, 0.0 }
 0x213   :  { %4823 = vset.pattern.permute.xlu1 %v7183_v46 }
 0x214   :  { %v1984_v32 = vadd.f32 %v6339_v18, %v1341_v10  ;;  %1199 = vperm.xlu1 %4823, %v6416_v50   ;;  %v6473_v39 = vpop.permute.xlu1 %425  ;;  %v2287_v31 = vpack.c.bf16 %v2244_v43, %v2243_v26  ;;  %v2181_v51 = vadd.f32 %v5905_v17, %v2113_v9  ;;  %v566_v18 = vmul.f32 %v5844_v37, %v6341_v55  ;;  %v7240_v55 = vld [vmem:[#allocation35_spill] sm:$0xff] }
 0x215   :  { %v1278_v4 = vmul.f32 %v5849_v16, %v7240_v55  ;;  %v768_v55 = vpop.permute.xlu0 %767 }
 0x216   :  { %v2114_v24 = vmul.f32 %v5884_v0, %v1984_v32  ;;  %4574 = vmatprep.mubr.bf16.mxu1 %v2287_v31  ;;  %v2245_v35 = vmax.f32 %v2181_v51, 0.0 }
 0x217   :  { %v6503_v32 = vpop.f32.mrb[116].mxu0 }
 0x218   :  { %v2182_v50 = vadd.f32 %v5905_v17, %v2114_v24  ;;  %1207 = vperm.xlu1 %4823, %v5003_v53   ;;  %v4536_v59 = vpop.f32.mrb[0].mxu1  ;;  %v2046_v24 = vpop.f32.mrb[117].mxu0 }
 0x219   :  { %v2658_v40 = vmul.f32 %v4536_v59, %v6480_v30  ;;  %v764_v63 = vpop.permute.xlu1 %763  ;;  %v2397_v48 = vpop.f32.mrb[1].mxu1  ;;  %v891_v24 = vmul.f32 %v5838_v5, %v768_v55 }
 0x21a   :  { %v2246_v6 = vmax.f32 %v2182_v50, 0.0  ;;  %v890_v7 = vmul.f32 %v5838_v5, %v764_v63  ;;  %v2656_v49 = vmul.f32 %v6480_v30, %v2397_v48  ;;  %v4537_v27 = vpop.f32.mrb[2].mxu1  ;;  %v6511_v63 = vpop.f32.mrb[118].mxu0 }
 0x21b   :  { %v2726_v29 = vadd.f32 %v6484_v52, %v2658_v40  ;;  %v2659_v34 = vmul.f32 %v4537_v27, %v6480_v30  ;;  %v2400_v56 = vpop.f32.mrb[3].mxu1 }
 0x21c   :  { %v954_v43 = vadd.f32 %v890_v7, %v566_v18  ;;  %v2724_v9 = vadd.f32 %v6484_v52, %v2656_v49  ;;  %v2657_v10 = vmul.f32 %v6480_v30, %v2400_v56  ;;  %1211 = vperm.xlu1 %4823, %v6446_v1   ;;  %v2288_v26 = vpack.c.bf16 %v2246_v6, %v2245_v35  ;;  %v2049_v35 = vpop.f32.mrb[119].mxu0  ;;  %v5004_v56 = vld [vmem:[%s7148_s0 + $0x1e0] sm:$0xff] }
 0x21d   :  { %v2727_v20 = vadd.f32 %v6484_v52, %v2659_v34  ;;  %v2790_v50 = vmax.f32 %v2726_v29, 0.0 }
 0x21e   :  { %v2725_v31 = vadd.f32 %v6484_v52, %v2657_v10  ;;  %v431_v11 = vpop.permute.xlu1 %430  ;;  %4575 = vmatmul.mubr.bf16.gmra.mrb[40].mxu1 %v2288_v26  ;;  %v1342_v51 = vadd.f32 %v1278_v4, %v954_v43  ;;  %v2788_v18 = vmax.f32 %v2724_v9, 0.0 }
 0x21f   :  { %v2791_v53 = vmax.f32 %v2727_v20, 0.0 }
 0x220   :  { %v2789_v59 = vmax.f32 %v2725_v31, 0.0  ;;  %v1989_v40 = vadd.f32 %v6348_v58, %v1342_v51  ;;  %4826 = vset.pattern.permute.xlu1 %v7187_v15 }
 0x221   :  { %v6508_v1 = vpack.c.bf16 %v2791_v53, %v2790_v50  ;;  %505 = vperm.xlu1 %4826, %v6198_v36   ;;  %v567_v50 = vmul.f32 %v5844_v37, %v6473_v39  ;;  %v772_v53 = vpop.permute.xlu0 %771 }
 0x222   :  { %v436_v48 = vpop.permute.xlu1 %435  ;;  %v6513_v6 = vpack.c.bf16 %v2789_v59, %v2788_v18  ;;  %v7241_v59 = vld [vmem:[#allocation36_spill] sm:$0xff]  ;;  %v892_v55 = vmul.f32 %v5838_v5, %v772_v53 }
 0x223   :  { %v4540_v7 = vpop.f32.mrb[4].mxu1  ;;  %v569_v20 = vmul.f32 %v5844_v37, %v436_v48  ;;  %v1281_v35 = vmul.f32 %v5849_v16, %v7241_v59 }
 0x224   :  { %v2662_v49 = vmul.f32 %v4540_v7, %v6480_v30  ;;  %v2413_v27 = vpop.f32.mrb[5].mxu1 }
 0x225   :  { %v2660_v4 = vmul.f32 %v6480_v30, %v2413_v27  ;;  %4827 = vset.pattern.permute.xlu1 %v7180_v57  ;;  %v4541_v58 = vpop.f32.mrb[6].mxu1 }
 0x226   :  { %v2730_v29 = vadd.f32 %v6484_v52, %v2662_v49  ;;  %v2663_v34 = vmul.f32 %v4541_v58, %v6480_v30  ;;  %827 = vperm.xlu1 %4827, %v5004_v56   ;;  %v2416_v43 = vpop.f32.mrb[7].mxu1  ;;  %v955_v56 = vadd.f32 %v891_v24, %v567_v50 }
 0x227   :  { %v2728_v9 = vadd.f32 %v6484_v52, %v2660_v4  ;;  %v2661_v10 = vmul.f32 %v6480_v30, %v2416_v43  ;;  %v776_v26 = vpop.permute.xlu1 %775  ;;  %v568_v43 = vmul.f32 %v5844_v37, %v431_v11 }
 0x228   :  { %v2731_v31 = vadd.f32 %v6484_v52, %v2663_v34  ;;  %v893_v51 = vmul.f32 %v5838_v5, %v776_v26  ;;  %v2794_v7 = vmax.f32 %v2730_v29, 0.0  ;;  %v6541_v29 = vpop.f32.mrb[120].mxu0 }
 0x229   :  { %v2729_v18 = vadd.f32 %v6484_v52, %v2661_v10  ;;  %v2792_v48 = vmax.f32 %v2728_v9, 0.0  ;;  %v956_v53 = vadd.f32 %v892_v55, %v568_v43 }
 0x22a   :  { %v2795_v49 = vmax.f32 %v2731_v31, 0.0  ;;  %v957_v27 = vadd.f32 %v893_v51, %v569_v20  ;;  %4828 = vset.pattern.permute.xlu1 %v7187_v15  ;;  %v2115_v15 = vmul.f32 %v5884_v0, %v1989_v40  ;;  %v2054_v20 = vpop.f32.mrb[121].mxu0  ;;  %v4952_v40 = vld [vmem:[#allocation2 + $0xc0] sm:$0xff]  }
 0x22b   :  { %v2793_v4 = vmax.f32 %v2729_v18, 0.0  ;;  %510 = vperm.xlu1 %4828, %v6214_v54   ;;  %4598 = vmatprep.subr.bf16.mxu1 %v4952_v40  ;;  %v6567_v20 = vpop.f32.mrb[122].mxu0 }
 0x22c   :  { %v1156_v58 = vpop.permute.xlu1 %1155  ;;  %v1345_v34 = vadd.f32 %v1281_v35, %v957_v27  ;;  %v6537_v39 = vpack.c.bf16 %v2795_v49, %v2794_v7  ;;  %v2183_v50 = vadd.f32 %v5905_v17, %v2115_v15  ;;  %4599 = vmatpush3.bf16.msra.mxu1 %v4952_v40 }
 0x22d   :  { %v1279_v10 = vmul.f32 %v5849_v16, %v1156_v58  ;;  %v6543_v26 = vpack.c.bf16 %v2793_v4, %v2792_v48 }
 0x22e   :  { %v2000_v9 = vadd.f32 %v6373_v60, %v1345_v34  ;;  %v2247_v58 = vmax.f32 %v2183_v50, 0.0 }
 0x22f   :  { %v1343_v31 = vadd.f32 %v1279_v10, %v955_v56  ;;  %515 = vperm.xlu1 %4828, %v6266_v28  }
 0x230   :  { %v1160_v51 = vpop.permute.xlu1 %1159  ;;  %v2118_v18 = vmul.f32 %v5884_v0, %v2000_v9 }
 0x231   :  { %v1992_v24 = vadd.f32 %v6350_v38, %v1343_v31  ;;  %v1280_v11 = vmul.f32 %v5849_v16, %v1160_v51  ;;  %v2057_v51 = vpop.f32.mrb[123].mxu0 }
 0x232   :  { %v6574_v50 = vpop.f32.mrb[124].mxu0 }
 0x233   :  { %v2116_v59 = vmul.f32 %v5884_v0, %v1992_v24  ;;  %v1344_v35 = vadd.f32 %v1280_v11, %v956_v53  ;;  %4829 = vset.pattern.permute.xlu1 %v7180_v57  ;;  %v4544_v60 = vpop.f32.mrb[8].mxu1  ;;  %v2186_v57 = vadd.f32 %v5905_v17, %v2118_v18 }
 0x234   :  { %v2666_v7 = vmul.f32 %v4544_v60, %v6480_v30  ;;  %839 = vperm.xlu1 %4829, %v6266_v28   ;;  %v2429_v49 = vpop.f32.mrb[9].mxu1  ;;  %v4953_v28 = vld [vmem:[#allocation2 + $0xc8] sm:$0xff]   ;;  %v2062_v60 = vpop.f32.mrb[125].mxu0 }
 0x235   :  { %v1997_v38 = vadd.f32 %v6361_v21, %v1344_v35  ;;  %v2664_v27 = vmul.f32 %v6480_v30, %v2429_v49  ;;  %v6558_v48 = vpop.permute.xlu1 %440  ;;  %v4545_v4 = vpop.f32.mrb[10].mxu1  ;;  %v2184_v55 = vadd.f32 %v5905_v17, %v2116_v59  ;;  %4600 = vmatprep.subr.bf16.mxu1 %v4953_v28  ;;  %v2250_v40 = vmax.f32 %v2186_v57, 0.0 }
 0x236   :  { %v2734_v34 = vadd.f32 %v6484_v52, %v2666_v7  ;;  %v2667_v56 = vmul.f32 %v4545_v4, %v6480_v30  ;;  %v2432_v43 = vpop.f32.mrb[11].mxu1  ;;  %4601 = vmatpush3.bf16.msra.mxu1 %v4953_v28  ;;  %v571_v57 = vmul.f32 %v5844_v37, %v6352_v47  ;;  %v7242_v28 = vld [vmem:[#allocation39_spill] sm:$0xff] }
 0x237   :  { %v2117_v21 = vmul.f32 %v5884_v0, %v1997_v38  ;;  %v2732_v10 = vadd.f32 %v6484_v52, %v2664_v27  ;;  %v2665_v15 = vmul.f32 %v6480_v30, %v2432_v43  ;;  %v2248_v9 = vmax.f32 %v2184_v55, 0.0  ;;  %v6576_v38 = vpop.f32.mrb[126].mxu0  ;;  %v4954_v27 = vld [vmem:[#allocation2 + $0xd0] sm:$0xff]   ;;  %v4955_v43 = vld [vmem:[#allocation2 + $0xd8] sm:$0xff]  }
 0x238   :  { %v2735_v31 = vadd.f32 %v6484_v52, %v2667_v56  ;;  %4831 = vset.pattern.permute.xlu1 %v7183_v46  ;;  %v2798_v18 = vmax.f32 %v2734_v34, 0.0  ;;  %v2065_v4 = vpop.f32.mrb[127].mxu0  ;;  %4602 = vmatprep.subr.bf16.mxu1 %v4954_v27 }
 0x239   :  { %v2733_v53 = vadd.f32 %v6484_v52, %v2665_v15  ;;  %1219 = vperm.xlu1 %4831, %v6198_v36   ;;  %v2289_v24 = vpack.c.bf16 %v2248_v9, %v2247_v58  ;;  %v2185_v11 = vadd.f32 %v5905_v17, %v2117_v21  ;;  %v2796_v7 = vmax.f32 %v2732_v10, 0.0 }
 0x23a   :  { %v2799_v59 = vmax.f32 %v2735_v31, 0.0  ;;  %v780_v35 = vpop.permute.xlu1 %779  ;;  %4603 = vmatpush3.bf16.msra.mxu1 %v4954_v27  ;;  %v1283_v21 = vmul.f32 %v5849_v16, %v7242_v28  ;;  %v4956_v31 = vld [vmem:[#allocation2 + $0xe0] sm:$0xff]   ;;  %v570_v28 = vmul.f32 %v5844_v37, %v6558_v48 }
 0x23b   :  { %v2797_v49 = vmax.f32 %v2733_v53, 0.0  ;;  %4578 = vmatprep.mubr.bf16.mxu1 %v2289_v24  ;;  %v2249_v46 = vmax.f32 %v2185_v11, 0.0  ;;  %4604 = vmatprep.subr.bf16.mxu1 %v4955_v43  ;;  %v894_v4 = vmul.f32 %v5838_v5, %v780_v35 }
 0x23c   :  { %v6578_v36 = vpack.c.bf16 %v2799_v59, %v2798_v18 }
 0x23d   :  { %1223 = vperm.xlu1 %4831, %v6214_v54   ;;  %v2290_v55 = vpack.c.bf16 %v2250_v40, %v2249_v46  ;;  %v6581_v58 = vpack.c.bf16 %v2797_v49, %v2796_v7  ;;  %v4957_v49 = vld [vmem:[#allocation2 + $0xe8] sm:$0xff]  }
 0x23e   :  { %v784_v34 = vpop.permute.xlu1 %783  ;;  %4605 = vmatpush3.bf16.msra.mxu1 %v4955_v43  ;;  %v4958_v43 = vld [vmem:[#allocation2 + $0xf0] sm:$0xff]  }
 0x23f   :  { %v895_v56 = vmul.f32 %v5838_v5, %v784_v34  ;;  %4579 = vmatmul.mubr.bf16.gmra.mrb[44].mxu1 %v2290_v55  ;;  %4606 = vmatprep.subr.bf16.mxu1 %v4956_v31 }
 0x241   :  { %v959_v10 = vadd.f32 %v895_v56, %v571_v57 }
 0x242   :  { %4607 = vmatpush3.bf16.msra.mxu1 %v4956_v31  ;;  %v572_v31 = vmul.f32 %v5844_v37, %v6366_v13 }
 0x243   :  { %v456_v54 = vpop.permute.xlu1 %455  ;;  %v4548_v15 = vpop.f32.mrb[12].mxu1  ;;  %v1347_v9 = vadd.f32 %v1283_v21, %v959_v10  ;;  %4608 = vmatprep.subr.bf16.mxu1 %v4957_v49 }
 0x244   :  { %v2670_v51 = vmul.f32 %v4548_v15, %v6480_v30  ;;  %v2445_v53 = vpop.f32.mrb[13].mxu1  ;;  %v788_v10 = vpop.permute.xlu0 %787  ;;  %v573_v13 = vmul.f32 %v5844_v37, %v456_v54 }
 0x245   :  { %v2008_v24 = vadd.f32 %v6394_v19, %v1347_v9  ;;  %v2668_v47 = vmul.f32 %v6480_v30, %v2445_v53  ;;  %v4549_v11 = vpop.f32.mrb[14].mxu1  ;;  %v896_v35 = vmul.f32 %v5838_v5, %v788_v10 }
 0x246   :  { %v2738_v18 = vadd.f32 %v6484_v52, %v2670_v51  ;;  %v2671_v59 = vmul.f32 %v4549_v11, %v6480_v30  ;;  %v2448_v60 = vpop.f32.mrb[15].mxu1  ;;  %4609 = vmatpush3.bf16.msra.mxu1 %v4957_v49  ;;  %v958_v51 = vadd.f32 %v894_v4, %v570_v28 }
 0x247   :  { %v2736_v40 = vadd.f32 %v6484_v52, %v2668_v47  ;;  %v2669_v7 = vmul.f32 %v6480_v30, %v2448_v60  ;;  %4610 = vmatprep.subr.bf16.mxu1 %v4958_v43  ;;  %v4959_v47 = vld [vmem:[#allocation2 + $0xf8] sm:$0xff]   ;;  %v2120_v48 = vmul.f32 %v5884_v0, %v2008_v24  ;;  %v960_v60 = vadd.f32 %v896_v35, %v572_v31 }
 0x248   :  { %v2739_v46 = vadd.f32 %v6484_v52, %v2671_v59  ;;  %v792_v27 = vpop.permute.xlu1 %791  ;;  %v2802_v55 = vmax.f32 %v2738_v18, 0.0 }
 0x249   :  { %v2737_v19 = vadd.f32 %v6484_v52, %v2669_v7  ;;  %v2800_v57 = vmax.f32 %v2736_v40, 0.0  ;;  %v897_v18 = vmul.f32 %v5838_v5, %v792_v27  ;;  %v2188_v24 = vadd.f32 %v5905_v17, %v2120_v48 }
 0x24a   :  { %v2803_v34 = vmax.f32 %v2739_v46, 0.0  ;;  %4611 = vmatpush3.bf16.msra.mxu1 %v4958_v43 }
 0x24b   :  { %v2801_v56 = vmax.f32 %v2737_v19, 0.0  ;;  %4612 = vmatprep.subr.bf16.mxu1 %v4959_v47  ;;  %v961_v27 = vadd.f32 %v897_v18, %v573_v13 }
 0x24c   :  { %v6600_v21 = vpack.c.bf16 %v2803_v34, %v2802_v55 }
 0x24d   :  { %v1168_v15 = vpop.permute.xlu1 %1167  ;;  %v6602_v9 = vpack.c.bf16 %v2801_v56, %v2800_v57 }
 0x24e   :  { %v1282_v53 = vmul.f32 %v5849_v16, %v1168_v15  ;;  %4613 = vmatpush3.bf16.msra.mxu1 %v4959_v47 }
 0x250   :  { %v1346_v11 = vadd.f32 %v1282_v53, %v958_v51 }
 0x251   :  { %v1176_v59 = vpop.permute.xlu1 %1175 }
 0x252   :  { %v2005_v40 = vadd.f32 %v6388_v41, %v1346_v11  ;;  %v1284_v7 = vmul.f32 %v5849_v16, %v1176_v59  ;;  %v2252_v11 = vmax.f32 %v2188_v24, 0.0 }
 0x253   :  { %v4552_v49 = vpop.f32.mrb[16].mxu1 }
 0x254   :  { %v2119_v46 = vmul.f32 %v5884_v0, %v2005_v40  ;;  %v2674_v19 = vmul.f32 %v4552_v49, %v6480_v30  ;;  %v2461_v4 = vpop.f32.mrb[17].mxu1  ;;  %v1348_v55 = vadd.f32 %v1284_v7, %v960_v60 }
 0x255   :  { %v2672_v34 = vmul.f32 %v6480_v30, %v2461_v4  ;;  %v1180_v57 = vpop.permute.xlu1 %1179  ;;  %v4553_v56 = vpop.f32.mrb[18].mxu1 }
 0x256   :  { %v2742_v41 = vadd.f32 %v6484_v52, %v2674_v19  ;;  %v1285_v43 = vmul.f32 %v5849_v16, %v1180_v57  ;;  %v2013_v54 = vadd.f32 %v6404_v62, %v1348_v55  ;;  %v2675_v28 = vmul.f32 %v4553_v56, %v6480_v30  ;;  %v2464_v10 = vpop.f32.mrb[19].mxu1 }
 0x257   :  { %v2740_v15 = vadd.f32 %v6484_v52, %v2672_v34  ;;  %v2673_v31 = vmul.f32 %v6480_v30, %v2464_v10  ;;  %v2187_v35 = vadd.f32 %v5905_v17, %v2119_v46  ;;  %v574_v34 = vmul.f32 %v5844_v37, %v6384_v3 }
 0x258   :  { %v2121_v51 = vmul.f32 %v5884_v0, %v2013_v54  ;;  %v2743_v53 = vadd.f32 %v6484_v52, %v2675_v28  ;;  %v1349_v47 = vadd.f32 %v1285_v43, %v961_v27  ;;  %v2806_v59 = vmax.f32 %v2742_v41, 0.0  ;;  %v7243_v41 = vld [vmem:[#allocation41_spill] sm:$0xff] }
 0x259   :  { %v2741_v48 = vadd.f32 %v6484_v52, %v2673_v31  ;;  %v2251_v18 = vmax.f32 %v2187_v35, 0.0  ;;  %v2804_v7 = vmax.f32 %v2740_v15, 0.0  ;;  %v1286_v43 = vmul.f32 %v5849_v16, %v7243_v41 }
 0x25a   :  { %v2807_v62 = vmax.f32 %v2743_v53, 0.0  ;;  %v2016_v60 = vadd.f32 %v6406_v8, %v1349_v47  ;;  %v466_v40 = vpop.permute.xlu1 %465  ;;  %v2189_v19 = vadd.f32 %v5905_v17, %v2121_v51 }
 0x25b   :  { %v2805_v13 = vmax.f32 %v2741_v48, 0.0  ;;  %v2291_v49 = vpack.c.bf16 %v2252_v11, %v2251_v18 }
 0x25c   :  { %v2122_v46 = vmul.f32 %v5884_v0, %v2016_v60  ;;  %v6630_v4 = vpack.c.bf16 %v2807_v62, %v2806_v59  ;;  %v2253_v8 = vmax.f32 %v2189_v19, 0.0 }
 0x25d   :  { %4582 = vmatprep.mubr.bf16.mxu1 %v2291_v49  ;;  %v6632_v55 = vpack.c.bf16 %v2805_v13, %v2804_v7 }
 0x25e   :  { %v2190_v24 = vadd.f32 %v5905_v17, %v2122_v46  ;;  %v800_v46 = vpop.permute.xlu0 %799 }
 0x25f   :  { %v796_v27 = vpop.permute.xlu1 %795  ;;  %v899_v41 = vmul.f32 %v5838_v5, %v800_v46 }
 0x260   :  { %v2254_v57 = vmax.f32 %v2190_v24, 0.0  ;;  %v898_v56 = vmul.f32 %v5838_v5, %v796_v27 }
 0x262   :  { %v962_v54 = vadd.f32 %v898_v56, %v574_v34  ;;  %v2292_v28 = vpack.c.bf16 %v2254_v57, %v2253_v8 }
 0x263   :  { %v4556_v10 = vpop.f32.mrb[20].mxu1 }
 0x264   :  { %v2678_v15 = vmul.f32 %v4556_v10, %v6480_v30  ;;  %v471_v31 = vpop.permute.xlu1 %470  ;;  %v2477_v35 = vpop.f32.mrb[21].mxu1  ;;  %4583 = vmatmul.mubr.bf16.gmra.mrb[48].mxu1 %v2292_v28  ;;  %v1350_v51 = vadd.f32 %v1286_v43, %v962_v54  ;;  %v575_v43 = vmul.f32 %v5844_v37, %v466_v40  ;;  %v7244_v54 = vld [vmem:[#allocation44_spill] sm:$0xff] }
 0x265   :  { %v2676_v53 = vmul.f32 %v6480_v30, %v2477_v35  ;;  %v4557_v47 = vpop.f32.mrb[22].mxu1  ;;  %v1289_v28 = vmul.f32 %v5849_v16, %v7244_v54 }
 0x266   :  { %v2746_v3 = vadd.f32 %v6484_v52, %v2678_v15  ;;  %v2021_v11 = vadd.f32 %v6421_v42, %v1350_v51  ;;  %v2679_v48 = vmul.f32 %v4557_v47, %v6480_v30  ;;  %v2480_v18 = vpop.f32.mrb[23].mxu1  ;;  %v804_v15 = vpop.permute.xlu0 %803  ;;  %v576_v51 = vmul.f32 %v5844_v37, %v471_v31 }
 0x267   :  { %v2744_v59 = vadd.f32 %v6484_v52, %v2676_v53  ;;  %v2677_v62 = vmul.f32 %v6480_v30, %v2480_v18  ;;  %v900_v35 = vmul.f32 %v5838_v5, %v804_v15 }
 0x268   :  { %v2747_v60 = vadd.f32 %v6484_v52, %v2679_v48  ;;  %v476_v7 = vpop.permute.xlu1 %475  ;;  %v2810_v49 = vmax.f32 %v2746_v3, 0.0  ;;  %v963_v3 = vadd.f32 %v899_v41, %v575_v43 }
 0x269   :  { %v2745_v13 = vadd.f32 %v6484_v52, %v2677_v62  ;;  %v2808_v24 = vmax.f32 %v2744_v59, 0.0  ;;  %v577_v57 = vmul.f32 %v5844_v37, %v476_v7  ;;  %v2123_v59 = vmul.f32 %v5884_v0, %v2021_v11 }
 0x26a   :  { %v2811_v19 = vmax.f32 %v2747_v60, 0.0 }
 0x26b   :  { %v2809_v27 = vmax.f32 %v2745_v13, 0.0 }
 0x26c   :  { %v6649_v34 = vpack.c.bf16 %v2811_v19, %v2810_v49  ;;  %v964_v19 = vadd.f32 %v900_v35, %v576_v51 }
 0x26d   :  { %v808_v42 = vpop.permute.xlu1 %807  ;;  %v6651_v8 = vpack.c.bf16 %v2809_v27, %v2808_v24 }
 0x26e   :  { %v901_v56 = vmul.f32 %v5838_v5, %v808_v42 }
 0x270   :  { %v965_v10 = vadd.f32 %v901_v56, %v577_v57  ;;  %v2191_v56 = vadd.f32 %v5905_v17, %v2123_v59 }
 0x272   :  { %v1188_v53 = vpop.permute.xlu1 %1187  ;;  %v1353_v47 = vadd.f32 %v1289_v28, %v965_v10 }
 0x273   :  { %v1287_v48 = vmul.f32 %v5849_v16, %v1188_v53  ;;  %v4560_v18 = vpop.f32.mrb[24].mxu1 }
 0x274   :  { %v2032_v62 = vadd.f32 %v6437_v45, %v1353_v47  ;;  %v2682_v40 = vmul.f32 %v4560_v18, %v6480_v30  ;;  %v2493_v60 = vpop.f32.mrb[25].mxu1 }
 0x275   :  { %v1351_v7 = vadd.f32 %v1287_v48, %v963_v3  ;;  %v2680_v13 = vmul.f32 %v6480_v30, %v2493_v60  ;;  %v4561_v49 = vpop.f32.mrb[26].mxu1  ;;  %v2255_v48 = vmax.f32 %v2191_v56, 0.0 }
 0x276   :  { %v2750_v31 = vadd.f32 %v6484_v52, %v2682_v40  ;;  %v2683_v46 = vmul.f32 %v4561_v49, %v6480_v30  ;;  %v1192_v24 = vpop.permute.xlu1 %1191  ;;  %v2496_v27 = vpop.f32.mrb[27].mxu1  ;;  %v2126_v54 = vmul.f32 %v5884_v0, %v2032_v62 }
 0x277   :  { %v2024_v42 = vadd.f32 %v6426_v22, %v1351_v7  ;;  %v2748_v11 = vadd.f32 %v6484_v52, %v2680_v13  ;;  %v1288_v45 = vmul.f32 %v5849_v16, %v1192_v24  ;;  %v2681_v57 = vmul.f32 %v6480_v30, %v2496_v27 }
 0x278   :  { %v2751_v41 = vadd.f32 %v6484_v52, %v2683_v46  ;;  %v2814_v15 = vmax.f32 %v2750_v31, 0.0  ;;  %v2194_v59 = vadd.f32 %v5905_v17, %v2126_v54  ;;  %v579_v24 = vmul.f32 %v5844_v37, %v6398_v61 }
 0x279   :  { %v2124_v43 = vmul.f32 %v5884_v0, %v2024_v42  ;;  %v1352_v28 = vadd.f32 %v1288_v45, %v964_v19  ;;  %v2749_v10 = vadd.f32 %v6484_v52, %v2681_v57  ;;  %v2812_v22 = vmax.f32 %v2748_v11, 0.0  ;;  %v7245_v11 = vld [vmem:[#allocation46_spill] sm:$0xff] }
 0x27a   :  { %v2815_v35 = vmax.f32 %v2751_v41, 0.0  ;;  %v2258_v19 = vmax.f32 %v2194_v59, 0.0  ;;  %v1291_v45 = vmul.f32 %v5849_v16, %v7245_v11 }
 0x27b   :  { %v2029_v51 = vadd.f32 %v6431_v23, %v1352_v28  ;;  %v2813_v53 = vmax.f32 %v2749_v10, 0.0  ;;  %v481_v47 = vpop.permute.xlu1 %480  ;;  %v2192_v3 = vadd.f32 %v5905_v17, %v2124_v43 }
 0x27c   :  { %v6679_v18 = vpack.c.bf16 %v2815_v35, %v2814_v15 }
 0x27d   :  { %v2125_v40 = vmul.f32 %v5884_v0, %v2029_v51  ;;  %v2256_v62 = vmax.f32 %v2192_v3, 0.0  ;;  %v6683_v60 = vpack.c.bf16 %v2813_v53, %v2812_v22 }
 0x27f   :  { %v2293_v7 = vpack.c.bf16 %v2256_v62, %v2255_v48  ;;  %v2193_v13 = vadd.f32 %v5905_v17, %v2125_v40 }
 0x280   :  { %v812_v49 = vpop.permute.xlu1 %811 }
 0x281   :  { %4586 = vmatprep.mubr.bf16.mxu1 %v2293_v7  ;;  %v2257_v23 = vmax.f32 %v2193_v13, 0.0 }
 0x283   :  { %v2294_v31 = vpack.c.bf16 %v2258_v19, %v2257_v23  ;;  %v902_v23 = vmul.f32 %v5838_v5, %v812_v49 }
 0x284   :  { %v816_v46 = vpop.permute.xlu1 %815 }
 0x285   :  { %v903_v27 = vmul.f32 %v5838_v5, %v816_v46  ;;  %4587 = vmatmul.mubr.bf16.gmra.mrb[52].mxu1 %v2294_v31  ;;  %v820_v46 = vpop.permute.xlu0 %819 }
 0x286   :  { %v4564_v42 = vpop.f32.mrb[28].mxu1 }
 0x287   :  { %v967_v57 = vadd.f32 %v903_v27, %v579_v24  ;;  %v2686_v56 = vmul.f32 %v4564_v42, %v6480_v30  ;;  %v2509_v41 = vpop.f32.mrb[29].mxu1  ;;  %v578_v24 = vmul.f32 %v5844_v37, %v481_v47  ;;  %v904_v42 = vmul.f32 %v5838_v5, %v820_v46 }
 0x288   :  { %v2684_v43 = vmul.f32 %v6480_v30, %v2509_v41  ;;  %v4565_v54 = vpop.f32.mrb[30].mxu1 }
 0x289   :  { %v2754_v28 = vadd.f32 %v6484_v52, %v2686_v56  ;;  %v2687_v10 = vmul.f32 %v4565_v54, %v6480_v30  ;;  %v496_v15 = vpop.permute.xlu1 %495  ;;  %v2512_v61 = vpop.f32.mrb[31].mxu1  ;;  %v1355_v35 = vadd.f32 %v1291_v45, %v967_v57  ;;  %v966_v11 = vadd.f32 %v902_v23, %v578_v24 }
 0x28a   :  { %v2752_v22 = vadd.f32 %v6484_v52, %v2684_v43  ;;  %v2685_v51 = vmul.f32 %v6480_v30, %v2512_v61 }
 0x28b   :  { %v2755_v53 = vadd.f32 %v6484_v52, %v2687_v10  ;;  %v2040_v3 = vadd.f32 %v6461_v33, %v1355_v35  ;;  %v2818_v59 = vmax.f32 %v2754_v28, 0.0  ;;  %v580_v33 = vmul.f32 %v5844_v37, %v6408_v14  ;;  %v832_v28 = vpop.permute.xlu0 %831 }
 0x28c   :  { %v2753_v48 = vadd.f32 %v6484_v52, %v2685_v51  ;;  %v2816_v62 = vmax.f32 %v2752_v22, 0.0  ;;  %v581_v10 = vmul.f32 %v5844_v37, %v496_v15 }
 0x28d   :  { %v2819_v40 = vmax.f32 %v2755_v53, 0.0  ;;  %v2128_v57 = vmul.f32 %v5884_v0, %v2040_v3  ;;  %v968_v43 = vadd.f32 %v904_v42, %v580_v33  ;;  %v582_v33 = vmul.f32 %v5844_v37, %v6424_v12 }
 0x28e   :  { %v2817_v7 = vmax.f32 %v2753_v48, 0.0  ;;  %v824_v13 = vpop.permute.xlu1 %823 }
 0x28f   :  { %v6700_v19 = vpack.c.bf16 %v2819_v40, %v2818_v59  ;;  %v905_v49 = vmul.f32 %v5838_v5, %v824_v13  ;;  %v2196_v14 = vadd.f32 %v5905_v17, %v2128_v57 }
 0x290   :  { %v6703_v31 = vpack.c.bf16 %v2817_v7, %v2816_v62  ;;  %v836_v7 = vpop.permute.xlu0 %835 }
 0x291   :  { %v969_v51 = vadd.f32 %v905_v49, %v581_v10  ;;  %v2260_v59 = vmax.f32 %v2196_v14, 0.0 }
 0x293   :  { %v1200_v27 = vpop.permute.xlu1 %1199 }
 0x294   :  { %v1290_v45 = vmul.f32 %v5849_v16, %v1200_v27  ;;  %v1216_v27 = vpop.permute.xlu0 %1215 }
 0x296   :  { %v1354_v56 = vadd.f32 %v1290_v45, %v966_v11 }
 0x297   :  { %v1208_v41 = vpop.permute.xlu1 %1207 }
 0x298   :  { %v2037_v54 = vadd.f32 %v6455_v2, %v1354_v56  ;;  %v1292_v47 = vmul.f32 %v5849_v16, %v1208_v41 }
 0x29a   :  { %v2127_v61 = vmul.f32 %v5884_v0, %v2037_v54  ;;  %v1356_v35 = vadd.f32 %v1292_v47, %v968_v43 }
 0x29b   :  { %v1212_v22 = vpop.permute.xlu1 %1211 }
 0x29c   :  { %v1293_v53 = vmul.f32 %v5849_v16, %v1212_v22  ;;  %v2045_v3 = vadd.f32 %v6503_v32, %v1356_v35  ;;  %v2195_v48 = vadd.f32 %v5905_v17, %v2127_v61 }
 0x29e   :  { %v2129_v2 = vmul.f32 %v5884_v0, %v2045_v3  ;;  %v1357_v40 = vadd.f32 %v1293_v53, %v969_v51  ;;  %v2259_v62 = vmax.f32 %v2195_v48, 0.0 }
 0x2a0   :  { %v2048_v15 = vadd.f32 %v6511_v63, %v1357_v40  ;;  %v506_v13 = vpop.permute.xlu1 %505  ;;  %v2295_v23 = vpack.c.bf16 %v2260_v59, %v2259_v62  ;;  %v2197_v46 = vadd.f32 %v5905_v17, %v2129_v2  ;;  %v1294_v63 = vmul.f32 %v5849_v16, %v1216_v27  ;;  %v1228_v2 = vpop.permute.xlu0 %1227 }
 0x2a2   :  { %v2130_v24 = vmul.f32 %v5884_v0, %v2048_v15  ;;  %4590 = vmatprep.mubr.bf16.mxu1 %v2295_v23  ;;  %v2261_v11 = vmax.f32 %v2197_v46, 0.0 }
 0x2a4   :  { %v2198_v32 = vadd.f32 %v5905_v17, %v2130_v24 }
 0x2a5   :  { %v828_v42 = vpop.permute.xlu1 %827 }
 0x2a6   :  { %v2262_v45 = vmax.f32 %v2198_v32, 0.0  ;;  %v906_v57 = vmul.f32 %v5838_v5, %v828_v42  ;;  %v1297_v32 = vmul.f32 %v5849_v16, %v1228_v2  ;;  %v583_v42 = vmul.f32 %v5844_v37, %v506_v13 }
 0x2a8   :  { %v970_v56 = vadd.f32 %v906_v57, %v582_v33  ;;  %v2296_v41 = vpack.c.bf16 %v2262_v45, %v2261_v11  ;;  %v907_v57 = vmul.f32 %v5838_v5, %v832_v28 }
 0x2aa   :  { %v511_v43 = vpop.permute.xlu1 %510  ;;  %4591 = vmatmul.mubr.bf16.gmra.mrb[56].mxu1 %v2296_v41  ;;  %v1358_v49 = vadd.f32 %v1294_v63, %v970_v56  ;;  %v971_v41 = vadd.f32 %v907_v57, %v583_v42 }
 0x2ab   :  { %v4568_v54 = vpop.f32.mrb[32].mxu1 }
 0x2ac   :  { %v2053_v47 = vadd.f32 %v6541_v29, %v1358_v49  ;;  %v2690_v10 = vmul.f32 %v4568_v54, %v6480_v30  ;;  %v2525_v14 = vpop.f32.mrb[33].mxu1  ;;  %v584_v49 = vmul.f32 %v5844_v37, %v511_v43 }
 0x2ad   :  { %v2688_v12 = vmul.f32 %v6480_v30, %v2525_v14  ;;  %v4569_v61 = vpop.f32.mrb[34].mxu1 }
 0x2ae   :  { %v2758_v35 = vadd.f32 %v6484_v52, %v2690_v10  ;;  %v2691_v22 = vmul.f32 %v4569_v61, %v6480_v30  ;;  %v516_v51 = vpop.permute.xlu1 %515  ;;  %v2528_v53 = vpop.f32.mrb[35].mxu1  ;;  %v908_v10 = vmul.f32 %v5838_v5, %v836_v7  ;;  %v2131_v14 = vmul.f32 %v5884_v0, %v2053_v47 }
 0x2af   :  { %v2756_v3 = vadd.f32 %v6484_v52, %v2688_v12  ;;  %v2689_v48 = vmul.f32 %v6480_v30, %v2528_v53  ;;  %v585_v24 = vmul.f32 %v5844_v37, %v516_v51 }
 0x2b0   :  { %v2759_v59 = vadd.f32 %v6484_v52, %v2691_v22  ;;  %v2822_v40 = vmax.f32 %v2758_v35, 0.0  ;;  %v972_v35 = vadd.f32 %v908_v10, %v584_v49  ;;  %v2199_v51 = vadd.f32 %v5905_v17, %v2131_v14 }
 0x2b1   :  { %v2757_v29 = vadd.f32 %v6484_v52, %v2689_v48  ;;  %v2820_v15 = vmax.f32 %v2756_v3, 0.0 }
 0x2b2   :  { %v2823_v62 = vmax.f32 %v2759_v59, 0.0  ;;  %v2263_v47 = vmax.f32 %v2199_v51, 0.0 }
 0x2b3   :  { %v2821_v23 = vmax.f32 %v2757_v29, 0.0  ;;  %v840_v46 = vpop.permute.xlu1 %839 }
 0x2b4   :  { %v909_v27 = vmul.f32 %v5838_v5, %v840_v46  ;;  %v6741_v33 = vpack.c.bf16 %v2823_v62, %v2822_v40 }
 0x2b5   :  { %v6744_v11 = vpack.c.bf16 %v2821_v23, %v2820_v15 }
 0x2b6   :  { %v973_v45 = vadd.f32 %v909_v27, %v585_v24 }
 0x2b8   :  { %v1220_v63 = vpop.permute.xlu1 %1219  ;;  %v1361_v56 = vadd.f32 %v1297_v32, %v973_v45 }
 0x2b9   :  { %v1295_v54 = vmul.f32 %v5849_v16, %v1220_v63 }
 0x2ba   :  { %v2064_v61 = vadd.f32 %v6576_v38, %v1361_v56 }
 0x2bb   :  { %v1359_v12 = vadd.f32 %v1295_v54, %v971_v41 }
 0x2bc   :  { %v1224_v13 = vpop.permute.xlu1 %1223  ;;  %v2134_v37 = vmul.f32 %v5884_v0, %v2064_v61 }
 0x2bd   :  { %v2056_v22 = vadd.f32 %v6567_v20, %v1359_v12  ;;  %v1296_v28 = vmul.f32 %v5849_v16, %v1224_v13 }
 0x2be   :  { %v2202_v38 = vadd.f32 %v5905_v17, %v2134_v37 }
 0x2bf   :  { %v2132_v53 = vmul.f32 %v5884_v0, %v2056_v22  ;;  %v1360_v43 = vadd.f32 %v1296_v28, %v972_v35 }
 0x2c0   :  { %v2266_v59 = vmax.f32 %v2202_v38, 0.0 }
 0x2c1   :  { %v2061_v5 = vadd.f32 %v6574_v50, %v1360_v43  ;;  %v2200_v7 = vadd.f32 %v5905_v17, %v2132_v53 }
 0x2c3   :  { %v2133_v3 = vmul.f32 %v5884_v0, %v2061_v5  ;;  %v2264_v48 = vmax.f32 %v2200_v7, 0.0 }
 0x2c5   :  { %v2297_v20 = vpack.c.bf16 %v2264_v48, %v2263_v47  ;;  %v2201_v16 = vadd.f32 %v5905_v17, %v2133_v3 }
 0x2c7   :  { %4594 = vmatprep.mubr.bf16.mxu1 %v2297_v20  ;;  %v2265_v29 = vmax.f32 %v2201_v16, 0.0 }
 0x2c9   :  { %v2298_v2 = vpack.c.bf16 %v2266_v59, %v2265_v29 }
 0x2cb   :  { %4595 = vmatmul.mubr.bf16.gmra.mrb[60].mxu1 %v2298_v2 }
 0x2cc   :  { %v4572_v40 = vpop.f32.mrb[36].mxu1  ;;  %4614 = vmatprep.mubr.bf16.mxu1 %v6513_v6 }
 0x2cd   :  { %v2694_v50 = vmul.f32 %v4572_v40, %v6480_v30  ;;  %v2541_v62 = vpop.f32.mrb[37].mxu1 }
 0x2ce   :  { %v2692_v15 = vmul.f32 %v6480_v30, %v2541_v62  ;;  %v4573_v23 = vpop.f32.mrb[38].mxu1 }
 0x2cf   :  { %v2762_v0 = vadd.f32 %v6484_v52, %v2694_v50  ;;  %v2695_v46 = vmul.f32 %v4573_v23, %v6480_v30  ;;  %v2544_v24 = vpop.f32.mrb[39].mxu1 }
 0x2d0   :  { %v2760_v17 = vadd.f32 %v6484_v52, %v2692_v15  ;;  %v2693_v27 = vmul.f32 %v6480_v30, %v2544_v24 }
 0x2d1   :  { %v2763_v32 = vadd.f32 %v6484_v52, %v2695_v46  ;;  %v2826_v6 = vmax.f32 %v2762_v0, 0.0 }
 0x2d2   :  { %v2761_v42 = vadd.f32 %v6484_v52, %v2693_v27  ;;  %v2824_v57 = vmax.f32 %v2760_v17, 0.0 }
 0x2d3   :  { %v2827_v45 = vmax.f32 %v2763_v32, 0.0  ;;  %4615 = vmatmul.mubr.bf16.vlgmr.msra.gmra.mrb[64].mxu1 %v6508_v1 }
 0x2d4   :  { %v2825_v63 = vmax.f32 %v2761_v42, 0.0  ;;  %4618 = vmatprep.mubr.bf16.mxu1 %v6543_v26 }
 0x2d5   :  { %v2871_v56 = vpack.c.bf16 %v2827_v45, %v2826_v6 }
 0x2d6   :  { %v2870_v41 = vpack.c.bf16 %v2825_v63, %v2824_v57 }
 0x2db   :  { %4619 = vmatmul.mubr.bf16.gmra.mrb[68].mxu1 %v6537_v39 }
 0x2dc   :  { %4622 = vmatprep.mubr.bf16.mxu1 %v6581_v58 }
 0x2e3   :  { %4623 = vmatmul.mubr.bf16.gmra.mrb[72].mxu1 %v6578_v36 }
 0x2e4   :  { %4626 = vmatprep.mubr.bf16.mxu1 %v6602_v9 }
 0x2eb   :  { %4627 = vmatmul.mubr.bf16.gmra.mrb[76].mxu1 %v6600_v21 }
 0x2ec   :  { %4630 = vmatprep.mubr.bf16.mxu1 %v6632_v55 }
 0x2f1   :  { %v4576_v49 = vpop.f32.mrb[40].mxu1 }
 0x2f2   :  { %v2698_v1 = vmul.f32 %v4576_v49, %v6480_v30  ;;  %v2557_v54 = vpop.f32.mrb[41].mxu1 }
 0x2f3   :  { %v2696_v26 = vmul.f32 %v6480_v30, %v2557_v54  ;;  %v4577_v10 = vpop.f32.mrb[42].mxu1  ;;  %4631 = vmatmul.mubr.bf16.gmra.mrb[80].mxu1 %v6630_v4 }
 0x2f4   :  { %v2766_v39 = vadd.f32 %v6484_v52, %v2698_v1  ;;  %v2699_v58 = vmul.f32 %v4577_v10, %v6480_v30  ;;  %v2560_v36 = vpop.f32.mrb[43].mxu1  ;;  %4634 = vmatprep.mubr.bf16.mxu1 %v6651_v8 }
 0x2f5   :  { %v2764_v21 = vadd.f32 %v6484_v52, %v2696_v26  ;;  %v2697_v9 = vmul.f32 %v6480_v30, %v2560_v36 }
 0x2f6   :  { %v2767_v55 = vadd.f32 %v6484_v52, %v2699_v58  ;;  %v2830_v12 = vmax.f32 %v2766_v39, 0.0 }
 0x2f7   :  { %v2765_v14 = vadd.f32 %v6484_v52, %v2697_v9  ;;  %v2828_v13 = vmax.f32 %v2764_v21, 0.0 }
 0x2f8   :  { %v2831_v61 = vmax.f32 %v2767_v55, 0.0 }
 0x2f9   :  { %v2829_v35 = vmax.f32 %v2765_v14, 0.0 }
 0x2fa   :  { %v2873_v4 = vpack.c.bf16 %v2831_v61, %v2830_v12 }
 0x2fb   :  { %4635 = vmatmul.mubr.bf16.gmra.mrb[84].mxu1 %v6649_v34  ;;  %v2872_v22 = vpack.c.bf16 %v2829_v35, %v2828_v13 }
 0x2fc   :  { %4638 = vmatprep.mubr.bf16.mxu1 %v6683_v60 }
 0x303   :  { %4639 = vmatmul.mubr.bf16.gmra.mrb[88].mxu1 %v6679_v18 }
 0x304   :  { %4642 = vmatprep.mubr.bf16.mxu1 %v6703_v31 }
 0x30b   :  { %4643 = vmatmul.mubr.bf16.gmra.mrb[92].mxu1 %v6700_v19 }
 0x30c   :  { %4646 = vmatprep.mubr.bf16.mxu1 %v6744_v11 }
 0x312   :  { %v4580_v8 = vpop.f32.mrb[44].mxu1 }
 0x313   :  { %v2702_v28 = vmul.f32 %v4580_v8, %v6480_v30  ;;  %v2573_v51 = vpop.f32.mrb[45].mxu1  ;;  %4647 = vmatmul.mubr.bf16.gmra.mrb[96].mxu1 %v6741_v33 }
 0x314   :  { %v2700_v53 = vmul.f32 %v6480_v30, %v2573_v51  ;;  %v4581_v34 = vpop.f32.mrb[46].mxu1  ;;  %4650 = vmatprep.mubr.bf16.mxu1 %v2870_v41 }
 0x315   :  { %v2770_v60 = vadd.f32 %v6484_v52, %v2702_v28  ;;  %v2703_v18 = vmul.f32 %v4581_v34, %v6480_v30  ;;  %v2576_v37 = vpop.f32.mrb[47].mxu1 }
 0x316   :  { %v2768_v31 = vadd.f32 %v6484_v52, %v2700_v53  ;;  %v2701_v19 = vmul.f32 %v6480_v30, %v2576_v37 }
 0x317   :  { %v2771_v11 = vadd.f32 %v6484_v52, %v2703_v18  ;;  %v2834_v5 = vmax.f32 %v2770_v60, 0.0 }
 0x318   :  { %v2769_v43 = vadd.f32 %v6484_v52, %v2701_v19  ;;  %v2832_v33 = vmax.f32 %v2768_v31, 0.0 }
 0x319   :  { %v2835_v7 = vmax.f32 %v2771_v11, 0.0 }
 0x31a   :  { %v2833_v47 = vmax.f32 %v2769_v43, 0.0 }
 0x31b   :  { %4651 = vmatmul.mubr.bf16.gmra.mrb[100].mxu1 %v2871_v56  ;;  %v2875_v38 = vpack.c.bf16 %v2835_v7, %v2834_v5 }
 0x31c   :  { %4654 = vmatprep.mubr.bf16.mxu1 %v2872_v22  ;;  %v2874_v3 = vpack.c.bf16 %v2833_v47, %v2832_v33  ;;  %v3239_v47 = vsub.s32 7, %v5794_v25 }
 0x323   :  { %4655 = vmatmul.mubr.bf16.gmra.mrb[104].mxu1 %v2873_v4 }
 0x324   :  { %4658 = vmatprep.mubr.bf16.mxu1 %v2874_v3 }
 0x32b   :  { %4659 = vmatmul.mubr.bf16.gmra.mrb[108].mxu1 %v2875_v38 }
 0x337   :  { %v4584_v48 = vpop.f32.mrb[48].mxu1 }
 0x338   :  { %v2706_v20 = vmul.f32 %v4584_v48, %v6480_v30  ;;  %v2589_v16 = vpop.f32.mrb[49].mxu1 }
 0x339   :  { %v2704_v59 = vmul.f32 %v6480_v30, %v2589_v16  ;;  %v4585_v29 = vpop.f32.mrb[50].mxu1 }
 0x33a   :  { %v2774_v2 = vadd.f32 %v6484_v52, %v2706_v20  ;;  %v2707_v40 = vmul.f32 %v4585_v29, %v6480_v30  ;;  %v2592_v50 = vpop.f32.mrb[51].mxu1 }
 0x33b   :  { %v2772_v62 = vadd.f32 %v6484_v52, %v2704_v59  ;;  %v2705_v15 = vmul.f32 %v6480_v30, %v2592_v50  ;;  %v5005_v50 = vld [vmem:[%s7151_s3] sm:$0xff] }
 0x33c   :  { %v2775_v23 = vadd.f32 %v6484_v52, %v2707_v40  ;;  %v2838_v46 = vmax.f32 %v2774_v2, 0.0  ;;  %v37_v2 = vld [vmem:[%s7151_s3 + $0x8] sm:$0x3f] }
 0x33d   :  { %v2773_v0 = vadd.f32 %v6484_v52, %v2705_v15  ;;  %v2836_v17 = vmax.f32 %v2772_v62, 0.0  ;;  %v6842_v62 = vrot.slane %v5005_v50, %v3239_v47 }
 0x33e   :  { %v2839_v24 = vmax.f32 %v2775_v23, 0.0 }
 0x33f   :  { %v2837_v27 = vmax.f32 %v2773_v0, 0.0 }
 0x340   :  { %v2877_v32 = vpack.c.bf16 %v2839_v24, %v2838_v46  ;;  %v7246_v46 = vsub.s32 0, %v5794_v25 }
 0x341   :  { %v2876_v42 = vpack.c.bf16 %v2837_v27, %v2836_v17 }
 0x342   :  { %v6847_v24 = vrot.slane %v37_v2, %v7246_v46 }
 0x343   :  { %4662 = vmatprep.mubr.bf16.mxu1 %v2876_v42 }
 0x344   :  { %4663 = vmatmul.mubr.bf16.gmra.mrb[112].mxu1 %v2877_v32 }
 0x358   :  { %v4588_v6 = vpop.f32.mrb[52].mxu1 }
 0x359   :  { %v2710_v45 = vmul.f32 %v4588_v6, %v6480_v30  ;;  %v2605_v57 = vpop.f32.mrb[53].mxu1 }
 0x35a   :  { %v2708_v63 = vmul.f32 %v6480_v30, %v2605_v57  ;;  %v4589_v56 = vpop.f32.mrb[54].mxu1 }
 0x35b   :  { %v2778_v41 = vadd.f32 %v6484_v52, %v2710_v45  ;;  %v2711_v49 = vmul.f32 %v4589_v56, %v6480_v30  ;;  %v2608_v1 = vpop.f32.mrb[55].mxu1 }
 0x35c   :  { %v2776_v54 = vadd.f32 %v6484_v52, %v2708_v63  ;;  %v2709_v26 = vmul.f32 %v6480_v30, %v2608_v1 }
 0x35d   :  { %v2779_v10 = vadd.f32 %v6484_v52, %v2711_v49  ;;  %v2842_v58 = vmax.f32 %v2778_v41, 0.0 }
 0x35e   :  { %v2777_v39 = vadd.f32 %v6484_v52, %v2709_v26  ;;  %v2840_v21 = vmax.f32 %v2776_v54, 0.0 }
 0x35f   :  { %v2843_v36 = vmax.f32 %v2779_v10, 0.0 }
 0x360   :  { %v2841_v9 = vmax.f32 %v2777_v39, 0.0 }
 0x361   :  { %v2879_v55 = vpack.c.bf16 %v2843_v36, %v2842_v58 }
 0x362   :  { %v2878_v14 = vpack.c.bf16 %v2841_v9, %v2840_v21 }
 0x364   :  { %4666 = vmatprep.mubr.bf16.mxu1 %v2878_v14 }
 0x365   :  { %4667 = vmatmul.mubr.bf16.gmra.mrb[116].mxu1 %v2879_v55 }
 0x37d   :  { %v4592_v12 = vpop.f32.mrb[56].mxu1 }
 0x37e   :  { %v2714_v61 = vmul.f32 %v4592_v12, %v6480_v30  ;;  %v2621_v13 = vpop.f32.mrb[57].mxu1 }
 0x37f   :  { %v2712_v35 = vmul.f32 %v6480_v30, %v2621_v13  ;;  %v4593_v4 = vpop.f32.mrb[58].mxu1 }
 0x380   :  { %v2782_v22 = vadd.f32 %v6484_v52, %v2714_v61  ;;  %v2715_v8 = vmul.f32 %v4593_v4, %v6480_v30  ;;  %v2624_v28 = vpop.f32.mrb[59].mxu1 }
 0x381   :  { %v2780_v51 = vadd.f32 %v6484_v52, %v2712_v35  ;;  %v2713_v53 = vmul.f32 %v6480_v30, %v2624_v28 }
 0x382   :  { %v2783_v34 = vadd.f32 %v6484_v52, %v2715_v8  ;;  %v2846_v18 = vmax.f32 %v2782_v22, 0.0 }
 0x383   :  { %v2781_v60 = vadd.f32 %v6484_v52, %v2713_v53  ;;  %v2844_v31 = vmax.f32 %v2780_v51, 0.0 }
 0x384   :  { %v2847_v37 = vmax.f32 %v2783_v34, 0.0 }
 0x385   :  { %v2845_v19 = vmax.f32 %v2781_v60, 0.0 }
 0x386   :  { %v2881_v11 = vpack.c.bf16 %v2847_v37, %v2846_v18 }
 0x387   :  { %v2880_v43 = vpack.c.bf16 %v2845_v19, %v2844_v31  ;;  %v4960_v31 = vld [vmem:[#allocation2 + $0x100] sm:$0xff]   ;;  %v4961_v19 = vld [vmem:[#allocation2 + $0x108] sm:$0xff]  }
 0x388   :  { %4678 = vmatprep.subr.bf16.mxu1 %v4960_v31 }
 0x389   :  { %4670 = vmatprep.mubr.bf16.mxu1 %v2880_v43  ;;  %4679 = vmatpush3.bf16.msra.mxu1 %v4960_v31 }
 0x38a   :  { %4671 = vmatmul.mubr.bf16.gmra.mrb[120].mxu1 %v2881_v11  ;;  %4680 = vmatprep.subr.bf16.mxu1 %v4961_v19 }
 0x38d   :  { %4681 = vmatpush3.bf16.msra.mxu1 %v4961_v19 }
 0x39e   :  { %v4596_v5 = vpop.f32.mrb[60].mxu1 }
 0x39f   :  { %v2718_v7 = vmul.f32 %v4596_v5, %v6480_v30  ;;  %v2637_v33 = vpop.f32.mrb[61].mxu1 }
 0x3a0   :  { %v2716_v38 = vmul.f32 %v6480_v30, %v2637_v33  ;;  %v4597_v3 = vpop.f32.mrb[62].mxu1 }
 0x3a1   :  { %v2786_v48 = vadd.f32 %v6484_v52, %v2718_v7  ;;  %v2719_v20 = vmul.f32 %v4597_v3, %v6480_v30  ;;  %v2640_v16 = vpop.f32.mrb[63].mxu1 }
 0x3a2   :  { %v2784_v59 = vadd.f32 %v6484_v52, %v2716_v38  ;;  %v2717_v29 = vmul.f32 %v6480_v30, %v2640_v16 }
 0x3a3   :  { %v2787_v40 = vadd.f32 %v6484_v52, %v2719_v20  ;;  %v2850_v23 = vmax.f32 %v2786_v48, 0.0 }
 0x3a4   :  { %v2785_v15 = vadd.f32 %v6484_v52, %v2717_v29  ;;  %v2848_v30 = vmax.f32 %v2784_v59, 0.0 }
 0x3a5   :  { %v2851_v0 = vmax.f32 %v2787_v40, 0.0 }
 0x3a6   :  { %v2849_v17 = vmax.f32 %v2785_v15, 0.0  ;;  %v4616_v27 = vpop.f32.mrb[64].mxu1 }
 0x3a7   :  { %v3243_v32 = vmul.f32 %v4616_v27, %v6842_v62  ;;  %v2982_v42 = vpop.f32.mrb[65].mxu1  ;;  %v2883_v6 = vpack.c.bf16 %v2851_v0, %v2850_v23 }
 0x3a8   :  { %v3241_v45 = vmul.f32 %v6842_v62, %v2982_v42  ;;  %v4617_v57 = vpop.f32.mrb[66].mxu1  ;;  %v2882_v63 = vpack.c.bf16 %v2849_v17, %v2848_v30 }
 0x3a9   :  { %v3311_v56 = vadd.f32 %v6847_v24, %v3243_v32  ;;  %v3244_v52 = vmul.f32 %v4617_v57, %v6842_v62  ;;  %v2985_v41 = vpop.f32.mrb[67].mxu1 }
 0x3aa   :  { %v3309_v49 = vadd.f32 %v6847_v24, %v3241_v45  ;;  %v3242_v1 = vmul.f32 %v6842_v62, %v2985_v41  ;;  %4674 = vmatprep.mubr.bf16.mxu1 %v2882_v63 }
 0x3ab   :  { %v3312_v54 = vadd.f32 %v6847_v24, %v3244_v52  ;;  %4675 = vmatmul.mubr.bf16.gmra.mrb[124].mxu1 %v2883_v6  ;;  %v3375_v10 = vmax.f32 %v3311_v56, 0.0 }
 0x3ac   :  { %v3310_v26 = vadd.f32 %v6847_v24, %v3242_v1  ;;  %v3373_v58 = vmax.f32 %v3309_v49, 0.0 }
 0x3ad   :  { %v3376_v39 = vmax.f32 %v3312_v54, 0.0 }
 0x3ae   :  { %v3374_v36 = vmax.f32 %v3310_v26, 0.0  ;;  %v4620_v21 = vpop.f32.mrb[68].mxu1 }
 0x3af   :  { %v3444_v9 = vmax.f32 %v3375_v10, %v3376_v39  ;;  %v3247_v55 = vmul.f32 %v4620_v21, %v6842_v62  ;;  %v2998_v14 = vpop.f32.mrb[69].mxu1 }
 0x3b0   :  { %v3437_v12 = vmax.f32 %v3373_v58, %v3374_v36  ;;  %v3245_v61 = vmul.f32 %v6842_v62, %v2998_v14  ;;  %v4621_v13 = vpop.f32.mrb[70].mxu1 }
 0x3b1   :  { %v3445_v35 = vrot.slane %v3444_v9, 4  ;;  %v3315_v4 = vadd.f32 %v6847_v24, %v3247_v55  ;;  %v3248_v22 = vmul.f32 %v4621_v13, %v6842_v62  ;;  %v3001_v8 = vpop.f32.mrb[71].mxu1 }
 0x3b2   :  { %v3438_v28 = vrot.slane %v3437_v12, 4  ;;  %v3313_v51 = vadd.f32 %v6847_v24, %v3245_v61  ;;  %v3246_v53 = vmul.f32 %v6842_v62, %v3001_v8 }
 0x3b3   :  { %v3446_v34 = vmax.f32 %v3444_v9, %v3445_v35  ;;  %v3316_v60 = vadd.f32 %v6847_v24, %v3248_v22  ;;  %v3379_v43 = vmax.f32 %v3315_v4, 0.0 }
 0x3b4   :  { %v3439_v18 = vmax.f32 %v3437_v12, %v3438_v28  ;;  %v3314_v37 = vadd.f32 %v6847_v24, %v3246_v53  ;;  %v3377_v33 = vmax.f32 %v3313_v51, 0.0 }
 0x3b5   :  { %v3447_v11 = vrot.slane %v3446_v34, 2  ;;  %v3380_v5 = vmax.f32 %v3316_v60, 0.0 }
 0x3b6   :  { %v3440_v7 = vrot.slane %v3439_v18, 2  ;;  %v3378_v47 = vmax.f32 %v3314_v37, 0.0  ;;  %v4624_v38 = vpop.f32.mrb[72].mxu1 }
 0x3b7   :  { %v3448_v3 = vmax.f32 %v3446_v34, %v3447_v11  ;;  %v3458_v48 = vmax.f32 %v3379_v43, %v3380_v5  ;;  %v3251_v20 = vmul.f32 %v4624_v38, %v6842_v62  ;;  %v3014_v16 = vpop.f32.mrb[73].mxu1 }
 0x3b8   :  { %v3441_v59 = vmax.f32 %v3439_v18, %v3440_v7  ;;  %v3451_v29 = vmax.f32 %v3377_v33, %v3378_v47  ;;  %v3249_v2 = vmul.f32 %v6842_v62, %v3014_v16  ;;  %v4625_v40 = vpop.f32.mrb[74].mxu1 }
 0x3b9   :  { %v3449_v50 = vrot.slane %v3448_v3, 1  ;;  %v3459_v15 = vrot.slane %v3458_v48, 4  ;;  %v3319_v23 = vadd.f32 %v6847_v24, %v3251_v20  ;;  %v3252_v0 = vmul.f32 %v4625_v40, %v6842_v62  ;;  %v3017_v46 = vpop.f32.mrb[75].mxu1 }
 0x3ba   :  { %v3442_v30 = vrot.slane %v3441_v59, 1  ;;  %v3452_v17 = vrot.slane %v3451_v29, 4  ;;  %v3317_v27 = vadd.f32 %v6847_v24, %v3249_v2  ;;  %v3250_v32 = vmul.f32 %v6842_v62, %v3017_v46 }
 0x3bb   :  { %v3450_v42 = vmax.f32 %v3448_v3, %v3449_v50  ;;  %v3460_v6 = vmax.f32 %v3458_v48, %v3459_v15  ;;  %v3320_v45 = vadd.f32 %v6847_v24, %v3252_v0  ;;  %v3383_v56 = vmax.f32 %v3319_v23, 0.0 }
 0x3bc   :  { %v3443_v57 = vmax.f32 %v3441_v59, %v3442_v30  ;;  %v3453_v63 = vmax.f32 %v3451_v29, %v3452_v17  ;;  %v3318_v52 = vadd.f32 %v6847_v24, %v3250_v32  ;;  %v3381_v1 = vmax.f32 %v3317_v27, 0.0 }
 0x3bd   :  { %v3737_v41 = vpack.c.bf16 %v3450_v42, %v3450_v42  ;;  %v3461_v49 = vrot.slane %v3460_v6, 2  ;;  %v3384_v54 = vmax.f32 %v3320_v45, 0.0 }
 0x3be   :  { %v3694_v26 = vsel %vm3693_vm0, %v3450_v42, %v3443_v57  ;;  %v3736_v10 = vpack.c.bf16 %v3443_v57, %v3443_v57  ;;  %v3454_v39 = vrot.slane %v3453_v63, 2  ;;  %v3382_v58 = vmax.f32 %v3318_v52, 0.0  ;;  %v4628_v36 = vpop.f32.mrb[76].mxu1 }
 0x3bf   :  { %v3817_v21 = vunpack.c.l.b16 %v3737_v41  ;;  %v3462_v9 = vmax.f32 %v3460_v6, %v3461_v49  ;;  %v3472_v55 = vmax.f32 %v3383_v56, %v3384_v54  ;;  %v3255_v14 = vmul.f32 %v4628_v36, %v6842_v62  ;;  %v3030_v12 = vpop.f32.mrb[77].mxu1 }
 0x3c0   :  { %v3816_v61 = vunpack.c.l.b16 %v3736_v10  ;;  %v3455_v13 = vmax.f32 %v3453_v63, %v3454_v39  ;;  %v3465_v35 = vmax.f32 %v3381_v1, %v3382_v58  ;;  %v3253_v4 = vmul.f32 %v6842_v62, %v3030_v12  ;;  %v4629_v22 = vpop.f32.mrb[78].mxu1 }
 0x3c1   :  { %v3463_v8 = vrot.slane %v3462_v9, 1  ;;  %v3473_v28 = vrot.slane %v3472_v55, 4  ;;  %v3323_v51 = vadd.f32 %v6847_v24, %v3255_v14  ;;  %v3256_v53 = vmul.f32 %v4629_v22, %v6842_v62  ;;  %v3033_v34 = vpop.f32.mrb[79].mxu1 }
 0x3c2   :  { %v6879_v60 = vsel %vm3693_vm0, %v3817_v21, %v3816_v61  ;;  %v3456_v18 = vrot.slane %v3455_v13, 1  ;;  %v3466_v37 = vrot.slane %v3465_v35, 4  ;;  %v3321_v31 = vadd.f32 %v6847_v24, %v3253_v4 }
 0x3c3   :  { %v3464_v19 = vmax.f32 %v3462_v9, %v3463_v8  ;;  %v3474_v11 = vmax.f32 %v3472_v55, %v3473_v28  ;;  %v3324_v43 = vadd.f32 %v6847_v24, %v3256_v53  ;;  %v3254_v33 = vmul.f32 %v6842_v62, %v3033_v34 }
 0x3c4   :  { %v3457_v5 = vmax.f32 %v3455_v13, %v3456_v18  ;;  %v3467_v7 = vmax.f32 %v3465_v35, %v3466_v37  ;;  %v3387_v3 = vmax.f32 %v3323_v51, 0.0  ;;  %v3385_v59 = vmax.f32 %v3321_v31, 0.0 }
 0x3c5   :  { %v3739_v47 = vpack.c.bf16 %v3464_v19, %v3464_v19  ;;  %v3475_v38 = vrot.slane %v3474_v11, 2  ;;  %v3388_v48 = vmax.f32 %v3324_v43, 0.0  ;;  %v3322_v29 = vadd.f32 %v6847_v24, %v3254_v33 }
 0x3c6   :  { %v3696_v20 = vsel %vm3695_vm1, %v3457_v5, %v3694_v26  ;;  %v3468_v16 = vrot.slane %v3467_v7, 2  ;;  %v4632_v2 = vpop.f32.mrb[80].mxu1  ;;  %v3738_v40 = vpack.c.bf16 %v3457_v5, %v3457_v5 }
 0x3c7   :  { %v3476_v50 = vmax.f32 %v3474_v11, %v3475_v38  ;;  %v3698_v15 = vsel %vm3697_vm2, %v3464_v19, %v3696_v20  ;;  %v3486_v23 = vmax.f32 %v3387_v3, %v3388_v48  ;;  %v3046_v0 = vpop.f32.mrb[81].mxu1  ;;  %v6887_v46 = vunpack.c.l.b16 %v3739_v47 }
 0x3c8   :  { %v3469_v30 = vmax.f32 %v3467_v7, %v3468_v16  ;;  %v3386_v17 = vmax.f32 %v3322_v29, 0.0  ;;  %v3259_v27 = vmul.f32 %v4632_v2, %v6842_v62  ;;  %v4633_v32 = vpop.f32.mrb[82].mxu1  ;;  %v3257_v45 = vmul.f32 %v6842_v62, %v3046_v0  ;;  %v4962_v0 = vld [vmem:[#allocation2 + $0x110] sm:$0xff]  }
 0x3c9   :  { %v3477_v42 = vrot.slane %v3476_v50, 1  ;;  %v3487_v6 = vrot.slane %v3486_v23, 4  ;;  %v3260_v57 = vmul.f32 %v4633_v32, %v6842_v62  ;;  %v3049_v63 = vpop.f32.mrb[83].mxu1  ;;  %v3818_v39 = vunpack.c.l.b16 %v3738_v40  ;;  %4682 = vmatprep.subr.bf16.mxu1 %v4962_v0 }
 0x3ca   :  { %v3470_v56 = vrot.slane %v3469_v30, 1  ;;  %v3479_v52 = vmax.f32 %v3385_v59, %v3386_v17  ;;  %v3327_v41 = vadd.f32 %v6847_v24, %v3259_v27  ;;  %v3258_v49 = vmul.f32 %v6842_v62, %v3049_v63  ;;  %4683 = vmatpush3.bf16.msra.mxu1 %v4962_v0 }
 0x3cb   :  { %v3478_v1 = vmax.f32 %v3476_v50, %v3477_v42  ;;  %v3488_v54 = vmax.f32 %v3486_v23, %v3487_v6  ;;  %v3325_v26 = vadd.f32 %v6847_v24, %v3257_v45  ;;  %v3328_v10 = vadd.f32 %v6847_v24, %v3260_v57 }
 0x3cc   :  { %v3471_v58 = vmax.f32 %v3469_v30, %v3470_v56  ;;  %v3480_v36 = vrot.slane %v3479_v52, 4  ;;  %v3326_v21 = vadd.f32 %v6847_v24, %v3258_v49  ;;  %v3391_v14 = vmax.f32 %v3327_v41, 0.0  ;;  %v4963_v30 = vld [vmem:[#allocation2 + $0x118] sm:$0xff]  }
 0x3cd   :  { %v3741_v9 = vpack.c.bf16 %v3478_v1, %v3478_v1  ;;  %v3489_v55 = vrot.slane %v3488_v54, 2  ;;  %v3392_v12 = vmax.f32 %v3328_v10, 0.0  ;;  %v3389_v35 = vmax.f32 %v3325_v26, 0.0  ;;  %4684 = vmatprep.subr.bf16.mxu1 %v4963_v30 }
 0x3ce   :  { %v3700_v61 = vsel %vm3699_vm3, %v3471_v58, %v3698_v15  ;;  %v3481_v13 = vmax.f32 %v3479_v52, %v3480_v36  ;;  %v3390_v4 = vmax.f32 %v3326_v21, 0.0  ;;  %v4636_v22 = vpop.f32.mrb[84].mxu1  ;;  %v3740_v8 = vpack.c.bf16 %v3471_v58, %v3471_v58  ;;  %4685 = vmatpush3.bf16.msra.mxu1 %v4963_v30 }
 0x3cf   :  { %v3490_v28 = vmax.f32 %v3488_v54, %v3489_v55  ;;  %v3702_v51 = vsel %vm3701_vm4, %v3478_v1, %v3700_v61  ;;  %v3500_v53 = vmax.f32 %v3391_v14, %v3392_v12  ;;  %v3062_v34 = vpop.f32.mrb[85].mxu1  ;;  %v6899_v18 = vunpack.c.l.b16 %v3741_v9 }
 0x3d0   :  { %v3482_v37 = vrot.slane %v3481_v13, 2  ;;  %v3493_v31 = vmax.f32 %v3389_v35, %v3390_v4  ;;  %v3263_v19 = vmul.f32 %v4636_v22, %v6842_v62  ;;  %v4637_v11 = vpop.f32.mrb[86].mxu1  ;;  %v3261_v7 = vmul.f32 %v6842_v62, %v3062_v34 }
 0x3d1   :  { %v3491_v43 = vrot.slane %v3490_v28, 1  ;;  %v3501_v5 = vrot.slane %v3500_v53, 4  ;;  %v3264_v33 = vmul.f32 %v4637_v11, %v6842_v62  ;;  %v3065_v47 = vpop.f32.mrb[87].mxu1  ;;  %v6910_v40 = vunpack.c.l.b16 %v3740_v8 }
 0x3d2   :  { %v3483_v38 = vmax.f32 %v3481_v13, %v3482_v37  ;;  %v3494_v3 = vrot.slane %v3493_v31, 4  ;;  %v3331_v48 = vadd.f32 %v6847_v24, %v3263_v19  ;;  %v3262_v20 = vmul.f32 %v6842_v62, %v3065_v47 }
 0x3d3   :  { %v6906_v16 = vmax.f32 %v3490_v28, %v3491_v43  ;;  %v3502_v59 = vmax.f32 %v3500_v53, %v3501_v5  ;;  %v3329_v29 = vadd.f32 %v6847_v24, %v3261_v7  ;;  %v3332_v2 = vadd.f32 %v6847_v24, %v3264_v33 }
 0x3d4   :  { %v3484_v50 = vrot.slane %v3483_v38, 1  ;;  %v3495_v15 = vmax.f32 %v3493_v31, %v3494_v3  ;;  %v3330_v23 = vadd.f32 %v6847_v24, %v3262_v20  ;;  %v3395_v27 = vmax.f32 %v3331_v48, 0.0 }
 0x3d5   :  { %v3503_v17 = vrot.slane %v3502_v59, 2  ;;  %v3393_v32 = vmax.f32 %v3329_v29, 0.0  ;;  %v3396_v42 = vmax.f32 %v3332_v2, 0.0  ;;  %v6917_v56 = vsel %vm3695_vm1, %v3818_v39, %v6879_v60 }
 0x3d6   :  { %v6913_v6 = vmax.f32 %v3483_v38, %v3484_v50  ;;  %v3496_v45 = vrot.slane %v3495_v15, 2  ;;  %v3394_v57 = vmax.f32 %v3330_v23, 0.0  ;;  %v4640_v63 = vpop.f32.mrb[88].mxu1  ;;  %v3743_v54 = vpack.c.bf16 %v6906_v16, %v6906_v16 }
 0x3d7   :  { %v3504_v52 = vmax.f32 %v3502_v59, %v3503_v17  ;;  %v3514_v41 = vmax.f32 %v3395_v27, %v3396_v42  ;;  %v3267_v49 = vmul.f32 %v4640_v63, %v6842_v62  ;;  %v3078_v1 = vpop.f32.mrb[89].mxu1 }
 0x3d8   :  { %v6924_v26 = vsel %vm3703_vm5, %v6913_v6, %v3702_v51  ;;  %v3497_v10 = vmax.f32 %v3495_v15, %v3496_v45  ;;  %v3507_v58 = vmax.f32 %v3393_v32, %v3394_v57  ;;  %v3265_v36 = vmul.f32 %v6842_v62, %v3078_v1  ;;  %v4641_v60 = vpop.f32.mrb[90].mxu1 }
 0x3d9   :  { %v3505_v39 = vrot.slane %v3504_v52, 1  ;;  %v3515_v21 = vrot.slane %v3514_v41, 4  ;;  %v3335_v9 = vadd.f32 %v6847_v24, %v3267_v49  ;;  %v3268_v55 = vmul.f32 %v4641_v60, %v6842_v62  ;;  %v3081_v14 = vpop.f32.mrb[91].mxu1 }
 0x3da   :  { %v3498_v12 = vrot.slane %v3497_v10, 1  ;;  %v3508_v61 = vrot.slane %v3507_v58, 4  ;;  %v3333_v13 = vadd.f32 %v6847_v24, %v3265_v36  ;;  %v3266_v35 = vmul.f32 %v6842_v62, %v3081_v14 }
 0x3db   :  { %v3506_v4 = vmax.f32 %v3504_v52, %v3505_v39  ;;  %v3516_v22 = vmax.f32 %v3514_v41, %v3515_v21  ;;  %v3399_v8 = vmax.f32 %v3335_v9, 0.0  ;;  %v3336_v28 = vadd.f32 %v6847_v24, %v3268_v55  ;;  %v4964_v52 = vld [vmem:[#allocation2 + $0x120] sm:$0xff]  }
 0x3dc   :  { %v3499_v51 = vmax.f32 %v3497_v10, %v3498_v12  ;;  %v3509_v53 = vmax.f32 %v3507_v58, %v3508_v61  ;;  %v3397_v34 = vmax.f32 %v3333_v13, 0.0  ;;  %v3334_v37 = vadd.f32 %v6847_v24, %v3266_v35  ;;  %4686 = vmatprep.subr.bf16.mxu1 %v4964_v52 }
 0x3dd   :  { %v3745_v31 = vpack.c.bf16 %v3506_v4, %v3506_v4  ;;  %v3517_v19 = vrot.slane %v3516_v22, 2  ;;  %v3400_v11 = vmax.f32 %v3336_v28, 0.0  ;;  %v3742_v43 = vpack.c.bf16 %v6913_v6, %v6913_v6  ;;  %4687 = vmatpush3.bf16.msra.mxu1 %v4964_v52 }
 0x3de   :  { %v3707_v5 = vsel %vm3693_vm0, %v3506_v4, %v3499_v51  ;;  %v3744_v7 = vpack.c.bf16 %v3499_v51, %v3499_v51  ;;  %v3510_v33 = vrot.slane %v3509_v53, 2  ;;  %v3398_v47 = vmax.f32 %v3334_v37, 0.0  ;;  %v4644_v38 = vpop.f32.mrb[92].mxu1 }
 0x3df   :  { %v3825_v3 = vunpack.c.l.b16 %v3745_v31  ;;  %v3518_v48 = vmax.f32 %v3516_v22, %v3517_v19  ;;  %v3528_v20 = vmax.f32 %v3399_v8, %v3400_v11  ;;  %v3271_v59 = vmul.f32 %v4644_v38, %v6842_v62  ;;  %v3094_v29 = vpop.f32.mrb[93].mxu1 }
 0x3e0   :  { %v3824_v2 = vunpack.c.l.b16 %v3744_v7  ;;  %v3511_v50 = vmax.f32 %v3509_v53, %v3510_v33  ;;  %v3521_v15 = vmax.f32 %v3397_v34, %v3398_v47  ;;  %v3269_v23 = vmul.f32 %v6842_v62, %v3094_v29  ;;  %v4645_v0 = vpop.f32.mrb[94].mxu1 }
 0x3e1   :  { %v3519_v30 = vrot.slane %v3518_v48, 1  ;;  %v3529_v17 = vrot.slane %v3528_v20, 4  ;;  %v3339_v27 = vadd.f32 %v6847_v24, %v3271_v59  ;;  %v3272_v32 = vmul.f32 %v4645_v0, %v6842_v62  ;;  %v3097_v42 = vpop.f32.mrb[95].mxu1 }
 0x3e2   :  { %v6941_v6 = vsel %vm3693_vm0, %v3825_v3, %v3824_v2  ;;  %v3512_v45 = vrot.slane %v3511_v50, 1  ;;  %v3522_v57 = vrot.slane %v3521_v15, 4  ;;  %v3337_v63 = vadd.f32 %v6847_v24, %v3269_v23 }
 0x3e3   :  { %v3520_v41 = vmax.f32 %v3518_v48, %v3519_v30  ;;  %v3530_v49 = vmax.f32 %v3528_v20, %v3529_v17  ;;  %v3340_v1 = vadd.f32 %v6847_v24, %v3272_v32  ;;  %v6945_v10 = vunpack.c.l.b16 %v3743_v54 }
 0x3e4   :  { %v3513_v58 = vmax.f32 %v3511_v50, %v3512_v45  ;;  %v3523_v36 = vmax.f32 %v3521_v15, %v3522_v57  ;;  %v3403_v60 = vmax.f32 %v3339_v27, 0.0  ;;  %v3270_v39 = vmul.f32 %v6842_v62, %v3097_v42 }
 0x3e5   :  { %v3747_v21 = vpack.c.bf16 %v3520_v41, %v3520_v41  ;;  %v3531_v9 = vrot.slane %v3530_v49, 2  ;;  %v3401_v55 = vmax.f32 %v3337_v63, 0.0  ;;  %v3404_v14 = vmax.f32 %v3340_v1, 0.0 }
 0x3e6   :  { %v3708_v12 = vsel %vm3695_vm1, %v3513_v58, %v3707_v5  ;;  %v3524_v61 = vrot.slane %v3523_v36, 2  ;;  %v3338_v13 = vadd.f32 %v6847_v24, %v3270_v39  ;;  %v4648_v35 = vpop.f32.mrb[96].mxu1  ;;  %v6950_v4 = vunpack.c.l.b16 %v3742_v43 }
 0x3e7   :  { %v3746_v54 = vpack.c.bf16 %v3513_v58, %v3513_v58  ;;  %v3532_v22 = vmax.f32 %v3530_v49, %v3531_v9  ;;  %v3709_v8 = vsel %vm3697_vm2, %v3520_v41, %v3708_v12  ;;  %v3542_v28 = vmax.f32 %v3403_v60, %v3404_v14  ;;  %v3110_v51 = vpop.f32.mrb[97].mxu1 }
 0x3e8   :  { %v6953_v53 = vunpack.c.l.b16 %v3747_v21  ;;  %v3525_v34 = vmax.f32 %v3523_v36, %v3524_v61  ;;  %v3402_v37 = vmax.f32 %v3338_v13, 0.0  ;;  %v3275_v31 = vmul.f32 %v4648_v35, %v6842_v62  ;;  %v4649_v19 = vpop.f32.mrb[98].mxu1 }
 0x3e9   :  { %v3533_v11 = vrot.slane %v3532_v22, 1  ;;  %v3543_v5 = vrot.slane %v3542_v28, 4  ;;  %v3273_v7 = vmul.f32 %v6842_v62, %v3110_v51  ;;  %v3276_v43 = vmul.f32 %v4649_v19, %v6842_v62  ;;  %v3113_v33 = vpop.f32.mrb[99].mxu1 }
 0x3ea   :  { %v3526_v47 = vrot.slane %v3525_v34, 1  ;;  %v3535_v38 = vmax.f32 %v3401_v55, %v3402_v37  ;;  %v3343_v3 = vadd.f32 %v6847_v24, %v3275_v31  ;;  %v3274_v48 = vmul.f32 %v6842_v62, %v3113_v33 }
 0x3eb   :  { %v3534_v20 = vmax.f32 %v3532_v22, %v3533_v11  ;;  %v3544_v59 = vmax.f32 %v3542_v28, %v3543_v5  ;;  %v3341_v29 = vadd.f32 %v6847_v24, %v3273_v7  ;;  %v3344_v2 = vadd.f32 %v6847_v24, %v3276_v43 }
 0x3ec   :  { %v6962_v50 = vunpack.c.l.b16 %v3746_v54  ;;  %v3527_v15 = vmax.f32 %v3525_v34, %v3526_v47  ;;  %v3536_v23 = vrot.slane %v3535_v38, 4  ;;  %v3342_v0 = vadd.f32 %v6847_v24, %v3274_v48 }
 0x3ed   :  { %v3749_v30 = vpack.c.bf16 %v3534_v20, %v3534_v20  ;;  %v3545_v17 = vrot.slane %v3544_v59, 2  ;;  %v3407_v27 = vmax.f32 %v3343_v3, 0.0  ;;  %v3408_v32 = vmax.f32 %v3344_v2, 0.0 }
 0x3ee   :  { %v3710_v42 = vsel %vm3699_vm3, %v3527_v15, %v3709_v8  ;;  %v3537_v45 = vmax.f32 %v3535_v38, %v3536_v23  ;;  %v3405_v57 = vmax.f32 %v3341_v29, 0.0  ;;  %v3406_v63 = vmax.f32 %v3342_v0, 0.0  ;;  %v4652_v52 = vpop.f32.mrb[100].mxu1 }
 0x3ef   :  { %v3748_v41 = vpack.c.bf16 %v3527_v15, %v3527_v15  ;;  %v3546_v49 = vmax.f32 %v3544_v59, %v3545_v17  ;;  %v3711_v1 = vsel %vm3701_vm4, %v3534_v20, %v3710_v42  ;;  %v3556_v58 = vmax.f32 %v3407_v27, %v3408_v32  ;;  %v3126_v36 = vpop.f32.mrb[101].mxu1 }
 0x3f0   :  { %v6967_v60 = vunpack.c.l.b16 %v3749_v30  ;;  %v3538_v39 = vrot.slane %v3537_v45, 2  ;;  %v3549_v21 = vmax.f32 %v3405_v57, %v3406_v63  ;;  %v3279_v9 = vmul.f32 %v4652_v52, %v6842_v62  ;;  %v4653_v55 = vpop.f32.mrb[102].mxu1 }
 0x3f1   :  { %v3547_v14 = vrot.slane %v3546_v49, 1  ;;  %v3557_v12 = vrot.slane %v3556_v58, 4  ;;  %v3277_v61 = vmul.f32 %v6842_v62, %v3126_v36  ;;  %v3280_v13 = vmul.f32 %v4653_v55, %v6842_v62  ;;  %v3129_v35 = vpop.f32.mrb[103].mxu1 }
 0x3f2   :  { %v3539_v54 = vmax.f32 %v3537_v45, %v3538_v39  ;;  %v3550_v22 = vrot.slane %v3549_v21, 4  ;;  %v3347_v8 = vadd.f32 %v6847_v24, %v3279_v9  ;;  %v3278_v28 = vmul.f32 %v6842_v62, %v3129_v35 }
 0x3f3   :  { %v6974_v51 = vmax.f32 %v3546_v49, %v3547_v14  ;;  %v3558_v34 = vmax.f32 %v3556_v58, %v3557_v12  ;;  %v3345_v37 = vadd.f32 %v6847_v24, %v3277_v61  ;;  %v3348_v31 = vadd.f32 %v6847_v24, %v3280_v13  ;;  %v4966_v49 = vld [vmem:[#allocation2 + $0x130] sm:$0xff]   ;;  %v4967_v58 = vld [vmem:[#allocation2 + $0x140] sm:$0xff]  }
 0x3f4   :  { %v6978_v19 = vunpack.c.l.b16 %v3748_v41  ;;  %v3540_v11 = vrot.slane %v3539_v54, 1  ;;  %v3551_v5 = vmax.f32 %v3549_v21, %v3550_v22  ;;  %v3346_v7 = vadd.f32 %v6847_v24, %v3278_v28  ;;  %v4965_v41 = vld [vmem:[#allocation2 + $0x128] sm:$0xff]   ;;  %4698 = vmatprep.subr.bf16.mxu0 %v4967_v58 }
 0x3f5   :  { %v3559_v43 = vrot.slane %v3558_v34, 2  ;;  %v3411_v33 = vmax.f32 %v3347_v8, 0.0  ;;  %v3409_v47 = vmax.f32 %v3345_v37, 0.0  ;;  %v3412_v38 = vmax.f32 %v3348_v31, 0.0  ;;  %4688 = vmatprep.subr.bf16.mxu1 %v4965_v41  ;;  %4699 = vmatpush3.bf16.msra.mxu0 %v4967_v58 }
 0x3f6   :  { %v6981_v3 = vmax.f32 %v3539_v54, %v3540_v11  ;;  %v3552_v48 = vrot.slane %v3551_v5, 2  ;;  %v3410_v20 = vmax.f32 %v3346_v7, 0.0  ;;  %v4656_v59 = vpop.f32.mrb[104].mxu1  ;;  %v3850_v29 = vsel %vm3697_vm2, %v6887_v46, %v6917_v56  ;;  %4689 = vmatpush3.bf16.msra.mxu1 %v4965_v41 }
 0x3f7   :  { %v3560_v2 = vmax.f32 %v3558_v34, %v3559_v43  ;;  %v3570_v15 = vmax.f32 %v3411_v33, %v3412_v38  ;;  %v3283_v23 = vmul.f32 %v4656_v59, %v6842_v62  ;;  %v3142_v0 = vpop.f32.mrb[105].mxu1  ;;  %v3751_v30 = vpack.c.bf16 %v6974_v51, %v6974_v51  ;;  %4690 = vmatprep.subr.bf16.mxu1 %v4966_v49 }
 0x3f8   :  { %v6991_v17 = vsel %vm3703_vm5, %v6981_v3, %v3711_v1  ;;  %v3553_v27 = vmax.f32 %v3551_v5, %v3552_v48  ;;  %v3563_v32 = vmax.f32 %v3409_v47, %v3410_v20  ;;  %v3281_v42 = vmul.f32 %v6842_v62, %v3142_v0  ;;  %v4657_v45 = vpop.f32.mrb[106].mxu1 }
 0x3f9   :  { %v3561_v57 = vrot.slane %v3560_v2, 1  ;;  %v3571_v63 = vrot.slane %v3570_v15, 4  ;;  %v3351_v46 = vadd.f32 %v6847_v24, %v3283_v23  ;;  %v3284_v56 = vmul.f32 %v4657_v45, %v6842_v62  ;;  %v3145_v52 = vpop.f32.mrb[107].mxu1 }
 0x3fa   :  { %v3554_v36 = vrot.slane %v3553_v27, 1  ;;  %v3564_v39 = vrot.slane %v3563_v32, 4  ;;  %v3349_v1 = vadd.f32 %v6847_v24, %v3281_v42  ;;  %v3282_v21 = vmul.f32 %v6842_v62, %v3145_v52  ;;  %4691 = vmatpush3.bf16.msra.mxu1 %v4966_v49 }
 0x3fb   :  { %v3562_v9 = vmax.f32 %v3560_v2, %v3561_v57  ;;  %v3572_v55 = vmax.f32 %v3570_v15, %v3571_v63  ;;  %v3415_v14 = vmax.f32 %v3351_v46, 0.0  ;;  %v3352_v12 = vadd.f32 %v6847_v24, %v3284_v56 }
 0x3fc   :  { %v3555_v61 = vmax.f32 %v3553_v27, %v3554_v36  ;;  %v3565_v13 = vmax.f32 %v3563_v32, %v3564_v39  ;;  %v3413_v35 = vmax.f32 %v3349_v1, 0.0  ;;  %v3350_v54 = vadd.f32 %v6847_v24, %v3282_v21 }
 0x3fd   :  { %v3753_v22 = vpack.c.bf16 %v3562_v9, %v3562_v9  ;;  %v3573_v8 = vrot.slane %v3572_v55, 2  ;;  %v3416_v28 = vmax.f32 %v3352_v12, 0.0  ;;  %v3750_v34 = vpack.c.bf16 %v6981_v3, %v6981_v3 }
 0x3fe   :  { %v3714_v37 = vsel %vm3693_vm0, %v3562_v9, %v3555_v61  ;;  %v3752_v31 = vpack.c.bf16 %v3555_v61, %v3555_v61  ;;  %v3566_v11 = vrot.slane %v3565_v13, 2  ;;  %v3414_v5 = vmax.f32 %v3350_v54, 0.0  ;;  %v4660_v7 = vpop.f32.mrb[108].mxu1 }
 0x3ff   :  { %v3833_v43 = vunpack.c.l.b16 %v3753_v22  ;;  %v3574_v33 = vmax.f32 %v3572_v55, %v3573_v8  ;;  %v3584_v47 = vmax.f32 %v3415_v14, %v3416_v28  ;;  %v3287_v38 = vmul.f32 %v4660_v7, %v6842_v62  ;;  %v3158_v48 = vpop.f32.mrb[109].mxu1 }
 0x400   :  { %v3832_v20 = vunpack.c.l.b16 %v3752_v31  ;;  %v3567_v59 = vmax.f32 %v3565_v13, %v3566_v11  ;;  %v3577_v2 = vmax.f32 %v3413_v35, %v3414_v5  ;;  %v3831_v15 = vunpack.c.l.b16 %v3751_v30  ;;  %v4661_v23 = vpop.f32.mrb[110].mxu1 }
 0x401   :  { %v3575_v3 = vrot.slane %v3574_v33, 1  ;;  %v3585_v0 = vrot.slane %v3584_v47, 4  ;;  %v3830_v27 = vunpack.c.l.b16 %v3750_v34  ;;  %v3851_v32 = vsel %vm3699_vm3, %v6910_v40, %v3850_v29  ;;  %v3161_v42 = vpop.f32.mrb[111].mxu1 }
 0x402   :  { %v3862_v45 = vsel %vm3693_vm0, %v3833_v43, %v3832_v20  ;;  %v3568_v57 = vrot.slane %v3567_v59, 1  ;;  %v3578_v63 = vrot.slane %v3577_v2, 4  ;;  %v3852_v46 = vsel %vm3701_vm4, %v6899_v18, %v3851_v32 }
 0x403   :  { %v3576_v56 = vmax.f32 %v3574_v33, %v3575_v3  ;;  %v3586_v52 = vmax.f32 %v3584_v47, %v3585_v0  ;;  %v3355_v30 = vadd.f32 %v6847_v24, %v3287_v38  ;;  %v3853_v41 = vsel %vm3703_vm5, %v6950_v4, %v3852_v46 }
 0x404   :  { %v3569_v49 = vmax.f32 %v3567_v59, %v3568_v57  ;;  %v3579_v58 = vmax.f32 %v3577_v2, %v3578_v63  ;;  %v3854_v40 = vsel %vm3705_vm6, %v6945_v10, %v3853_v41  ;;  %v3856_v29 = vsel %vm3695_vm1, %v6962_v50, %v6941_v6  ;;  %v4968_v41 = vld [vmem:[#allocation2 + $0x138] sm:$0xff]  }
 0x405   :  { %v3755_v36 = vpack.c.bf16 %v3576_v56, %v3576_v56  ;;  %v3587_v39 = vrot.slane %v3586_v52, 2  ;;  %v3857_v18 = vsel %vm3697_vm2, %v6953_v53, %v3856_v29  ;;  %v3285_v1 = vmul.f32 %v6842_v62, %v3158_v48  ;;  %4692 = vmatprep.subr.bf16.mxu1 %v4968_v41 }
 0x406   :  { %v3715_v21 = vsel %vm3695_vm1, %v3569_v49, %v3714_v37  ;;  %v3754_v9 = vpack.c.bf16 %v3569_v49, %v3569_v49  ;;  %v3580_v4 = vrot.slane %v3579_v58, 2  ;;  %v3858_v55 = vsel %vm3699_vm3, %v6978_v19, %v3857_v18  ;;  %v4969_v49 = vld [vmem:[#allocation2 + $0x148] sm:$0xff]   ;;  %4693 = vmatpush3.bf16.msra.mxu1 %v4968_v41 }
 0x407   :  { %v3835_v14 = vunpack.c.l.b16 %v3755_v36  ;;  %v3588_v10 = vmax.f32 %v3586_v52, %v3587_v39  ;;  %v3716_v12 = vsel %vm3697_vm2, %v3576_v56, %v3715_v21  ;;  %v3859_v6 = vsel %vm3701_vm4, %v6967_v60, %v3858_v55  ;;  %4700 = vmatprep.subr.bf16.mxu0 %v4969_v49 }
 0x408   :  { %v3834_v50 = vunpack.c.l.b16 %v3754_v9  ;;  %v3581_v61 = vmax.f32 %v3579_v58, %v3580_v4  ;;  %v3860_v53 = vsel %vm3703_vm5, %v3830_v27, %v3859_v6  ;;  %v3353_v13 = vadd.f32 %v6847_v24, %v3285_v1  ;;  %4701 = vmatpush3.bf16.msra.mxu0 %v4969_v49 }
 0x409   :  { %v3589_v35 = vrot.slane %v3588_v10, 1  ;;  %v3861_v54 = vsel %vm3705_vm6, %v3831_v15, %v3860_v53  ;;  %v3288_v22 = vmul.f32 %v4661_v23, %v6842_v62  ;;  %v3286_v19 = vmul.f32 %v6842_v62, %v3161_v42 }
 0x40a   :  { %v3863_v8 = vsel %vm3695_vm1, %v3834_v50, %v3862_v45  ;;  %v3582_v28 = vrot.slane %v3581_v61, 1  ;;  %v3876_v34 = vpack.c.b16 %v3861_v54, %v3854_v40  ;;  %v3419_v7 = vmax.f32 %v3355_v30, 0.0 }
 0x40b   :  { %v3590_v37 = vmax.f32 %v3588_v10, %v3589_v35  ;;  %v3864_v60 = vsel %vm3697_vm2, %v3835_v14, %v3863_v8  ;;  %v3356_v31 = vadd.f32 %v6847_v24, %v3288_v22  ;;  %v3354_v11 = vadd.f32 %v6847_v24, %v3286_v19  ;;  %v4971_v35 = vld [vmem:[#allocation2 + $0x158] sm:$0xff]  }
 0x40c   :  { %v3583_v5 = vmax.f32 %v3581_v61, %v3582_v28  ;;  %4694 = vmatprep.mubr.bf16.mxu1 %v3876_v34  ;;  %v3706_v43 = vsel %vm3705_vm6, %v6906_v16, %v6924_v26  ;;  %v3713_v33 = vsel %vm3705_vm6, %v6974_v51, %v6991_v17  ;;  %v3417_v38 = vmax.f32 %v3353_v13, 0.0  ;;  %v4970_v13 = vld [vmem:[#allocation2 + $0x150] sm:$0xff]  }
 0x40d   :  { %v3757_v47 = vpack.c.bf16 %v3590_v37, %v3590_v37  ;;  %v3420_v48 = vmax.f32 %v3356_v31, 0.0  ;;  %v3418_v20 = vmax.f32 %v3354_v11, 0.0  ;;  %3732 = vst [vmem:[#allocation5] sm:$0xff] %v3706_v43  ;;  %3733 = vst [vmem:[#allocation5 + $0x8] sm:$0xff] %v3713_v33  ;;  %4702 = vmatprep.subr.bf16.mxu0 %v4970_v13 }
 0x40e   :  { %v3717_v59 = vsel %vm3699_vm3, %v3583_v5, %v3716_v12  ;;  %v3756_v2 = vpack.c.bf16 %v3583_v5, %v3583_v5  ;;  %4703 = vmatpush3.bf16.msra.mxu0 %v4970_v13  ;;  %v4972_v5 = vld [vmem:[#allocation2 + $0x160] sm:$0xff]  }
 0x40f   :  { %v3598_v15 = vmax.f32 %v3419_v7, %v3420_v48  ;;  %v3591_v23 = vmax.f32 %v3417_v38, %v3418_v20  ;;  %v3718_v3 = vsel %vm3701_vm4, %v3590_v37, %v3717_v59  ;;  %v3837_v27 = vunpack.c.l.b16 %v3757_v47  ;;  %4704 = vmatprep.subr.bf16.mxu0 %v4971_v35  ;;  %v4973_v38 = vld [vmem:[#allocation2 + $0x168] sm:$0xff]  }
 0x410   :  { %v3836_v0 = vunpack.c.l.b16 %v3756_v2 }
 0x411   :  { %v3599_v16 = vrot.slane %v3598_v15, 4  ;;  %v3592_v26 = vrot.slane %v3591_v23, 4 }
 0x412   :  { %v3865_v32 = vsel %vm3699_vm3, %v3836_v0, %v3864_v60  ;;  %4705 = vmatpush3.bf16.msra.mxu0 %v4971_v35 }
 0x413   :  { %v3600_v51 = vmax.f32 %v3598_v15, %v3599_v16  ;;  %v3593_v17 = vmax.f32 %v3591_v23, %v3592_v26  ;;  %v3866_v42 = vsel %vm3701_vm4, %v3837_v27, %v3865_v32  ;;  %4706 = vmatprep.subr.bf16.mxu0 %v4972_v5  ;;  %v4974_v15 = vld [vmem:[#allocation2 + $0x170] sm:$0xff]   ;;  %v4975_v16 = vld [vmem:[#allocation2 + $0x178] sm:$0xff]  }
 0x415   :  { %v3601_v45 = vrot.slane %v3600_v51, 2  ;;  %v3594_v57 = vrot.slane %v3593_v17, 2 }
 0x416   :  { %4707 = vmatpush3.bf16.msra.mxu0 %v4972_v5 }
 0x417   :  { %v3602_v63 = vmax.f32 %v3600_v51, %v3601_v45  ;;  %v3595_v46 = vmax.f32 %v3593_v17, %v3594_v57  ;;  %v4664_v56 = vpop.f32.mrb[112].mxu1  ;;  %4708 = vmatprep.subr.bf16.mxu0 %v4973_v38 }
 0x418   :  { %v3291_v52 = vmul.f32 %v4664_v56, %v6842_v62  ;;  %v3174_v30 = vpop.f32.mrb[113].mxu1 }
 0x419   :  { %v3603_v58 = vrot.slane %v3602_v63, 1  ;;  %v3596_v40 = vrot.slane %v3595_v46, 1  ;;  %v3289_v29 = vmul.f32 %v6842_v62, %v3174_v30  ;;  %v4665_v36 = vpop.f32.mrb[114].mxu1 }
 0x41a   :  { %v3359_v39 = vadd.f32 %v6847_v24, %v3291_v52  ;;  %v3292_v18 = vmul.f32 %v4665_v36, %v6842_v62  ;;  %v3177_v1 = vpop.f32.mrb[115].mxu1  ;;  %4709 = vmatpush3.bf16.msra.mxu0 %v4973_v38 }
 0x41b   :  { %v3604_v21 = vmax.f32 %v3602_v63, %v3603_v58  ;;  %v3597_v9 = vmax.f32 %v3595_v46, %v3596_v40  ;;  %v3290_v4 = vmul.f32 %v6842_v62, %v3177_v1  ;;  %v3357_v55 = vadd.f32 %v6847_v24, %v3289_v29  ;;  %4710 = vmatprep.subr.bf16.mxu0 %v4974_v15 }
 0x41c   :  { %v3360_v14 = vadd.f32 %v6847_v24, %v3292_v18  ;;  %v3423_v50 = vmax.f32 %v3359_v39, 0.0 }
 0x41d   :  { %v3759_v10 = vpack.c.bf16 %v3604_v21, %v3604_v21  ;;  %v3719_v12 = vsel %vm3703_vm5, %v3597_v9, %v3718_v3  ;;  %v3758_v6 = vpack.c.bf16 %v3597_v9, %v3597_v9  ;;  %v3358_v53 = vadd.f32 %v6847_v24, %v3290_v4 }
 0x41e   :  { %v3424_v61 = vmax.f32 %v3360_v14, 0.0  ;;  %v3720_v54 = vsel %vm3705_vm6, %v3604_v21, %v3719_v12  ;;  %v3421_v8 = vmax.f32 %v3357_v55, 0.0  ;;  %4711 = vmatpush3.bf16.msra.mxu0 %v4974_v15 }
 0x41f   :  { %v3838_v22 = vunpack.c.l.b16 %v3758_v6  ;;  %3734 = vst [vmem:[#allocation5 + $0x10] sm:$0xff] %v3720_v54  ;;  %v3839_v19 = vunpack.c.l.b16 %v3759_v10  ;;  %v3422_v34 = vmax.f32 %v3358_v53, 0.0  ;;  %4712 = vmatprep.subr.bf16.mxu0 %v4975_v16 }
 0x420   :  { %v3612_v28 = vmax.f32 %v3423_v50, %v3424_v61 }
 0x421   :  { %v3867_v37 = vsel %vm3703_vm5, %v3838_v22, %v3866_v42  ;;  %v3605_v31 = vmax.f32 %v3421_v8, %v3422_v34 }
 0x422   :  { %v3613_v60 = vrot.slane %v3612_v28, 4  ;;  %v7057_v11 = vsel %vm3705_vm6, %v3839_v19, %v3867_v37  ;;  %4713 = vmatpush3.bf16.msra.mxu0 %v4975_v16 }
 0x423   :  { %v3606_v43 = vrot.slane %v3605_v31, 4 }
 0x424   :  { %v3614_v7 = vmax.f32 %v3612_v28, %v3613_v60 }
 0x425   :  { %v3607_v47 = vmax.f32 %v3605_v31, %v3606_v43 }
 0x426   :  { %v3615_v33 = vrot.slane %v3614_v7, 2 }
 0x427   :  { %v3608_v20 = vrot.slane %v3607_v47, 2 }
 0x428   :  { %v3616_v48 = vmax.f32 %v3614_v7, %v3615_v33 }
 0x429   :  { %v3609_v2 = vmax.f32 %v3607_v47, %v3608_v20 }
 0x42a   :  { %v3617_v59 = vrot.slane %v3616_v48, 1 }
 0x42b   :  { %v3610_v3 = vrot.slane %v3609_v2, 1 }
 0x42c   :  { %v3618_v23 = vmax.f32 %v3616_v48, %v3617_v59 }
 0x42d   :  { %v3611_v27 = vmax.f32 %v3609_v2, %v3610_v3 }
 0x42e   :  { %v3761_v0 = vpack.c.bf16 %v3618_v23, %v3618_v23 }
 0x42f   :  { %v3721_v32 = vsel %vm3693_vm0, %v3618_v23, %v3611_v27  ;;  %v3760_v51 = vpack.c.bf16 %v3611_v27, %v3611_v27 }
 0x430   :  { %v3841_v26 = vunpack.c.l.b16 %v3761_v0 }
 0x431   :  { %v3840_v17 = vunpack.c.l.b16 %v3760_v51 }
 0x433   :  { %v3869_v42 = vsel %vm3693_vm0, %v3841_v26, %v3840_v17 }
 0x438   :  { %v4668_v45 = vpop.f32.mrb[116].mxu1 }
 0x439   :  { %v3295_v57 = vmul.f32 %v4668_v45, %v6842_v62  ;;  %v3190_v63 = vpop.f32.mrb[117].mxu1 }
 0x43a   :  { %v3293_v46 = vmul.f32 %v6842_v62, %v3190_v63  ;;  %v4669_v56 = vpop.f32.mrb[118].mxu1 }
 0x43b   :  { %v3363_v52 = vadd.f32 %v6847_v24, %v3295_v57  ;;  %v3296_v30 = vmul.f32 %v4669_v56, %v6842_v62  ;;  %v3193_v41 = vpop.f32.mrb[119].mxu1 }
 0x43c   :  { %v3361_v49 = vadd.f32 %v6847_v24, %v3293_v46  ;;  %v3294_v58 = vmul.f32 %v6842_v62, %v3193_v41 }
 0x43d   :  { %v3364_v40 = vadd.f32 %v6847_v24, %v3296_v30  ;;  %v3427_v36 = vmax.f32 %v3363_v52, 0.0 }
 0x43e   :  { %v3362_v29 = vadd.f32 %v6847_v24, %v3294_v58  ;;  %v3425_v18 = vmax.f32 %v3361_v49, 0.0 }
 0x43f   :  { %v3428_v39 = vmax.f32 %v3364_v40, 0.0 }
 0x440   :  { %v3426_v1 = vmax.f32 %v3362_v29, 0.0 }
 0x441   :  { %v3626_v21 = vmax.f32 %v3427_v36, %v3428_v39 }
 0x442   :  { %v3619_v9 = vmax.f32 %v3425_v18, %v3426_v1 }
 0x443   :  { %v3627_v4 = vrot.slane %v3626_v21, 4 }
 0x444   :  { %v3620_v55 = vrot.slane %v3619_v9, 4 }
 0x445   :  { %v3628_v14 = vmax.f32 %v3626_v21, %v3627_v4 }
 0x446   :  { %v3621_v10 = vmax.f32 %v3619_v9, %v3620_v55 }
 0x447   :  { %v3629_v12 = vrot.slane %v3628_v14, 2 }
 0x448   :  { %v3622_v6 = vrot.slane %v3621_v10, 2 }
 0x449   :  { %v3630_v50 = vmax.f32 %v3628_v14, %v3629_v12 }
 0x44a   :  { %v3623_v61 = vmax.f32 %v3621_v10, %v3622_v6 }
 0x44b   :  { %v3631_v53 = vrot.slane %v3630_v50, 1 }
 0x44c   :  { %v3624_v13 = vrot.slane %v3623_v61, 1 }
 0x44d   :  { %v3632_v35 = vmax.f32 %v3630_v50, %v3631_v53 }
 0x44e   :  { %v3625_v54 = vmax.f32 %v3623_v61, %v3624_v13 }
 0x44f   :  { %v3763_v22 = vpack.c.bf16 %v3632_v35, %v3632_v35 }
 0x450   :  { %v3722_v19 = vsel %vm3695_vm1, %v3625_v54, %v3721_v32  ;;  %v3762_v8 = vpack.c.bf16 %v3625_v54, %v3625_v54 }
 0x451   :  { %v3723_v28 = vsel %vm3697_vm2, %v3632_v35, %v3722_v19  ;;  %v3843_v37 = vunpack.c.l.b16 %v3763_v22 }
 0x452   :  { %v3842_v34 = vunpack.c.l.b16 %v3762_v8 }
 0x454   :  { %v3870_v60 = vsel %vm3695_vm1, %v3842_v34, %v3869_v42 }
 0x455   :  { %v3871_v31 = vsel %vm3697_vm2, %v3843_v37, %v3870_v60 }
 0x45d   :  { %v4672_v5 = vpop.f32.mrb[120].mxu1 }
 0x45e   :  { %v3299_v7 = vmul.f32 %v4672_v5, %v6842_v62  ;;  %v3206_v43 = vpop.f32.mrb[121].mxu1 }
 0x45f   :  { %v3297_v33 = vmul.f32 %v6842_v62, %v3206_v43  ;;  %v4673_v47 = vpop.f32.mrb[122].mxu1 }
 0x460   :  { %v3367_v38 = vadd.f32 %v6847_v24, %v3299_v7  ;;  %v3300_v48 = vmul.f32 %v4673_v47, %v6842_v62  ;;  %v3209_v20 = vpop.f32.mrb[123].mxu1 }
 0x461   :  { %v3365_v59 = vadd.f32 %v6847_v24, %v3297_v33  ;;  %v3298_v2 = vmul.f32 %v6842_v62, %v3209_v20 }
 0x462   :  { %v3368_v15 = vadd.f32 %v6847_v24, %v3300_v48  ;;  %v3431_v3 = vmax.f32 %v3367_v38, 0.0 }
 0x463   :  { %v3366_v23 = vadd.f32 %v6847_v24, %v3298_v2  ;;  %v3429_v27 = vmax.f32 %v3365_v59, 0.0 }
 0x464   :  { %v3432_v0 = vmax.f32 %v3368_v15, 0.0 }
 0x465   :  { %v3430_v16 = vmax.f32 %v3366_v23, 0.0 }
 0x466   :  { %v3640_v26 = vmax.f32 %v3431_v3, %v3432_v0 }
 0x467   :  { %v3633_v32 = vmax.f32 %v3429_v27, %v3430_v16 }
 0x468   :  { %v3641_v51 = vrot.slane %v3640_v26, 4 }
 0x469   :  { %v3634_v17 = vrot.slane %v3633_v32, 4 }
 0x46a   :  { %v3642_v42 = vmax.f32 %v3640_v26, %v3641_v51  ;;  %v4976_v26 = vld [vmem:[#allocation2 + $0x180] sm:$0xff]   ;;  %v4978_v51 = vld [vmem:[#allocation2 + $0x190] sm:$0xff]  }
 0x46b   :  { %v3635_v45 = vmax.f32 %v3633_v32, %v3634_v17  ;;  %v4977_v32 = vld [vmem:[#allocation2 + $0x188] sm:$0xff]   ;;  %4718 = vmatprep.subr.bf16.mxu1 %v4976_v26  ;;  %v4979_v17 = vld [vmem:[#allocation2 + $0x198] sm:$0xff]  }
 0x46c   :  { %v3643_v57 = vrot.slane %v3642_v42, 2 }
 0x46d   :  { %v3636_v63 = vrot.slane %v3635_v45, 2 }
 0x46e   :  { %v3644_v46 = vmax.f32 %v3642_v42, %v3643_v57  ;;  %v4980_v42 = vld [vmem:[#allocation2 + $0x1a0] sm:$0xff]  }
 0x46f   :  { %v3637_v56 = vmax.f32 %v3635_v45, %v3636_v63  ;;  %v7247_v45 = vsub.s32 1, %v5794_v25  ;;  %v7248_v63 = vsub.s32 2, %v5794_v25 }
 0x470   :  { %v3645_v52 = vrot.slane %v3644_v46, 1 }
 0x471   :  { %v3638_v30 = vrot.slane %v3637_v56, 1 }
 0x472   :  { %v3646_v41 = vmax.f32 %v3644_v46, %v3645_v52 }
 0x473   :  { %v3639_v49 = vmax.f32 %v3637_v56, %v3638_v30 }
 0x474   :  { %v3765_v58 = vpack.c.bf16 %v3646_v41, %v3646_v41 }
 0x475   :  { %v3724_v40 = vsel %vm3699_vm3, %v3639_v49, %v3723_v28  ;;  %v3764_v29 = vpack.c.bf16 %v3639_v49, %v3639_v49 }
 0x476   :  { %v3725_v36 = vsel %vm3701_vm4, %v3646_v41, %v3724_v40  ;;  %v3845_v18 = vunpack.c.l.b16 %v3765_v58 }
 0x477   :  { %v3844_v39 = vunpack.c.l.b16 %v3764_v29 }
 0x479   :  { %v3872_v1 = vsel %vm3699_vm3, %v3844_v39, %v3871_v31 }
 0x47a   :  { %v3873_v21 = vsel %vm3701_vm4, %v3845_v18, %v3872_v1 }
 0x47e   :  { %v4676_v9 = vpop.f32.mrb[124].mxu1 }
 0x47f   :  { %v3303_v4 = vmul.f32 %v4676_v9, %v6842_v62  ;;  %v3222_v55 = vpop.f32.mrb[125].mxu1 }
 0x480   :  { %v3301_v14 = vmul.f32 %v6842_v62, %v3222_v55  ;;  %v4677_v10 = vpop.f32.mrb[126].mxu1 }
 0x481   :  { %v3371_v12 = vadd.f32 %v6847_v24, %v3303_v4  ;;  %v3304_v6 = vmul.f32 %v4677_v10, %v6842_v62  ;;  %v3225_v50 = vpop.f32.mrb[127].mxu1 }
 0x482   :  { %v3369_v61 = vadd.f32 %v6847_v24, %v3301_v14  ;;  %v3302_v53 = vmul.f32 %v6842_v62, %v3225_v50  ;;  %v4983_v50 = vld [vmem:[#allocation2 + $0x1b8] sm:$0xff]  }
 0x483   :  { %v3372_v13 = vadd.f32 %v6847_v24, %v3304_v6  ;;  %v3435_v54 = vmax.f32 %v3371_v12, 0.0  ;;  %v4981_v12 = vld [vmem:[#allocation2 + $0x1a8] sm:$0xff]   ;;  %v4982_v6 = vld [vmem:[#allocation2 + $0x1b0] sm:$0xff]  }
 0x484   :  { %v3370_v35 = vadd.f32 %v6847_v24, %v3302_v53  ;;  %v3433_v19 = vmax.f32 %v3369_v61, 0.0  ;;  %v7249_v61 = vsub.s32 3, %v5794_v25 }
 0x485   :  { %v3436_v22 = vmax.f32 %v3372_v13, 0.0  ;;  %v7250_v13 = vsub.s32 4, %v5794_v25 }
 0x486   :  { %v3434_v8 = vmax.f32 %v3370_v35, 0.0 }
 0x487   :  { %v3654_v28 = vmax.f32 %v3435_v54, %v3436_v22 }
 0x488   :  { %v3647_v34 = vmax.f32 %v3433_v19, %v3434_v8 }
 0x489   :  { %v3655_v37 = vrot.slane %v3654_v28, 4 }
 0x48a   :  { %v3648_v60 = vrot.slane %v3647_v34, 4 }
 0x48b   :  { %v3656_v31 = vmax.f32 %v3654_v28, %v3655_v37 }
 0x48c   :  { %v3649_v5 = vmax.f32 %v3647_v34, %v3648_v60 }
 0x48d   :  { %v3657_v7 = vrot.slane %v3656_v31, 2 }
 0x48e   :  { %v3650_v43 = vrot.slane %v3649_v5, 2 }
 0x48f   :  { %v3658_v33 = vmax.f32 %v3656_v31, %v3657_v7 }
 0x490   :  { %v3651_v47 = vmax.f32 %v3649_v5, %v3650_v43 }
 0x491   :  { %v3659_v38 = vrot.slane %v3658_v33, 1 }
 0x492   :  { %v3652_v62 = vrot.slane %v3651_v47, 1 }
 0x493   :  { %v3660_v48 = vmax.f32 %v3658_v33, %v3659_v38 }
 0x494   :  { %v3653_v20 = vmax.f32 %v3651_v47, %v3652_v62 }
 0x495   :  { %v3767_v59 = vpack.c.bf16 %v3660_v48, %v3660_v48 }
 0x496   :  { %v3726_v24 = vsel %vm3703_vm5, %v3653_v20, %v3725_v36  ;;  %v3766_v2 = vpack.c.bf16 %v3653_v20, %v3653_v20 }
 0x497   :  { %v3727_v15 = vsel %vm3705_vm6, %v3660_v48, %v3726_v24  ;;  %v3847_v3 = vunpack.c.l.b16 %v3767_v59 }
 0x498   :  { %v3846_v23 = vunpack.c.l.b16 %v3766_v2  ;;  %3735 = vst [vmem:[#allocation5 + $0x18] sm:$0xff] %v3727_v15 }
 0x49a   :  { %v3874_v0 = vsel %vm3703_vm5, %v3846_v23, %v3873_v21 }
 0x49b   :  { %v3875_v27 = vsel %vm3705_vm6, %v3847_v3, %v3874_v0 }
 0x49c   :  { %v3877_v16 = vpack.c.b16 %v3875_v27, %v7057_v11  ;;  %v7101_v11 = vld [vmem:[%s7151_s3 + $0x8] sm:$0x3f]  ;;  %s5085_s3 = smov [#allocation5]  }
 0x49d   :  { %v3980_v57 = vrot.slane %v7101_v11, %v7247_v45  ;;  %v3988_v46 = vrot.slane %v7101_v11, %v7248_v63  ;;  %v4115_v53 = vrot.slane %v7101_v11, %v7249_v61  ;;  %v4123_v35 = vrot.slane %v7101_v11, %v7250_v13  ;;  %s4260_s23 = sshll.u32 %s5085_s3, 4  ;;  %s4261_s23 = int_to_ptr.vmem [resolvable:$true] %s4260_s23 }
 0x49e   :  { %4695 = vmatmul.mubr.bf16.vlgmr.msra.gmra.mrb[128].mxu1 %v3877_v16  ;;  %s5029_s1 = scalar_lea.vmem %s4261_s23, 512  ;;  %p5034_p9 = scmp.lt.s32.totalorder %s4261_s23, %s4261_s23 }
 0x49f   :  { %4719 = vmatpush3.bf16.msra.mxu1 %v4976_v26  ;;  %p5030_p8 = scmp.ne.s32.totalorder %s4261_s23, %s5029_s1  ;;  %p5035_p10 = scmp.lt.s32.totalorder %s5029_s1, %s5029_s1 }
 0x4a0   :  { %4720 = vmatprep.subr.bf16.mxu1 %v4977_v32 }
 0x4a1   :  { %p5036_p11 = por %p5035_p10, %p5034_p9 }
 0x4a3   :  { %4721 = vmatpush3.bf16.msra.mxu1 %v4977_v32  ;;  %p5037_p12 = pnand %p5036_p11, %p5030_p8 }
 0x4a4   :  { %4722 = vmatprep.subr.bf16.mxu1 %v4978_v51 }
 0x4a7   :  { %4723 = vmatpush3.bf16.msra.mxu1 %v4978_v51 }
 0x4a8   :  { %4724 = vmatprep.subr.bf16.mxu1 %v4979_v17 }
 0x4ab   :  { %4725 = vmatpush3.bf16.msra.mxu1 %v4979_v17 }
 0x4ac   :  { %4726 = vmatprep.subr.bf16.mxu1 %v4980_v42 }
 0x4af   :  { %4727 = vmatpush3.bf16.msra.mxu1 %v4980_v42 }
 0x4b0   :  { %4728 = vmatprep.subr.bf16.mxu1 %v4981_v12 }
 0x4b3   :  { %4729 = vmatpush3.bf16.msra.mxu1 %v4981_v12 }
 0x4b4   :  { %4730 = vmatprep.subr.bf16.mxu1 %v4982_v6 }
 0x4b7   :  { %4731 = vmatpush3.bf16.msra.mxu1 %v4982_v6 }
 0x4b8   :  { %4732 = vmatprep.subr.bf16.mxu1 %v4983_v50 }
 0x4bb   :  { %4733 = vmatpush3.bf16.msra.mxu1 %v4983_v50 }
 0x571   :  { %v4696_v56 = vpop.f32.mrb[128].mxu1 }
 0x572   :  { %v3983_v52 = vmul.f32 %v4696_v56, %v3980_v57  ;;  %v3962_v30 = vpop.f32.mrb[129].mxu1 }
 0x573   :  { %v3981_v41 = vmul.f32 %v3980_v57, %v3962_v30  ;;  %v4697_v49 = vpop.f32.mrb[130].mxu1 }
 0x574   :  { %v3991_v58 = vadd.f32 %v3988_v46, %v3983_v52  ;;  %v3984_v40 = vmul.f32 %v4697_v49, %v3980_v57  ;;  %v3965_v29 = vpop.f32.mrb[131].mxu1 }
 0x575   :  { %v3989_v36 = vadd.f32 %v3988_v46, %v3981_v41  ;;  %v3982_v39 = vmul.f32 %v3980_v57, %v3965_v29 }
 0x576   :  { %v3992_v18 = vadd.f32 %v3988_v46, %v3984_v40  ;;  %v3995_v21 = vmax.f32 %v3991_v58, 0.0 }
 0x577   :  { %v3990_v1 = vadd.f32 %v3988_v46, %v3982_v39  ;;  %v3993_v4 = vmax.f32 %v3989_v36, 0.0 }
 0x578   :  { %v3996_v9 = vmax.f32 %v3992_v18, 0.0 }
 0x579   :  { %v3994_v55 = vmax.f32 %v3990_v1, 0.0 }
 0x57a   :  { %v3998_v14 = vpack.c.bf16 %v3996_v9, %v3995_v21 }
 0x57b   :  { %v3997_v10 = vpack.c.bf16 %v3994_v55, %v3993_v4 }
 0x57d   :  { %4714 = vmatprep.mubr.bf16.mxu0 %v3997_v10 }
 0x57e   :  { %4715 = vmatmul.mubr.bf16.vlgmr.msra.gmra.mrb[128].mxu0 %v3998_v14 }
 0x651   :  { %v4716_v54 = vpop.f32.mrb[128].mxu0 }
 0x652   :  { %v4118_v22 = vmul.f32 %v4716_v54, %v4115_v53  ;;  %v4097_v19 = vpop.f32.mrb[129].mxu0 }
 0x653   :  { %v4116_v8 = vmul.f32 %v4115_v53, %v4097_v19  ;;  %v4717_v28 = vpop.f32.mrb[130].mxu0 }
 0x654   :  { %v4126_v34 = vadd.f32 %v4123_v35, %v4118_v22  ;;  %v4119_v37 = vmul.f32 %v4717_v28, %v4115_v53  ;;  %v4100_v60 = vpop.f32.mrb[131].mxu0 }
 0x655   :  { %v4124_v31 = vadd.f32 %v4123_v35, %v4116_v8  ;;  %v4117_v5 = vmul.f32 %v4115_v53, %v4100_v60 }
 0x656   :  { %v4127_v7 = vadd.f32 %v4123_v35, %v4119_v37  ;;  %v4130_v33 = vmax.f32 %v4126_v34, 0.0 }
 0x657   :  { %v4125_v43 = vadd.f32 %v4123_v35, %v4117_v5  ;;  %v4128_v38 = vmax.f32 %v4124_v31, 0.0 }
 0x658   :  { %v4131_v47 = vmax.f32 %v4127_v7, 0.0 }
 0x659   :  { %v4129_v62 = vmax.f32 %v4125_v43, 0.0 }
 0x65a   :  { %v4133_v48 = vpack.c.bf16 %v4131_v47, %v4130_v33 }
 0x65b   :  { %v4132_v20 = vpack.c.bf16 %v4129_v62, %v4128_v38 }
 0x65d   :  { %4734 = vmatprep.mubr.bf16.mxu1 %v4132_v20 }
 0x65e   :  { %4735 = vmatmul.mubr.bf16.vlgmr.msra.gmra.mrb[132].mxu1 %v4133_v48 }
 0x65f   :  { %5040 = shalt.err (!%p5037_p12)
}
 0x660   :  { %s5041_s26 = scalar_lea.hbm %s7152_s4, 512 }
 0x661   :  { %p5042_p13 = scmp.ne.s32.totalorder %s7152_s4, %s5041_s26  ;;  %p5045_p0 = scmp.lt.u32.totalorder %s5041_s26, %s7152_s4 }
 0x663   :  { %p5047_p1 = pnand %p5045_p0, %p5042_p13 }
 0x665   :  { %5050 = shalt.err (!%p5047_p1)
}
 0x666   :  { %s5086_s6 = smov 128   ;;  %s5087_s7 = smov 8   ;;  %v4153_v59 = vrot.slane %v7101_v11, %v2654_v44 }
 0x667   :  { %4266 = dma.vmem_to_hbm [thread:$0]  %s4261_s23, 512, %s7152_s4, [#allocation4], %s5086_s6, %s5086_s6, %s5087_s7  }
 0x668   :  { %s5088_s10 = smov [#allocation6]  }
 0x669   :  { %s4272_s2 = sshll.u32 %s5088_s10, 4  ;;  %s4273_s2 = int_to_ptr.vmem [resolvable:$true] %s4272_s2 }
 0x66a   :  { %s5051_s4 = scalar_lea.vmem %s4273_s2, 512  ;;  %p5056_p3 = scmp.lt.s32.totalorder %s4273_s2, %s4273_s2 }
 0x66b   :  { %p5052_p2 = scmp.ne.s32.totalorder %s4273_s2, %s5051_s4  ;;  %p5057_p4 = scmp.lt.s32.totalorder %s5051_s4, %s5051_s4 }
 0x66d   :  { %p5058_p5 = por %p5057_p4, %p5056_p3 }
 0x66f   :  { %p5059_p6 = pnand %p5058_p5, %p5052_p2 }
 0x731   :  { %v4736_v24 = vpop.f32.mrb[132].mxu1 }
 0x732   :  { %v4245_v2 = vadd.f32 %v4736_v24, %v4153_v59  ;;  %v4236_v15 = vpop.f32.mrb[133].mxu1 }
 0x733   :  { %v4237_v23 = vadd.f32 %v4236_v15, %v4153_v59  ;;  %v4737_v3 = vpop.f32.mrb[134].mxu1 }
 0x734   :  { %4253 = vst [vmem:[#allocation6 + $0x10] sm:$0xff] %v4245_v2  ;;  %v4248_v0 = vadd.f32 %v4737_v3, %v4153_v59  ;;  %v4239_v27 = vpop.f32.mrb[135].mxu1 }
 0x735   :  { %4251 = vst [vmem:[#allocation6] sm:$0xff] %v4237_v23  ;;  %v4240_v16 = vadd.f32 %v4239_v27, %v4153_v59 }
 0x736   :  { %4254 = vst [vmem:[#allocation6 + $0x18] sm:$0xff] %v4248_v0 }
 0x737   :  { %4252 = vst [vmem:[#allocation6 + $0x8] sm:$0xff] %v4240_v16 }
 0x738   :  { %5062 = shalt.err (!%p5059_p6)
}
 0x739   :  { %s5063_s13 = scalar_lea.hbm %s7153_s5, 512 }
 0x73a   :  { %p5064_p7 = scmp.ne.s32.totalorder %s7153_s5, %s5063_s13  ;;  %p5067_p8 = scmp.lt.u32.totalorder %s5063_s13, %s7153_s5 }
 0x73c   :  { %p5069_p9 = pnand %p5067_p8, %p5064_p7 }
 0x73e   :  { %5072 = shalt.err (!%p5069_p9)
}
 0x73f   :  { %4278 = dma.vmem_to_hbm [thread:$0]  %s4273_s2, 512, %s7153_s5, [#allocation7], %s5086_s6, %s5086_s6, %s5087_s7  }
 0x740   :  { %5075 = dma.done.wait [#allocation4], 512  }
 0x741   :  { %5076 = vsyncadd [#allocation4], 4294966784 }
 0x742   :  { %5077 = dma.done.wait [#allocation7], 512  }
 0x743   :  { %5078 = vsyncadd [#allocation7], 4294966784 }
 0x744   :  { %4285 = vsyncpa [#allocation3], 1 }
 0x745   :  { %4286 = vsyncpa [#allocation4], 1 }
 0x746   :  { %4287 = vsyncpa [#allocation7], 1 }

</bundles_post_ra>
